<compile_context>
chip_gen: v7x
topology: tpu7x:2x2x1
jax: 0.10.0
libtpu: 0.0.40
codegen_flags: <defaults>
</compile_context>

<pallas_src>
import jax
import jax.numpy as jnp
from jax.experimental import pallas as pl
from jax.experimental.pallas import tpu as pltpu

BN_EPS = 1e-5
LANE = 128


# ----------------------------- small helpers --------------------------------

def _elu(x):
    # ELU(alpha=1.0); exp(min(x,0)) keeps the false branch overflow-safe.
    return jnp.where(x > 0, x, jnp.exp(jnp.minimum(x, 0.0)) - 1.0)


def _round_up(x, m):
    return (x + m - 1) // m * m


def _vmem_limit_bytes():
    # Budget VMEM conservatively so the same tiling works on v7x (64 MiB/TC).
    try:
        cap = int(pltpu.get_tpu_info().vmem_capacity_bytes)
    except Exception:
        cap = 64 * 2 ** 20
    return min(64 * 2 ** 20, max(16 * 2 ** 20, int(cap * 0.6)))


def _choose_tile_h(H, W, cin_p, cp, max_rows, budget_bytes):
    """Largest divisor-of-H tile whose per-step working set fits the budget."""
    wpad = W + 2
    best = 1
    for th in range(1, H + 1):
        if H % th:
            continue
        rows = th * W
        if rows > max_rows:
            continue
        # double-buffered blocked tiles (f32) + in-kernel im2col temporaries
        tiles = 2 * 4 * (th * wpad * cin_p + th * wpad * cp + 2 * th * W * cp)
        temps = rows * 9 * max(cin_p, cp) * (4 + 2) + 8 * rows * cp
        if tiles + temps <= budget_bytes:
            best = th
    return best


def _pad_conv_w(w_9io, cin_p, cout_p):
    # (9, Cin, Cout) -> (9*Cin_p, Cout_p) bf16, tap-major rows (matches im2col).
    k, cin, cout = w_9io.shape
    wfull = jnp.zeros((k, cin_p, cout_p), jnp.float32).at[:, :cin, :cout].set(w_9io)
    return wfull.reshape(k * cin_p, cout_p).astype(jnp.bfloat16)


def _pad_mat(w_io, cin_p, cout_p):
    cin, cout = w_io.shape
    return (jnp.zeros((cin_p, cout_p), jnp.float32)
            .at[:cin, :cout].set(w_io).astype(jnp.bfloat16))


def _pad_vec(v, cp, fill=0.0):
    return jnp.full((1, cp), fill, jnp.float32).at[:, :v.shape[-1]].set(v)


def _bn_scale_shift(stats, count, gamma, beta):
    # stats: (N, nh, 2, Cp) per-tile [sum, sumsq]; finish BN in f32, clamp var.
    s = jnp.sum(stats[:, :, 0, :], axis=(0, 1))
    ss = jnp.sum(stats[:, :, 1, :], axis=(0, 1))
    mean = s / count
    var = jnp.maximum(ss / count - mean * mean, 0.0)
    scale = gamma[0] * jax.lax.rsqrt(var + BN_EPS)
    shift = beta[0] - mean * scale
    return scale.reshape(1, -1), shift.reshape(1, -1)


# ------------------------------ Pallas kernels -------------------------------

def _make_kernels(H, W, TH, Cin_p, Cp):
    Wp = W + 2
    R = TH * W  # flattened rows per tile

    def _im2col(xpad, c):
        # xpad: (TH+2, Wp, c) f32 -> (R, 9*c) bf16 patch matrix (one fused-K dot)
        cols = []
        for ky in range(3):
            for kx in range(3):
                cols.append(xpad[ky:ky + TH, kx:kx + W, :].reshape(R, c))
        return jnp.concatenate(cols, axis=1).astype(jnp.bfloat16)

    def _partial_stats(v):
        s = jnp.sum(v, axis=0, keepdims=True)
        ss = jnp.sum(v * v, axis=0, keepdims=True)
        return jnp.concatenate([s, ss], axis=0).reshape(1, 1, 2, Cp)

    def conv1_kernel(x_ref, xtop_ref, xbot_ref, w1_ref, b1_ref, wp_ref, bp_ref,
                     z1_ref, pr_ref, st1_ref, stp_ref):
        xt = x_ref[0]                                                # (TH, Wp, Cin_p)
        xpad = jnp.concatenate([xtop_ref[0], xt, xbot_ref[0]], axis=0)

        patches = _im2col(xpad, Cin_p)                               # (R, 9*Cin_p) bf16
        z = jnp.dot(patches, w1_ref[...],
                    preferred_element_type=jnp.float32) + b1_ref[...]

        xv = xt[:, 1:1 + W, :].reshape(R, Cin_p).astype(jnp.bfloat16)
        p = jnp.dot(xv, wp_ref[...],
                    preferred_element_type=jnp.float32) + bp_ref[...]

        st1_ref[...] = _partial_stats(z)
        stp_ref[...] = _partial_stats(p)

        # store z1 with replicated W columns so pass 2 needs no pad copy
        zw = z.reshape(TH, W, Cp)
        z1_ref[...] = jnp.concatenate([zw[:, :1], zw, zw[:, -1:]],
                                      axis=1).reshape(1, TH, Wp, Cp)
        pr_ref[...] = p.reshape(1, TH, W, Cp)

    def conv2_kernel(z_ref, ztop_ref, zbot_ref, w2_ref, b2_ref, s1_ref, t1_ref,
                     z2_ref, st2_ref):
        zpad = jnp.concatenate([ztop_ref[0], z_ref[0], zbot_ref[0]], axis=0)
        # BN1 affine + ELU fused here (applied to halo too) -> y1 never hits HBM.
        y1 = _elu(zpad * s1_ref[...] + t1_ref[...])

        patches = _im2col(y1, Cp)
        z2 = jnp.dot(patches, w2_ref[...],
                     preferred_element_type=jnp.float32) + b2_ref[...]

        st2_ref[...] = _partial_stats(z2)
        z2_ref[...] = z2.reshape(1, TH, W, Cp)

    def finish_kernel(z2_ref, pr_ref, s2_ref, t2_ref, sp_ref, tp_ref, o_ref):
        y = (z2_ref[...] * s2_ref[...] + t2_ref[...]
             + pr_ref[...] * sp_ref[...] + tp_ref[...])
        o_ref[...] = _elu(y)

    return conv1_kernel, conv2_kernel, finish_kernel


# --------------------------------- wrapper -----------------------------------

def residual_block_2d_c2_forward(x_nchw, params, *, max_rows_per_tile=1024):
    x = jnp.transpose(x_nchw, (0, 2, 3, 1)).astype(jnp.float32)   # NCHW -> NHWC
    N, H, W, Cin = x.shape
    Cout = params["w1"].shape[-1]
    Cin_p = _round_up(Cin, LANE)
    Cp = _round_up(Cout, LANE)
    Wp = W + 2

    vmem_limit = _vmem_limit_bytes()
    TH = _choose_tile_h(H, W, Cin_p, Cp, max_rows_per_tile, vmem_limit // 2)
    nh = H // TH

    # parameter packing: channel-padded (lane-dense) weights as bf16 MXU operands
    w1 = _pad_conv_w(params["w1"], Cin_p, Cp)
    w2 = _pad_conv_w(params["w2"], Cp, Cp)
    wproj = _pad_mat(params["wp"], Cin_p, Cp)
    b1 = _pad_vec(params["b1"], Cp)
    b2 = _pad_vec(params["b2"], Cp)
    bp = _pad_vec(params["bp"], Cp)
    g1 = _pad_vec(params["g1"], Cp, 1.0)
    g2 = _pad_vec(params["g2"], Cp, 1.0)
    gp = _pad_vec(params["gp"], Cp, 1.0)
    bt1 = _pad_vec(params["bt1"], Cp)
    bt2 = _pad_vec(params["bt2"], Cp)
    btp = _pad_vec(params["btp"], Cp)

    # channel pad + W replication pad; the H halo comes from clamped index maps.
    x_cp = jnp.pad(x, ((0, 0), (0, 0), (0, 0), (0, Cin_p - Cin)))
    x_wp = jnp.pad(x_cp, ((0, 0), (0, 0), (1, 1), (0, 0)), mode="edge")

    conv1_k, conv2_k, finish_k = _make_kernels(H, W, TH, Cin_p, Cp)

    cparams = pltpu.CompilerParams(
        dimension_semantics=("parallel", "parallel"),
        vmem_limit_bytes=vmem_limit)

    def tile_spec(c, w):
        return pl.BlockSpec((1, TH, w, c), lambda n, h: (n, h, 0, 0))

    def halo_spec(c, w, row_of):
        # single-row block: block index along H == element row index
        return pl.BlockSpec((1, 1, w, c), lambda n, h: (n, row_of(h), 0, 0))

    def const_spec(shape):
        return pl.BlockSpec(shape, lambda n, h: (0,) * len(shape))

    top_row = lambda h: jnp.maximum(h * TH - 1, 0)        # replication-clamped
    bot_row = lambda h: jnp.minimum(h * TH + TH, H - 1)

    stat_spec = pl.BlockSpec((1, 1, 2, Cp), lambda n, h: (n, h, 0, 0))
    grid = (N, nh)
    count = float(N * H * W)

    # pass 1: conv1 + projector + BN partial stats
    z1, proj, st1, stp = pl.pallas_call(
        conv1_k,
        grid=grid,
        in_specs=[tile_spec(Cin_p, Wp),
                  halo_spec(Cin_p, Wp, top_row),
                  halo_spec(Cin_p, Wp, bot_row),
                  const_spec((9 * Cin_p, Cp)),
                  const_spec((1, Cp)),
                  const_spec((Cin_p, Cp)),
                  const_spec((1, Cp))],
        out_specs=[tile_spec(Cp, Wp), tile_spec(Cp, W), stat_spec, stat_spec],
        out_shape=[jax.ShapeDtypeStruct((N, H, Wp, Cp), jnp.float32),
                   jax.ShapeDtypeStruct((N, H, W, Cp), jnp.float32),
                   jax.ShapeDtypeStruct((N, nh, 2, Cp), jnp.float32),
                   jax.ShapeDtypeStruct((N, nh, 2, Cp), jnp.float32)],
        compiler_params=cparams,
    )(x_wp, x_wp, x_wp, w1, b1, wproj, bp)

    s1, t1 = _bn_scale_shift(st1, count, g1, bt1)
    sp_, tp_ = _bn_scale_shift(stp, count, gp, btp)

    # pass 2: fused BN1+ELU, conv2, BN2 partial stats
    z2, st2 = pl.pallas_call(
        conv2_k,
        grid=grid,
        in_specs=[tile_spec(Cp, Wp),
                  halo_spec(Cp, Wp, top_row),
                  halo_spec(Cp, Wp, bot_row),
                  const_spec((9 * Cp, Cp)),
                  const_spec((1, Cp)),
                  const_spec((1, Cp)),
                  const_spec((1, Cp))],
        out_specs=[tile_spec(Cp, W), stat_spec],
        out_shape=[jax.ShapeDtypeStruct((N, H, W, Cp), jnp.float32),
                   jax.ShapeDtypeStruct((N, nh, 2, Cp), jnp.float32)],
        compiler_params=cparams,
    )(z1, z1, z1, w2, b2, s1, t1)

    s2, t2 = _bn_scale_shift(st2, count, g2, bt2)

    # pass 3: BN2/BNp affines + residual add + final ELU (elementwise)
    out = pl.pallas_call(
        finish_k,
        grid=grid,
        in_specs=[tile_spec(Cp, W), tile_spec(Cp, W),
                  const_spec((1, Cp)), const_spec((1, Cp)),
                  const_spec((1, Cp)), const_spec((1, Cp))],
        out_specs=tile_spec(Cp, W),
        out_shape=jax.ShapeDtypeStruct((N, H, W, Cp), jnp.float32),
        compiler_params=cparams,
    )(z2, proj, s2, t2, sp_, tp_)

    out = out[..., :Cout]                     # drop channel padding
    return jnp.transpose(out, (0, 3, 1, 2))   # NHWC -> NCHW


# --------------------------- pure-JAX reference -------------------------------
# The reference uses the same MXU input precision as the kernel (bf16 conv
# operands, f32 accumulation); everything else is f32.

def _bn_train_ref(x_nhwc, gamma, beta):
    mean = jnp.mean(x_nhwc, axis=(0, 1, 2), keepdims=True)
    var = jnp.mean(jnp.square(x_nhwc - mean), axis=(0, 1, 2), keepdims=True)
    return (x_nhwc - mean) * jax.lax.rsqrt(var + BN_EPS) * gamma + beta


def _conv3x3_rep_ref(x_nhwc, w_9io, b):
    cin, cout = w_9io.shape[1], w_9io.shape[2]
    w_hwio = w_9io.reshape(3, 3, cin, cout).astype(jnp.bfloat16)
    xp = jnp.pad(x_nhwc, ((0, 0), (1, 1), (1, 1), (0, 0)),
                 mode="edge").astype(jnp.bfloat16)
    y = jax.lax.conv_general_dilated(
        xp, w_hwio, window_strides=(1, 1), padding="VALID",
        dimension_numbers=("NHWC", "HWIO", "NHWC"),
        preferred_element_type=jnp.float32)
    return y + b.reshape(1, 1, 1, -1)


def reference_forward(x_nchw, p):
    x = jnp.transpose(x_nchw, (0, 2, 3, 1)).astype(jnp.float32)
    y = _conv3x3_rep_ref(x, p["w1"], p["b1"])
    y = jax.nn.elu(_bn_train_ref(y, p["g1"], p["bt1"]))
    y = _conv3x3_rep_ref(y, p["w2"], p["b2"])
    y = _bn_train_ref(y, p["g2"], p["bt2"])
    proj = jnp.einsum("nhwc,co->nhwo", x.astype(jnp.bfloat16),
                      p["wp"].astype(jnp.bfloat16),
                      preferred_element_type=jnp.float32)
    proj = proj + p["bp"].reshape(1, 1, 1, -1)
    proj = _bn_train_ref(proj, p["gp"], p["btp"])
    out = jax.nn.elu(y + proj)
    return jnp.transpose(out, (0, 3, 1, 2))


# ----------------------------------- main -------------------------------------

def make_params(key, in_planes, out_planes):
    ks = jax.random.split(key, 12)
    s1 = 1.0 / jnp.sqrt(in_planes * 9.0)
    s2 = 1.0 / jnp.sqrt(out_planes * 9.0)
    sp = 1.0 / jnp.sqrt(float(in_planes))
    return {
        "w1": jax.random.normal(ks[0], (9, in_planes, out_planes), jnp.float32) * s1,
        "b1": jax.random.normal(ks[1], (1, out_planes), jnp.float32) * s1,
        "g1": 1.0 + 0.1 * jax.random.normal(ks[2], (1, out_planes), jnp.float32),
        "bt1": 0.1 * jax.random.normal(ks[3], (1, out_planes), jnp.float32),
        "w2": jax.random.normal(ks[4], (9, out_planes, out_planes), jnp.float32) * s2,
        "b2": jax.random.normal(ks[5], (1, out_planes), jnp.float32) * s2,
        "g2": 1.0 + 0.1 * jax.random.normal(ks[6], (1, out_planes), jnp.float32),
        "bt2": 0.1 * jax.random.normal(ks[7], (1, out_planes), jnp.float32),
        "wp": jax.random.normal(ks[8], (in_planes, out_planes), jnp.float32) * sp,
        "bp": jax.random.normal(ks[9], (1, out_planes), jnp.float32) * sp,
        "gp": 1.0 + 0.1 * jax.random.normal(ks[10], (1, out_planes), jnp.float32),
        "btp": 0.1 * jax.random.normal(ks[11], (1, out_planes), jnp.float32),
    }


if __name__ == "__main__":
    key = jax.random.PRNGKey(0)
    kx, kp = jax.random.split(key)

    N, Cin, Cout, H, W = 2, 4, 8, 16, 16
    x = jax.random.normal(kx, (N, Cin, H, W), jnp.float32)   # NCHW like PyTorch
    params = make_params(kp, Cin, Cout)

    # max_rows_per_tile=128 so the toy shape still exercises the multi-tile
    # spatial grid and the replication-clamped halo index maps.
    fwd = jax.jit(lambda xx, pp: residual_block_2d_c2_forward(
        xx, pp, max_rows_per_tile=128))
    out = jax.block_until_ready(fwd(x, params))
    assert out.shape == (N, Cout, H, W), out.shape

    ref = jax.block_until_ready(jax.jit(reference_forward)(x, params))
    if not jnp.allclose(out, ref, atol=2e-3, rtol=2e-3):
        err = float(jnp.max(jnp.abs(out - ref)))
        raise AssertionError(
            f"Pallas result does not match JAX reference (max abs err {err:.3e})")
    print("KERNEL_OK")
</pallas_src>

<mosaic_0001>
module attributes {stable_mosaic.version = 11 : i64} {
  func.func @conv1_kernel(%arg0: i32, %arg1: i32, %arg2: memref<1x8x18x128xf32, #tpu.memory_space<vmem>>, %arg3: memref<1x1x18x128xf32, #tpu.memory_space<vmem>>, %arg4: memref<1x1x18x128xf32, #tpu.memory_space<vmem>>, %arg5: memref<1152x128xbf16, #tpu.memory_space<vmem>>, %arg6: memref<1x128xf32, #tpu.memory_space<vmem>>, %arg7: memref<128x128xbf16, #tpu.memory_space<vmem>>, %arg8: memref<1x128xf32, #tpu.memory_space<vmem>>, %arg9: memref<1x8x18x128xf32, #tpu.memory_space<vmem>>, %arg10: memref<1x8x16x128xf32, #tpu.memory_space<vmem>>, %arg11: memref<1x1x2x128xf32, #tpu.memory_space<vmem>>, %arg12: memref<1x1x2x128xf32, #tpu.memory_space<vmem>>) attributes {dimension_semantics = [#tpu.dimension_semantics<parallel>, #tpu.dimension_semantics<parallel>], iteration_bounds = array<i64: 2, 2>, scalar_prefetch = 0 : i64, scratch_operands = 0 : i64, tpu.core_type = #tpu.core_type<tc>, window_params = [{transform_indices = @transform_0, window_bounds = array<i64: 1, 8, 18, 128>}, {transform_indices = @transform_1, window_bounds = array<i64: 1, 1, 18, 128>}, {transform_indices = @transform_2, window_bounds = array<i64: 1, 1, 18, 128>}, {pipeline_mode = #tpu.pipeline_mode<synchronous>, transform_indices = @transform_3, window_bounds = array<i64: 1152, 128>}, {pipeline_mode = #tpu.pipeline_mode<synchronous>, transform_indices = @transform_4, window_bounds = array<i64: 1, 128>}, {pipeline_mode = #tpu.pipeline_mode<synchronous>, transform_indices = @transform_5, window_bounds = array<i64: 128, 128>}, {pipeline_mode = #tpu.pipeline_mode<synchronous>, transform_indices = @transform_6, window_bounds = array<i64: 1, 128>}, {transform_indices = @transform_7, window_bounds = array<i64: 1, 8, 18, 128>}, {transform_indices = @transform_8, window_bounds = array<i64: 1, 8, 16, 128>}, {transform_indices = @transform_9, window_bounds = array<i64: 1, 1, 2, 128>}, {transform_indices = @transform_10, window_bounds = array<i64: 1, 1, 2, 128>}]} {
    %c0 = arith.constant 0 : index
    %c0_0 = arith.constant 0 : index
    %c0_1 = arith.constant 0 : index
    %c0_2 = arith.constant 0 : index
    %0 = vector.load %arg2[%c0, %c0_0, %c0_1, %c0_2] : memref<1x8x18x128xf32, #tpu.memory_space<vmem>>, vector<1x8x18x128xf32>
    %1 = vector.shape_cast %0 : vector<1x8x18x128xf32> to vector<8x18x128xf32>
    %c0_3 = arith.constant 0 : index
    %c0_4 = arith.constant 0 : index
    %c0_5 = arith.constant 0 : index
    %c0_6 = arith.constant 0 : index
    %2 = vector.load %arg3[%c0_3, %c0_4, %c0_5, %c0_6] : memref<1x1x18x128xf32, #tpu.memory_space<vmem>>, vector<1x1x18x128xf32>
    %3 = vector.shape_cast %2 : vector<1x1x18x128xf32> to vector<1x18x128xf32>
    %c0_7 = arith.constant 0 : index
    %c0_8 = arith.constant 0 : index
    %c0_9 = arith.constant 0 : index
    %c0_10 = arith.constant 0 : index
    %4 = vector.load %arg4[%c0_7, %c0_8, %c0_9, %c0_10] : memref<1x1x18x128xf32, #tpu.memory_space<vmem>>, vector<1x1x18x128xf32>
    %5 = vector.shape_cast %4 : vector<1x1x18x128xf32> to vector<1x18x128xf32>
    %6 = tpu.concatenate %3, %1, %5 in 0 : vector<1x18x128xf32>, vector<8x18x128xf32>, vector<1x18x128xf32> -> vector<10x18x128xf32>
    %7 = vector.extract_strided_slice %6 {offsets = [0, 0, 0], sizes = [8, 16, 128], strides = [1, 1, 1]} : vector<10x18x128xf32> to vector<8x16x128xf32>
    %8 = vector.shape_cast %7 : vector<8x16x128xf32> to vector<128x128xf32>
    %9 = vector.extract_strided_slice %6 {offsets = [0, 1, 0], sizes = [8, 16, 128], strides = [1, 1, 1]} : vector<10x18x128xf32> to vector<8x16x128xf32>
    %10 = vector.shape_cast %9 : vector<8x16x128xf32> to vector<128x128xf32>
    %11 = vector.extract_strided_slice %6 {offsets = [0, 2, 0], sizes = [8, 16, 128], strides = [1, 1, 1]} : vector<10x18x128xf32> to vector<8x16x128xf32>
    %12 = vector.shape_cast %11 : vector<8x16x128xf32> to vector<128x128xf32>
    %13 = vector.extract_strided_slice %6 {offsets = [1, 0, 0], sizes = [8, 16, 128], strides = [1, 1, 1]} : vector<10x18x128xf32> to vector<8x16x128xf32>
    %14 = vector.shape_cast %13 : vector<8x16x128xf32> to vector<128x128xf32>
    %15 = vector.extract_strided_slice %6 {offsets = [1, 1, 0], sizes = [8, 16, 128], strides = [1, 1, 1]} : vector<10x18x128xf32> to vector<8x16x128xf32>
    %16 = vector.shape_cast %15 : vector<8x16x128xf32> to vector<128x128xf32>
    %17 = vector.extract_strided_slice %6 {offsets = [1, 2, 0], sizes = [8, 16, 128], strides = [1, 1, 1]} : vector<10x18x128xf32> to vector<8x16x128xf32>
    %18 = vector.shape_cast %17 : vector<8x16x128xf32> to vector<128x128xf32>
    %19 = vector.extract_strided_slice %6 {offsets = [2, 0, 0], sizes = [8, 16, 128], strides = [1, 1, 1]} : vector<10x18x128xf32> to vector<8x16x128xf32>
    %20 = vector.shape_cast %19 : vector<8x16x128xf32> to vector<128x128xf32>
    %21 = vector.extract_strided_slice %6 {offsets = [2, 1, 0], sizes = [8, 16, 128], strides = [1, 1, 1]} : vector<10x18x128xf32> to vector<8x16x128xf32>
    %22 = vector.shape_cast %21 : vector<8x16x128xf32> to vector<128x128xf32>
    %23 = vector.extract_strided_slice %6 {offsets = [2, 2, 0], sizes = [8, 16, 128], strides = [1, 1, 1]} : vector<10x18x128xf32> to vector<8x16x128xf32>
    %24 = vector.shape_cast %23 : vector<8x16x128xf32> to vector<128x128xf32>
    %25 = tpu.concatenate %8, %10, %12, %14, %16, %18, %20, %22, %24 in 1 : vector<128x128xf32>, vector<128x128xf32>, vector<128x128xf32>, vector<128x128xf32>, vector<128x128xf32>, vector<128x128xf32>, vector<128x128xf32>, vector<128x128xf32>, vector<128x128xf32> -> vector<128x1152xf32>
    %26 = arith.truncf %25 : vector<128x1152xf32> to vector<128x1152xbf16>
    %c0_11 = arith.constant 0 : index
    %c0_12 = arith.constant 0 : index
    %27 = vector.load %arg5[%c0_11, %c0_12] : memref<1152x128xbf16, #tpu.memory_space<vmem>>, vector<1152x128xbf16>
    %cst = arith.constant dense<0.000000e+00> : vector<128x128xf32>
    %28 = tpu.matmul %26, %27, %cst {dimension_numbers = #tpu.dot_dimension_numbers<[1], [0], [0], [1], [0, 0, 1, 1], [], []>} : vector<128x1152xbf16>, vector<1152x128xbf16>, vector<128x128xf32> -> vector<128x128xf32>
    %c0_13 = arith.constant 0 : index
    %c0_14 = arith.constant 0 : index
    %29 = vector.load %arg6[%c0_13, %c0_14] : memref<1x128xf32, #tpu.memory_space<vmem>>, vector<1x128xf32>
    %30 = vector.broadcast %29 : vector<1x128xf32> to vector<128x128xf32>
    %31 = arith.addf %28, %30 : vector<128x128xf32>
    %32 = vector.extract_strided_slice %1 {offsets = [0, 1, 0], sizes = [8, 16, 128], strides = [1, 1, 1]} : vector<8x18x128xf32> to vector<8x16x128xf32>
    %33 = vector.shape_cast %32 : vector<8x16x128xf32> to vector<128x128xf32>
    %34 = arith.truncf %33 : vector<128x128xf32> to vector<128x128xbf16>
    %c0_15 = arith.constant 0 : index
    %c0_16 = arith.constant 0 : index
    %35 = vector.load %arg7[%c0_15, %c0_16] : memref<128x128xbf16, #tpu.memory_space<vmem>>, vector<128x128xbf16>
    %cst_17 = arith.constant dense<0.000000e+00> : vector<128x128xf32>
    %36 = tpu.matmul %34, %35, %cst_17 {dimension_numbers = #tpu.dot_dimension_numbers<[1], [0], [0], [1], [0, 0, 1, 1], [], []>} : vector<128x128xbf16>, vector<128x128xbf16>, vector<128x128xf32> -> vector<128x128xf32>
    %c0_18 = arith.constant 0 : index
    %c0_19 = arith.constant 0 : index
    %37 = vector.load %arg8[%c0_18, %c0_19] : memref<1x128xf32, #tpu.memory_space<vmem>>, vector<1x128xf32>
    %38 = vector.broadcast %37 : vector<1x128xf32> to vector<128x128xf32>
    %39 = arith.addf %36, %38 : vector<128x128xf32>
    %cst_20 = arith.constant dense<0.000000e+00> : vector<128xf32>
    %40 = vector.multi_reduction <add>, %31, %cst_20 [0] : vector<128x128xf32> to vector<128xf32>
    %41 = vector.shape_cast %40 : vector<128xf32> to vector<1x128xf32>
    %42 = arith.mulf %31, %31 : vector<128x128xf32>
    %cst_21 = arith.constant dense<0.000000e+00> : vector<128xf32>
    %43 = vector.multi_reduction <add>, %42, %cst_21 [0] : vector<128x128xf32> to vector<128xf32>
    %44 = vector.shape_cast %43 : vector<128xf32> to vector<1x128xf32>
    %45 = tpu.concatenate %41, %44 in 0 : vector<1x128xf32>, vector<1x128xf32> -> vector<2x128xf32>
    %46 = vector.shape_cast %45 : vector<2x128xf32> to vector<1x1x2x128xf32>
    %c0_22 = arith.constant 0 : index
    %c0_23 = arith.constant 0 : index
    %c0_24 = arith.constant 0 : index
    %c0_25 = arith.constant 0 : index
    %47 = vector.load %arg11[%c0_22, %c0_23, %c0_24, %c0_25] : memref<1x1x2x128xf32, #tpu.memory_space<vmem>>, vector<1x1x2x128xf32>
    tpu.vector_store %arg11[%c0_22, %c0_23, %c0_24, %c0_25], %46 {strides = array<i32>} : memref<1x1x2x128xf32, #tpu.memory_space<vmem>>, vector<1x1x2x128xf32>,
    %cst_26 = arith.constant dense<0.000000e+00> : vector<128xf32>
    %48 = vector.multi_reduction <add>, %39, %cst_26 [0] : vector<128x128xf32> to vector<128xf32>
    %49 = vector.shape_cast %48 : vector<128xf32> to vector<1x128xf32>
    %50 = arith.mulf %39, %39 : vector<128x128xf32>
    %cst_27 = arith.constant dense<0.000000e+00> : vector<128xf32>
    %51 = vector.multi_reduction <add>, %50, %cst_27 [0] : vector<128x128xf32> to vector<128xf32>
    %52 = vector.shape_cast %51 : vector<128xf32> to vector<1x128xf32>
    %53 = tpu.concatenate %49, %52 in 0 : vector<1x128xf32>, vector<1x128xf32> -> vector<2x128xf32>
    %54 = vector.shape_cast %53 : vector<2x128xf32> to vector<1x1x2x128xf32>
    %c0_28 = arith.constant 0 : index
    %c0_29 = arith.constant 0 : index
    %c0_30 = arith.constant 0 : index
    %c0_31 = arith.constant 0 : index
    %55 = vector.load %arg12[%c0_28, %c0_29, %c0_30, %c0_31] : memref<1x1x2x128xf32, #tpu.memory_space<vmem>>, vector<1x1x2x128xf32>
    tpu.vector_store %arg12[%c0_28, %c0_29, %c0_30, %c0_31], %54 {strides = array<i32>} : memref<1x1x2x128xf32, #tpu.memory_space<vmem>>, vector<1x1x2x128xf32>,
    %56 = vector.shape_cast %31 : vector<128x128xf32> to vector<8x16x128xf32>
    %57 = vector.extract_strided_slice %56 {offsets = [0, 0, 0], sizes = [8, 1, 128], strides = [1, 1, 1]} : vector<8x16x128xf32> to vector<8x1x128xf32>
    %58 = vector.extract_strided_slice %56 {offsets = [0, 15, 0], sizes = [8, 1, 128], strides = [1, 1, 1]} : vector<8x16x128xf32> to vector<8x1x128xf32>
    %59 = tpu.concatenate %57, %56, %58 in 1 : vector<8x1x128xf32>, vector<8x16x128xf32>, vector<8x1x128xf32> -> vector<8x18x128xf32>
    %60 = vector.shape_cast %59 : vector<8x18x128xf32> to vector<1x8x18x128xf32>
    %c0_32 = arith.constant 0 : index
    %c0_33 = arith.constant 0 : index
    %c0_34 = arith.constant 0 : index
    %c0_35 = arith.constant 0 : index
    %61 = vector.load %arg9[%c0_32, %c0_33, %c0_34, %c0_35] : memref<1x8x18x128xf32, #tpu.memory_space<vmem>>, vector<1x8x18x128xf32>
    tpu.vector_store %arg9[%c0_32, %c0_33, %c0_34, %c0_35], %60 {strides = array<i32>} : memref<1x8x18x128xf32, #tpu.memory_space<vmem>>, vector<1x8x18x128xf32>,
    %62 = vector.shape_cast %39 : vector<128x128xf32> to vector<1x8x16x128xf32>
    %c0_36 = arith.constant 0 : index
    %c0_37 = arith.constant 0 : index
    %c0_38 = arith.constant 0 : index
    %c0_39 = arith.constant 0 : index
    %63 = vector.load %arg10[%c0_36, %c0_37, %c0_38, %c0_39] : memref<1x8x16x128xf32, #tpu.memory_space<vmem>>, vector<1x8x16x128xf32>
    tpu.vector_store %arg10[%c0_36, %c0_37, %c0_38, %c0_39], %62 {strides = array<i32>} : memref<1x8x16x128xf32, #tpu.memory_space<vmem>>, vector<1x8x16x128xf32>,
    return
  }
  func.func @transform_0(%arg0: i32, %arg1: i32) -> (i32, i32, i32, i32) {
    %c0_i32 = arith.constant 0 : i32
    %c0_i32_0 = arith.constant 0 : i32
    %c0_i32_1 = arith.constant 0 : i32
    return %arg0, %arg1, %c0_i32, %c0_i32_0 : i32, i32, i32, i32
  }
  func.func @transform_1(%arg0: i32, %arg1: i32) -> (i32, i32, i32, i32) {
    %c8_i32 = arith.constant 8 : i32
    %0 = arith.muli %arg1, %c8_i32 : i32
    %c1_i32 = arith.constant 1 : i32
    %1 = arith.subi %0, %c1_i32 : i32
    %c0_i32 = arith.constant 0 : i32
    %2 = arith.maxsi %1, %c0_i32 : i32
    %c0_i32_0 = arith.constant 0 : i32
    %c0_i32_1 = arith.constant 0 : i32
    %c0_i32_2 = arith.constant 0 : i32
    return %arg0, %2, %c0_i32_0, %c0_i32_1 : i32, i32, i32, i32
  }
  func.func @transform_2(%arg0: i32, %arg1: i32) -> (i32, i32, i32, i32) {
    %c8_i32 = arith.constant 8 : i32
    %0 = arith.muli %arg1, %c8_i32 : i32
    %c8_i32_0 = arith.constant 8 : i32
    %1 = arith.addi %0, %c8_i32_0 : i32
    %c15_i32 = arith.constant 15 : i32
    %2 = arith.minsi %1, %c15_i32 : i32
    %c0_i32 = arith.constant 0 : i32
    %c0_i32_1 = arith.constant 0 : i32
    %c0_i32_2 = arith.constant 0 : i32
    return %arg0, %2, %c0_i32, %c0_i32_1 : i32, i32, i32, i32
  }
  func.func @transform_3(%arg0: i32, %arg1: i32) -> (i32, i32) {
    %c0_i32 = arith.constant 0 : i32
    %c0_i32_0 = arith.constant 0 : i32
    %c0_i32_1 = arith.constant 0 : i32
    return %c0_i32, %c0_i32_0 : i32, i32
  }
  func.func @transform_4(%arg0: i32, %arg1: i32) -> (i32, i32) {
    %c0_i32 = arith.constant 0 : i32
    %c0_i32_0 = arith.constant 0 : i32
    %c0_i32_1 = arith.constant 0 : i32
    return %c0_i32, %c0_i32_0 : i32, i32
  }
  func.func @transform_5(%arg0: i32, %arg1: i32) -> (i32, i32) {
    %c0_i32 = arith.constant 0 : i32
    %c0_i32_0 = arith.constant 0 : i32
    %c0_i32_1 = arith.constant 0 : i32
    return %c0_i32, %c0_i32_0 : i32, i32
  }
  func.func @transform_6(%arg0: i32, %arg1: i32) -> (i32, i32) {
    %c0_i32 = arith.constant 0 : i32
    %c0_i32_0 = arith.constant 0 : i32
    %c0_i32_1 = arith.constant 0 : i32
    return %c0_i32, %c0_i32_0 : i32, i32
  }
  func.func @transform_7(%arg0: i32, %arg1: i32) -> (i32, i32, i32, i32) {
    %c0_i32 = arith.constant 0 : i32
    %c0_i32_0 = arith.constant 0 : i32
    %c0_i32_1 = arith.constant 0 : i32
    return %arg0, %arg1, %c0_i32, %c0_i32_0 : i32, i32, i32, i32
  }
  func.func @transform_8(%arg0: i32, %arg1: i32) -> (i32, i32, i32, i32) {
    %c0_i32 = arith.constant 0 : i32
    %c0_i32_0 = arith.constant 0 : i32
    %c0_i32_1 = arith.constant 0 : i32
    return %arg0, %arg1, %c0_i32, %c0_i32_0 : i32, i32, i32, i32
  }
  func.func @transform_9(%arg0: i32, %arg1: i32) -> (i32, i32, i32, i32) {
    %c0_i32 = arith.constant 0 : i32
    %c0_i32_0 = arith.constant 0 : i32
    %c0_i32_1 = arith.constant 0 : i32
    return %arg0, %arg1, %c0_i32, %c0_i32_0 : i32, i32, i32, i32
  }
  func.func @transform_10(%arg0: i32, %arg1: i32) -> (i32, i32, i32, i32) {
    %c0_i32 = arith.constant 0 : i32
    %c0_i32_0 = arith.constant 0 : i32
    %c0_i32_1 = arith.constant 0 : i32
    return %arg0, %arg1, %c0_i32, %c0_i32_0 : i32, i32, i32, i32
  }
}

module attributes {stable_mosaic.version = 11 : i64} {
  func.func @conv2_kernel(%arg0: i32, %arg1: i32, %arg2: memref<1x8x18x128xf32, #tpu.memory_space<vmem>>, %arg3: memref<1x1x18x128xf32, #tpu.memory_space<vmem>>, %arg4: memref<1x1x18x128xf32, #tpu.memory_space<vmem>>, %arg5: memref<1152x128xbf16, #tpu.memory_space<vmem>>, %arg6: memref<1x128xf32, #tpu.memory_space<vmem>>, %arg7: memref<1x128xf32, #tpu.memory_space<vmem>>, %arg8: memref<1x128xf32, #tpu.memory_space<vmem>>, %arg9: memref<1x8x16x128xf32, #tpu.memory_space<vmem>>, %arg10: memref<1x1x2x128xf32, #tpu.memory_space<vmem>>) attributes {dimension_semantics = [#tpu.dimension_semantics<parallel>, #tpu.dimension_semantics<parallel>], iteration_bounds = array<i64: 2, 2>, scalar_prefetch = 0 : i64, scratch_operands = 0 : i64, tpu.core_type = #tpu.core_type<tc>, window_params = [{transform_indices = @transform_0, window_bounds = array<i64: 1, 8, 18, 128>}, {transform_indices = @transform_1, window_bounds = array<i64: 1, 1, 18, 128>}, {transform_indices = @transform_2, window_bounds = array<i64: 1, 1, 18, 128>}, {pipeline_mode = #tpu.pipeline_mode<synchronous>, transform_indices = @transform_3, window_bounds = array<i64: 1152, 128>}, {pipeline_mode = #tpu.pipeline_mode<synchronous>, transform_indices = @transform_4, window_bounds = array<i64: 1, 128>}, {pipeline_mode = #tpu.pipeline_mode<synchronous>, transform_indices = @transform_5, window_bounds = array<i64: 1, 128>}, {pipeline_mode = #tpu.pipeline_mode<synchronous>, transform_indices = @transform_6, window_bounds = array<i64: 1, 128>}, {transform_indices = @transform_7, window_bounds = array<i64: 1, 8, 16, 128>}, {transform_indices = @transform_8, window_bounds = array<i64: 1, 1, 2, 128>}]} {
    %c0 = arith.constant 0 : index
    %c0_0 = arith.constant 0 : index
    %c0_1 = arith.constant 0 : index
    %c0_2 = arith.constant 0 : index
    %0 = vector.load %arg3[%c0, %c0_0, %c0_1, %c0_2] : memref<1x1x18x128xf32, #tpu.memory_space<vmem>>, vector<1x1x18x128xf32>
    %1 = vector.shape_cast %0 : vector<1x1x18x128xf32> to vector<1x18x128xf32>
    %c0_3 = arith.constant 0 : index
    %c0_4 = arith.constant 0 : index
    %c0_5 = arith.constant 0 : index
    %c0_6 = arith.constant 0 : index
    %2 = vector.load %arg2[%c0_3, %c0_4, %c0_5, %c0_6] : memref<1x8x18x128xf32, #tpu.memory_space<vmem>>, vector<1x8x18x128xf32>
    %3 = vector.shape_cast %2 : vector<1x8x18x128xf32> to vector<8x18x128xf32>
    %c0_7 = arith.constant 0 : index
    %c0_8 = arith.constant 0 : index
    %c0_9 = arith.constant 0 : index
    %c0_10 = arith.constant 0 : index
    %4 = vector.load %arg4[%c0_7, %c0_8, %c0_9, %c0_10] : memref<1x1x18x128xf32, #tpu.memory_space<vmem>>, vector<1x1x18x128xf32>
    %5 = vector.shape_cast %4 : vector<1x1x18x128xf32> to vector<1x18x128xf32>
    %6 = tpu.concatenate %1, %3, %5 in 0 : vector<1x18x128xf32>, vector<8x18x128xf32>, vector<1x18x128xf32> -> vector<10x18x128xf32>
    %c0_11 = arith.constant 0 : index
    %c0_12 = arith.constant 0 : index
    %7 = vector.load %arg7[%c0_11, %c0_12] : memref<1x128xf32, #tpu.memory_space<vmem>>, vector<1x128xf32>
    %8 = vector.shape_cast %7 : vector<1x128xf32> to vector<1x1x128xf32>
    %9 = vector.broadcast %8 : vector<1x1x128xf32> to vector<10x18x128xf32>
    %10 = arith.mulf %6, %9 : vector<10x18x128xf32>
    %c0_13 = arith.constant 0 : index
    %c0_14 = arith.constant 0 : index
    %11 = vector.load %arg8[%c0_13, %c0_14] : memref<1x128xf32, #tpu.memory_space<vmem>>, vector<1x128xf32>
    %12 = vector.shape_cast %11 : vector<1x128xf32> to vector<1x1x128xf32>
    %13 = vector.broadcast %12 : vector<1x1x128xf32> to vector<10x18x128xf32>
    %14 = arith.addf %10, %13 : vector<10x18x128xf32>
    %cst = arith.constant 0.000000e+00 : f32
    %15 = vector.broadcast %cst : f32 to vector<10x18x128xf32>
    %16 = arith.cmpf ogt, %14, %15 : vector<10x18x128xf32>
    %cst_15 = arith.constant 0.000000e+00 : f32
    %17 = vector.broadcast %cst_15 : f32 to vector<10x18x128xf32>
    %18 = arith.minimumf %14, %17 : vector<10x18x128xf32>
    %19 = math.exp %18 : vector<10x18x128xf32>
    %cst_16 = arith.constant 1.000000e+00 : f32
    %20 = vector.broadcast %cst_16 : f32 to vector<10x18x128xf32>
    %21 = arith.subf %19, %20 : vector<10x18x128xf32>
    %22 = arith.select %16, %14, %21 : vector<10x18x128xi1>, vector<10x18x128xf32>
    %23 = vector.extract_strided_slice %22 {offsets = [0, 0, 0], sizes = [8, 16, 128], strides = [1, 1, 1]} : vector<10x18x128xf32> to vector<8x16x128xf32>
    %24 = vector.shape_cast %23 : vector<8x16x128xf32> to vector<128x128xf32>
    %25 = vector.extract_strided_slice %22 {offsets = [0, 1, 0], sizes = [8, 16, 128], strides = [1, 1, 1]} : vector<10x18x128xf32> to vector<8x16x128xf32>
    %26 = vector.shape_cast %25 : vector<8x16x128xf32> to vector<128x128xf32>
    %27 = vector.extract_strided_slice %22 {offsets = [0, 2, 0], sizes = [8, 16, 128], strides = [1, 1, 1]} : vector<10x18x128xf32> to vector<8x16x128xf32>
    %28 = vector.shape_cast %27 : vector<8x16x128xf32> to vector<128x128xf32>
    %29 = vector.extract_strided_slice %22 {offsets = [1, 0, 0], sizes = [8, 16, 128], strides = [1, 1, 1]} : vector<10x18x128xf32> to vector<8x16x128xf32>
    %30 = vector.shape_cast %29 : vector<8x16x128xf32> to vector<128x128xf32>
    %31 = vector.extract_strided_slice %22 {offsets = [1, 1, 0], sizes = [8, 16, 128], strides = [1, 1, 1]} : vector<10x18x128xf32> to vector<8x16x128xf32>
    %32 = vector.shape_cast %31 : vector<8x16x128xf32> to vector<128x128xf32>
    %33 = vector.extract_strided_slice %22 {offsets = [1, 2, 0], sizes = [8, 16, 128], strides = [1, 1, 1]} : vector<10x18x128xf32> to vector<8x16x128xf32>
    %34 = vector.shape_cast %33 : vector<8x16x128xf32> to vector<128x128xf32>
    %35 = vector.extract_strided_slice %22 {offsets = [2, 0, 0], sizes = [8, 16, 128], strides = [1, 1, 1]} : vector<10x18x128xf32> to vector<8x16x128xf32>
    %36 = vector.shape_cast %35 : vector<8x16x128xf32> to vector<128x128xf32>
    %37 = vector.extract_strided_slice %22 {offsets = [2, 1, 0], sizes = [8, 16, 128], strides = [1, 1, 1]} : vector<10x18x128xf32> to vector<8x16x128xf32>
    %38 = vector.shape_cast %37 : vector<8x16x128xf32> to vector<128x128xf32>
    %39 = vector.extract_strided_slice %22 {offsets = [2, 2, 0], sizes = [8, 16, 128], strides = [1, 1, 1]} : vector<10x18x128xf32> to vector<8x16x128xf32>
    %40 = vector.shape_cast %39 : vector<8x16x128xf32> to vector<128x128xf32>
    %41 = tpu.concatenate %24, %26, %28, %30, %32, %34, %36, %38, %40 in 1 : vector<128x128xf32>, vector<128x128xf32>, vector<128x128xf32>, vector<128x128xf32>, vector<128x128xf32>, vector<128x128xf32>, vector<128x128xf32>, vector<128x128xf32>, vector<128x128xf32> -> vector<128x1152xf32>
    %42 = arith.truncf %41 : vector<128x1152xf32> to vector<128x1152xbf16>
    %c0_17 = arith.constant 0 : index
    %c0_18 = arith.constant 0 : index
    %43 = vector.load %arg5[%c0_17, %c0_18] : memref<1152x128xbf16, #tpu.memory_space<vmem>>, vector<1152x128xbf16>
    %cst_19 = arith.constant dense<0.000000e+00> : vector<128x128xf32>
    %44 = tpu.matmul %42, %43, %cst_19 {dimension_numbers = #tpu.dot_dimension_numbers<[1], [0], [0], [1], [0, 0, 1, 1], [], []>} : vector<128x1152xbf16>, vector<1152x128xbf16>, vector<128x128xf32> -> vector<128x128xf32>
    %c0_20 = arith.constant 0 : index
    %c0_21 = arith.constant 0 : index
    %45 = vector.load %arg6[%c0_20, %c0_21] : memref<1x128xf32, #tpu.memory_space<vmem>>, vector<1x128xf32>
    %46 = vector.broadcast %45 : vector<1x128xf32> to vector<128x128xf32>
    %47 = arith.addf %44, %46 : vector<128x128xf32>
    %cst_22 = arith.constant dense<0.000000e+00> : vector<128xf32>
    %48 = vector.multi_reduction <add>, %47, %cst_22 [0] : vector<128x128xf32> to vector<128xf32>
    %49 = vector.shape_cast %48 : vector<128xf32> to vector<1x128xf32>
    %50 = arith.mulf %47, %47 : vector<128x128xf32>
    %cst_23 = arith.constant dense<0.000000e+00> : vector<128xf32>
    %51 = vector.multi_reduction <add>, %50, %cst_23 [0] : vector<128x128xf32> to vector<128xf32>
    %52 = vector.shape_cast %51 : vector<128xf32> to vector<1x128xf32>
    %53 = tpu.concatenate %49, %52 in 0 : vector<1x128xf32>, vector<1x128xf32> -> vector<2x128xf32>
    %54 = vector.shape_cast %53 : vector<2x128xf32> to vector<1x1x2x128xf32>
    %c0_24 = arith.constant 0 : index
    %c0_25 = arith.constant 0 : index
    %c0_26 = arith.constant 0 : index
    %c0_27 = arith.constant 0 : index
    %55 = vector.load %arg10[%c0_24, %c0_25, %c0_26, %c0_27] : memref<1x1x2x128xf32, #tpu.memory_space<vmem>>, vector<1x1x2x128xf32>
    tpu.vector_store %arg10[%c0_24, %c0_25, %c0_26, %c0_27], %54 {strides = array<i32>} : memref<1x1x2x128xf32, #tpu.memory_space<vmem>>, vector<1x1x2x128xf32>,
    %56 = vector.shape_cast %47 : vector<128x128xf32> to vector<1x8x16x128xf32>
    %c0_28 = arith.constant 0 : index
    %c0_29 = arith.constant 0 : index
    %c0_30 = arith.constant 0 : index
    %c0_31 = arith.constant 0 : index
    %57 = vector.load %arg9[%c0_28, %c0_29, %c0_30, %c0_31] : memref<1x8x16x128xf32, #tpu.memory_space<vmem>>, vector<1x8x16x128xf32>
    tpu.vector_store %arg9[%c0_28, %c0_29, %c0_30, %c0_31], %56 {strides = array<i32>} : memref<1x8x16x128xf32, #tpu.memory_space<vmem>>, vector<1x8x16x128xf32>,
    return
  }
  func.func @transform_0(%arg0: i32, %arg1: i32) -> (i32, i32, i32, i32) {
    %c0_i32 = arith.constant 0 : i32
    %c0_i32_0 = arith.constant 0 : i32
    %c0_i32_1 = arith.constant 0 : i32
    return %arg0, %arg1, %c0_i32, %c0_i32_0 : i32, i32, i32, i32
  }
  func.func @transform_1(%arg0: i32, %arg1: i32) -> (i32, i32, i32, i32) {
    %c8_i32 = arith.constant 8 : i32
    %0 = arith.muli %arg1, %c8_i32 : i32
    %c1_i32 = arith.constant 1 : i32
    %1 = arith.subi %0, %c1_i32 : i32
    %c0_i32 = arith.constant 0 : i32
    %2 = arith.maxsi %1, %c0_i32 : i32
    %c0_i32_0 = arith.constant 0 : i32
    %c0_i32_1 = arith.constant 0 : i32
    %c0_i32_2 = arith.constant 0 : i32
    return %arg0, %2, %c0_i32_0, %c0_i32_1 : i32, i32, i32, i32
  }
  func.func @transform_2(%arg0: i32, %arg1: i32) -> (i32, i32, i32, i32) {
    %c8_i32 = arith.constant 8 : i32
    %0 = arith.muli %arg1, %c8_i32 : i32
    %c8_i32_0 = arith.constant 8 : i32
    %1 = arith.addi %0, %c8_i32_0 : i32
    %c15_i32 = arith.constant 15 : i32
    %2 = arith.minsi %1, %c15_i32 : i32
    %c0_i32 = arith.constant 0 : i32
    %c0_i32_1 = arith.constant 0 : i32
    %c0_i32_2 = arith.constant 0 : i32
    return %arg0, %2, %c0_i32, %c0_i32_1 : i32, i32, i32, i32
  }
  func.func @transform_3(%arg0: i32, %arg1: i32) -> (i32, i32) {
    %c0_i32 = arith.constant 0 : i32
    %c0_i32_0 = arith.constant 0 : i32
    %c0_i32_1 = arith.constant 0 : i32
    return %c0_i32, %c0_i32_0 : i32, i32
  }
  func.func @transform_4(%arg0: i32, %arg1: i32) -> (i32, i32) {
    %c0_i32 = arith.constant 0 : i32
    %c0_i32_0 = arith.constant 0 : i32
    %c0_i32_1 = arith.constant 0 : i32
    return %c0_i32, %c0_i32_0 : i32, i32
  }
  func.func @transform_5(%arg0: i32, %arg1: i32) -> (i32, i32) {
    %c0_i32 = arith.constant 0 : i32
    %c0_i32_0 = arith.constant 0 : i32
    %c0_i32_1 = arith.constant 0 : i32
    return %c0_i32, %c0_i32_0 : i32, i32
  }
  func.func @transform_6(%arg0: i32, %arg1: i32) -> (i32, i32) {
    %c0_i32 = arith.constant 0 : i32
    %c0_i32_0 = arith.constant 0 : i32
    %c0_i32_1 = arith.constant 0 : i32
    return %c0_i32, %c0_i32_0 : i32, i32
  }
  func.func @transform_7(%arg0: i32, %arg1: i32) -> (i32, i32, i32, i32) {
    %c0_i32 = arith.constant 0 : i32
    %c0_i32_0 = arith.constant 0 : i32
    %c0_i32_1 = arith.constant 0 : i32
    return %arg0, %arg1, %c0_i32, %c0_i32_0 : i32, i32, i32, i32
  }
  func.func @transform_8(%arg0: i32, %arg1: i32) -> (i32, i32, i32, i32) {
    %c0_i32 = arith.constant 0 : i32
    %c0_i32_0 = arith.constant 0 : i32
    %c0_i32_1 = arith.constant 0 : i32
    return %arg0, %arg1, %c0_i32, %c0_i32_0 : i32, i32, i32, i32
  }
}

module attributes {stable_mosaic.version = 11 : i64} {
  func.func @finish_kernel(%arg0: i32, %arg1: i32, %arg2: memref<1x8x16x128xf32, #tpu.memory_space<vmem>>, %arg3: memref<1x8x16x128xf32, #tpu.memory_space<vmem>>, %arg4: memref<1x128xf32, #tpu.memory_space<vmem>>, %arg5: memref<1x128xf32, #tpu.memory_space<vmem>>, %arg6: memref<1x128xf32, #tpu.memory_space<vmem>>, %arg7: memref<1x128xf32, #tpu.memory_space<vmem>>, %arg8: memref<1x8x16x128xf32, #tpu.memory_space<vmem>>) attributes {dimension_semantics = [#tpu.dimension_semantics<parallel>, #tpu.dimension_semantics<parallel>], iteration_bounds = array<i64: 2, 2>, scalar_prefetch = 0 : i64, scratch_operands = 0 : i64, tpu.core_type = #tpu.core_type<tc>, window_params = [{transform_indices = @transform_0, window_bounds = array<i64: 1, 8, 16, 128>}, {transform_indices = @transform_1, window_bounds = array<i64: 1, 8, 16, 128>}, {pipeline_mode = #tpu.pipeline_mode<synchronous>, transform_indices = @transform_2, window_bounds = array<i64: 1, 128>}, {pipeline_mode = #tpu.pipeline_mode<synchronous>, transform_indices = @transform_3, window_bounds = array<i64: 1, 128>}, {pipeline_mode = #tpu.pipeline_mode<synchronous>, transform_indices = @transform_4, window_bounds = array<i64: 1, 128>}, {pipeline_mode = #tpu.pipeline_mode<synchronous>, transform_indices = @transform_5, window_bounds = array<i64: 1, 128>}, {transform_indices = @transform_6, window_bounds = array<i64: 1, 8, 16, 128>}]} {
    %c0 = arith.constant 0 : index
    %c0_0 = arith.constant 0 : index
    %c0_1 = arith.constant 0 : index
    %c0_2 = arith.constant 0 : index
    %0 = vector.load %arg2[%c0, %c0_0, %c0_1, %c0_2] : memref<1x8x16x128xf32, #tpu.memory_space<vmem>>, vector<1x8x16x128xf32>
    %c0_3 = arith.constant 0 : index
    %c0_4 = arith.constant 0 : index
    %1 = vector.load %arg4[%c0_3, %c0_4] : memref<1x128xf32, #tpu.memory_space<vmem>>, vector<1x128xf32>
    %2 = vector.shape_cast %1 : vector<1x128xf32> to vector<1x1x1x128xf32>
    %3 = vector.broadcast %2 : vector<1x1x1x128xf32> to vector<1x8x16x128xf32>
    %4 = arith.mulf %0, %3 : vector<1x8x16x128xf32>
    %c0_5 = arith.constant 0 : index
    %c0_6 = arith.constant 0 : index
    %5 = vector.load %arg5[%c0_5, %c0_6] : memref<1x128xf32, #tpu.memory_space<vmem>>, vector<1x128xf32>
    %6 = vector.shape_cast %5 : vector<1x128xf32> to vector<1x1x1x128xf32>
    %7 = vector.broadcast %6 : vector<1x1x1x128xf32> to vector<1x8x16x128xf32>
    %8 = arith.addf %4, %7 : vector<1x8x16x128xf32>
    %c0_7 = arith.constant 0 : index
    %c0_8 = arith.constant 0 : index
    %c0_9 = arith.constant 0 : index
    %c0_10 = arith.constant 0 : index
    %9 = vector.load %arg3[%c0_7, %c0_8, %c0_9, %c0_10] : memref<1x8x16x128xf32, #tpu.memory_space<vmem>>, vector<1x8x16x128xf32>
    %c0_11 = arith.constant 0 : index
    %c0_12 = arith.constant 0 : index
    %10 = vector.load %arg6[%c0_11, %c0_12] : memref<1x128xf32, #tpu.memory_space<vmem>>, vector<1x128xf32>
    %11 = vector.shape_cast %10 : vector<1x128xf32> to vector<1x1x1x128xf32>
    %12 = vector.broadcast %11 : vector<1x1x1x128xf32> to vector<1x8x16x128xf32>
    %13 = arith.mulf %9, %12 : vector<1x8x16x128xf32>
    %14 = arith.addf %8, %13 : vector<1x8x16x128xf32>
    %c0_13 = arith.constant 0 : index
    %c0_14 = arith.constant 0 : index
    %15 = vector.load %arg7[%c0_13, %c0_14] : memref<1x128xf32, #tpu.memory_space<vmem>>, vector<1x128xf32>
    %16 = vector.shape_cast %15 : vector<1x128xf32> to vector<1x1x1x128xf32>
    %17 = vector.broadcast %16 : vector<1x1x1x128xf32> to vector<1x8x16x128xf32>
    %18 = arith.addf %14, %17 : vector<1x8x16x128xf32>
    %cst = arith.constant 0.000000e+00 : f32
    %19 = vector.broadcast %cst : f32 to vector<1x8x16x128xf32>
    %20 = arith.cmpf ogt, %18, %19 : vector<1x8x16x128xf32>
    %cst_15 = arith.constant 0.000000e+00 : f32
    %21 = vector.broadcast %cst_15 : f32 to vector<1x8x16x128xf32>
    %22 = arith.minimumf %18, %21 : vector<1x8x16x128xf32>
    %23 = math.exp %22 : vector<1x8x16x128xf32>
    %cst_16 = arith.constant 1.000000e+00 : f32
    %24 = vector.broadcast %cst_16 : f32 to vector<1x8x16x128xf32>
    %25 = arith.subf %23, %24 : vector<1x8x16x128xf32>
    %26 = arith.select %20, %18, %25 : vector<1x8x16x128xi1>, vector<1x8x16x128xf32>
    %c0_17 = arith.constant 0 : index
    %c0_18 = arith.constant 0 : index
    %c0_19 = arith.constant 0 : index
    %c0_20 = arith.constant 0 : index
    %27 = vector.load %arg8[%c0_17, %c0_18, %c0_19, %c0_20] : memref<1x8x16x128xf32, #tpu.memory_space<vmem>>, vector<1x8x16x128xf32>
    tpu.vector_store %arg8[%c0_17, %c0_18, %c0_19, %c0_20], %26 {strides = array<i32>} : memref<1x8x16x128xf32, #tpu.memory_space<vmem>>, vector<1x8x16x128xf32>,
    return
  }
  func.func @transform_0(%arg0: i32, %arg1: i32) -> (i32, i32, i32, i32) {
    %c0_i32 = arith.constant 0 : i32
    %c0_i32_0 = arith.constant 0 : i32
    %c0_i32_1 = arith.constant 0 : i32
    return %arg0, %arg1, %c0_i32, %c0_i32_0 : i32, i32, i32, i32
  }
  func.func @transform_1(%arg0: i32, %arg1: i32) -> (i32, i32, i32, i32) {
    %c0_i32 = arith.constant 0 : i32
    %c0_i32_0 = arith.constant 0 : i32
    %c0_i32_1 = arith.constant 0 : i32
    return %arg0, %arg1, %c0_i32, %c0_i32_0 : i32, i32, i32, i32
  }
  func.func @transform_2(%arg0: i32, %arg1: i32) -> (i32, i32) {
    %c0_i32 = arith.constant 0 : i32
    %c0_i32_0 = arith.constant 0 : i32
    %c0_i32_1 = arith.constant 0 : i32
    return %c0_i32, %c0_i32_0 : i32, i32
  }
  func.func @transform_3(%arg0: i32, %arg1: i32) -> (i32, i32) {
    %c0_i32 = arith.constant 0 : i32
    %c0_i32_0 = arith.constant 0 : i32
    %c0_i32_1 = arith.constant 0 : i32
    return %c0_i32, %c0_i32_0 : i32, i32
  }
  func.func @transform_4(%arg0: i32, %arg1: i32) -> (i32, i32) {
    %c0_i32 = arith.constant 0 : i32
    %c0_i32_0 = arith.constant 0 : i32
    %c0_i32_1 = arith.constant 0 : i32
    return %c0_i32, %c0_i32_0 : i32, i32
  }
  func.func @transform_5(%arg0: i32, %arg1: i32) -> (i32, i32) {
    %c0_i32 = arith.constant 0 : i32
    %c0_i32_0 = arith.constant 0 : i32
    %c0_i32_1 = arith.constant 0 : i32
    return %c0_i32, %c0_i32_0 : i32, i32
  }
  func.func @transform_6(%arg0: i32, %arg1: i32) -> (i32, i32, i32, i32) {
    %c0_i32 = arith.constant 0 : i32
    %c0_i32_0 = arith.constant 0 : i32
    %c0_i32_1 = arith.constant 0 : i32
    return %arg0, %arg1, %c0_i32, %c0_i32_0 : i32, i32, i32, i32
  }
}

</mosaic_0001>

<bundles_post_ra>
// kernel: _lambda_.5
= control target key start
LH: loop header
LB: loop body
LE: loop exit
PB: predicated region body
PF: predicated region fallthrough
CT: control target
= control target key end

     0   :  { %s893_s21 = smov 0   ;;  %s895_s22 = smov 0   ;;  %s1164_s0 = inlined_call_operand.vmem [shape: f32[2,16,16,128], index: 0, kind: input, shape index: {}]   ;;  %s1165_s1 = inlined_call_operand.vmem [shape: f32[2,16,16,128], index: 1, kind: input, shape index: {}]   ;;  %s1166_s2 = inlined_call_operand.vmem [shape: f32[1,128], index: 2, kind: input, shape index: {}]   ;;  %s1167_s3 = inlined_call_operand.vmem [shape: f32[1,128], index: 3, kind: input, shape index: {}]   ;;  %s1168_s4 = inlined_call_operand.vmem [shape: f32[1,128], index: 4, kind: input, shape index: {}]   ;;  %s1169_s5 = inlined_call_operand.vmem [shape: f32[1,128], index: 5, kind: input, shape index: {}]   ;;  %s1170_s6 = inlined_call_operand.vmem [shape: f32[2,16,16,128], index: 6, kind: output, shape index: {}]  }
   0x1   :  { %s897_s23 = smov 0   ;;  %s899_s24 = smov 0  }
   0x2   :  { %s901_s25 = smov 0  }
   0x3 LB: > { %s25_s26 = sadd.s32 1, %s848_s23  ;;  %s28_s27 = sadd.s32 1, %s852_s24  ;;  %s856_s25 = sphi %s901_s25, %s16_s25   ;;  %s852_s24 = sphi %s899_s24, %s1174_s24   ;;  %s848_s23 = sphi %s897_s23, %s1173_s23   ;;  %s844_s22 = sphi %s895_s22, %s1172_s22   ;;  %s840_s21 = sphi %s893_s21, %s1171_s21  }
   0x4   : > { %p26_p0 = scmp.ge.s32.totalorder %s25_s26, 2  ;;  %p711_p1 = scmp.ge.s32.totalorder %s856_s25, 1 }
   0x5   : > { %p252_p2 = scmp.lt.s32.totalorder %s856_s25, 5 }
   0x6   : > { %s1176_s26 = smov (%p26_p0, %s25_s26), 0  ;;  %s1178_s27 = smov (!%p26_p0, %s28_s27), %s852_s24 }
   0x7   : > { %p253_p3 = pnand %p711_p1, %p252_p2  ;;  %p30_p4 = scmp.ge.s32.totalorder %s1178_s27, 2 }
   0x8   : > { %s712_s28 = sshll.u32 (!%p253_p3), %s840_s21, 3  ;;  %p303_p5 = scmp.lt.s32.totalorder (!%p253_p3), %s844_s22, 1  ;;  %v928_v0 = vld [vmem:[%s1166_s2] ss:$0 sm:$0xff] (!%p253_p3) }
   0x9   : > { %s1180_s27 = smov (%p30_p4, %s1178_s27), 0  ;;  %256 = sbr.rel (%p253_p3) target bundleno = 81 (0x51), region = 44 }
   0xa   : > { %p305_p6 = scmp.lt.s32.totalorder (!%p253_p3), %s712_s28, 15  ;;  %v933_v1 = vld [vmem:[%s1168_s4] ss:$0 sm:$0xff] (!%p253_p3) }
   0xb   : > { %v950_v2 = vld [vmem:[%s1167_s3] ss:$0 sm:$0xff] (!%p253_p3) }
   0xc   : > { %v977_v25 = vld [vmem:[%s1169_s5] ss:$0 sm:$0xff] (!%p253_p3) }
  0x10   : > { %s1182_s22 = smov (!%p303_p5, %s844_s22), 1  ;;  %s1184_s28 = smov (!%p305_p6, %s712_s28), 15 }
  0x11   : > { %s714_s29 = sshll.u32 %s1182_s22, 5  ;;  %s713_s30 = sshll.u32 %s1184_s28, 1 }
  0x12   : > { %s309_s7 = sadd.s32 %s714_s29, %s713_s30 }
  0x13   : > { %s923_s8 = sshll.u32 %s309_s7, 3 }
  0x14   : > { %s939_s15 = scalar_lea.vmem %s1164_s0, %s923_s8  ;;  %s945_s18 = scalar_lea.vmem %s1165_s1, %s923_s8 }
  0x15   : > { %v335_v3 = vld [vmem:[%s939_s15] sm:$0xff]  ;;  %v336_v5 = vld [vmem:[%s939_s15 + $0x8] sm:$0xff]  ;;  %v337_v10 = vld [vmem:[%s939_s15 + $0x10] sm:$0xff]  ;;  %s1069_s30 = scalar_lea.vmem %s1170_s6, %s923_s8 }
  0x16   : > { %v397_v4 = vld [vmem:[%s945_s18] sm:$0xff]  ;;  %v358_v6 = vmul.f32 %v928_v0, %v335_v3  ;;  %v359_v8 = vmul.f32 %v928_v0, %v336_v5  ;;  %v398_v9 = vld [vmem:[%s945_s18 + $0x8] sm:$0xff]  ;;  %v399_v11 = vld [vmem:[%s945_s18 + $0x10] sm:$0xff]  ;;  %v360_v13 = vmul.f32 %v928_v0, %v337_v10 }
  0x17   : > { %v420_v7 = vmul.f32 %v933_v1, %v397_v4  ;;  %v421_v12 = vmul.f32 %v933_v1, %v398_v9  ;;  %v422_v14 = vmul.f32 %v933_v1, %v399_v11  ;;  %v338_v15 = vld [vmem:[%s939_s15 + $0x18] sm:$0xff]  ;;  %v339_v17 = vld [vmem:[%s939_s15 + $0x20] sm:$0xff]  ;;  %v340_v23 = vld [vmem:[%s939_s15 + $0x28] sm:$0xff] }
  0x18   : > { %v400_v16 = vld [vmem:[%s945_s18 + $0x18] sm:$0xff]  ;;  %v381_v18 = vadd.f32 %v950_v2, %v358_v6  ;;  %v382_v19 = vadd.f32 %v950_v2, %v359_v8  ;;  %v361_v20 = vmul.f32 %v928_v0, %v338_v15  ;;  %v401_v22 = vld [vmem:[%s945_s18 + $0x20] sm:$0xff]  ;;  %v402_v24 = vld [vmem:[%s945_s18 + $0x28] sm:$0xff]  ;;  %v383_v26 = vadd.f32 %v950_v2, %v360_v13 }
  0x19   : > { %v423_v21 = vmul.f32 %v933_v1, %v400_v16  ;;  %v362_v27 = vmul.f32 %v928_v0, %v339_v17  ;;  %v424_v28 = vmul.f32 %v933_v1, %v401_v22  ;;  %v363_v29 = vmul.f32 %v928_v0, %v340_v23  ;;  %v341_v30 = vld [vmem:[%s939_s15 + $0x30] sm:$0xff]  ;;  %v342_v57 = vld [vmem:[%s939_s15 + $0x38] sm:$0xff]  ;;  %v343_v5 = vld [vmem:[%s939_s15 + $0x40] sm:$0xff] }
  0x1a   : > { %v403_v31 = vld [vmem:[%s945_s18 + $0x30] sm:$0xff]  ;;  %v436_v32 = vadd.f32 %v420_v7, %v381_v18  ;;  %v437_v33 = vadd.f32 %v421_v12, %v382_v19  ;;  %v384_v34 = vadd.f32 %v950_v2, %v361_v20  ;;  %v425_v35 = vmul.f32 %v933_v1, %v402_v24  ;;  %v404_v60 = vld [vmem:[%s945_s18 + $0x38] sm:$0xff]  ;;  %v405_v6 = vld [vmem:[%s945_s18 + $0x40] sm:$0xff] }
  0x1b   : > { %v438_v36 = vadd.f32 %v422_v14, %v383_v26  ;;  %v385_v37 = vadd.f32 %v950_v2, %v362_v27  ;;  %v386_v38 = vadd.f32 %v950_v2, %v363_v29  ;;  %v364_v39 = vmul.f32 %v928_v0, %v341_v30  ;;  %v344_v7 = vld [vmem:[%s939_s15 + $0x48] sm:$0xff]  ;;  %v345_v14 = vld [vmem:[%s939_s15 + $0x50] sm:$0xff]  ;;  %v346_v19 = vld [vmem:[%s939_s15 + $0x58] sm:$0xff] }
  0x1c   : > { %v991_v40 = vadd.f32 %v977_v25, %v436_v32  ;;  %v994_v41 = vadd.f32 %v977_v25, %v437_v33  ;;  %v439_v42 = vadd.f32 %v423_v21, %v384_v34  ;;  %v426_v43 = vmul.f32 %v933_v1, %v403_v31  ;;  %v406_v11 = vld [vmem:[%s945_s18 + $0x48] sm:$0xff]  ;;  %v407_v15 = vld [vmem:[%s945_s18 + $0x50] sm:$0xff]  ;;  %v408_v20 = vld [vmem:[%s945_s18 + $0x58] sm:$0xff] }
  0x1d   : > { %v998_v44 = vadd.f32 %v977_v25, %v438_v36  ;;  %v440_v45 = vadd.f32 %v424_v28, %v385_v37  ;;  %v441_v46 = vadd.f32 %v425_v35, %v386_v38  ;;  %v387_v47 = vadd.f32 %v950_v2, %v364_v39  ;;  %v347_v24 = vld [vmem:[%s939_s15 + $0x60] sm:$0xff] }
  0x1e   : > { %v491_v48 = vmin.f32 %v991_v40, 0.0  ;;  %v492_v49 = vmin.f32 %v994_v41, 0.0  ;;  %v1005_v51 = vadd.f32 %v977_v25, %v439_v42  ;;  %v365_v4 = vmul.f32 %v928_v0, %v342_v57  ;;  %v409_v37 = vld [vmem:[%s945_s18 + $0x60] sm:$0xff]  ;;  %v348_v42 = vld [vmem:[%s939_s15 + $0x68] sm:$0xff] }
  0x1f   : > { %v493_v50 = vmin.f32 %v998_v44, 0.0  ;;  %v1008_v52 = vadd.f32 %v977_v25, %v440_v45  ;;  %v1011_v55 = vadd.f32 %v977_v25, %v441_v46  ;;  %v442_v56 = vadd.f32 %v426_v43, %v387_v47 }
  0x20   : > { %v507_v53 = vmul.f32 1.442695, %v491_v48  ;;  %v509_v54 = vmul.f32 1.442695, %v492_v49  ;;  %v494_v59 = vmin.f32 %v1005_v51, 0.0  ;;  %vm475_vm0 = vcmp.gt.f32.partialorder %v991_v40, 0.0 }
  0x21   : > { %v511_v58 = vmul.f32 1.442695, %v493_v50  ;;  %v495_v61 = vmin.f32 %v1008_v52, 0.0  ;;  %v496_v62 = vmin.f32 %v1011_v55, 0.0  ;;  %v1019_v3 = vadd.f32 %v977_v25, %v442_v56 }
  0x22   : > { %786 = vpow2.f32 %v507_v53  ;;  %v513_v63 = vmul.f32 1.442695, %v494_v59  ;;  %v427_v10 = vmul.f32 %v933_v1, %v404_v60  ;;  %vm476_vm1 = vcmp.gt.f32.partialorder %v994_v41, 0.0 }
  0x23   : > { %788 = vpow2.f32 %v509_v54  ;;  %v515_v8 = vmul.f32 1.442695, %v495_v61  ;;  %v517_v9 = vmul.f32 1.442695, %v496_v62  ;;  %v497_v12 = vmin.f32 %v1019_v3, 0.0 }
  0x24   : > { %790 = vpow2.f32 %v511_v58  ;;  %v388_v13 = vadd.f32 %v950_v2, %v365_v4  ;;  %vm477_vm2 = vcmp.gt.f32.partialorder %v998_v44, 0.0  ;;  %v366_v16 = vmul.f32 %v928_v0, %v343_v5 }
  0x25   : > { %792 = vpow2.f32 %v513_v63  ;;  %v428_v17 = vmul.f32 %v933_v1, %v405_v6  ;;  %v367_v18 = vmul.f32 %v928_v0, %v344_v7  ;;  %v519_v21 = vmul.f32 1.442695, %v497_v12 }
  0x26   : > { %794 = vpow2.f32 %v515_v8  ;;  %v443_v22 = vadd.f32 %v427_v10, %v388_v13  ;;  %v429_v23 = vmul.f32 %v933_v1, %v406_v11  ;;  %v389_v26 = vadd.f32 %v950_v2, %v366_v16  ;;  %v349_v16 = vld [vmem:[%s939_s15 + $0x70] sm:$0xff] }
  0x27   : > { %796 = vpow2.f32 %v517_v9  ;;  %v390_v27 = vadd.f32 %v950_v2, %v367_v18  ;;  %v368_v28 = vmul.f32 %v928_v0, %v345_v14  ;;  %v430_v29 = vmul.f32 %v933_v1, %v407_v15  ;;  %v410_v15 = vld [vmem:[%s945_s18 + $0x68] sm:$0xff] }
  0x28   : > { %798 = vpow2.f32 %v519_v21  ;;  %v1046_v30 = vadd.f32 %v977_v25, %v443_v22  ;;  %v369_v31 = vmul.f32 %v928_v0, %v346_v19  ;;  %v431_v32 = vmul.f32 %v933_v1, %v408_v20  ;;  %v411_v19 = vld [vmem:[%s945_s18 + $0x70] sm:$0xff] }
  0x29   : > { %v444_v33 = vadd.f32 %v428_v17, %v389_v26  ;;  %v445_v34 = vadd.f32 %v429_v23, %v390_v27  ;;  %v391_v35 = vadd.f32 %v950_v2, %v368_v28  ;;  %v370_v36 = vmul.f32 %v928_v0, %v347_v24  ;;  %v350_v23 = vld [vmem:[%s939_s15 + $0x78] sm:$0xff] }
  0x2a   : > { %vm478_vm3 = vcmp.gt.f32.partialorder %v1005_v51, 0.0  ;;  %vm479_vm4 = vcmp.gt.f32.partialorder %v1008_v52, 0.0  ;;  %v498_v38 = vmin.f32 %v1046_v30, 0.0  ;;  %v392_v39 = vadd.f32 %v950_v2, %v369_v31  ;;  %v412_v28 = vld [vmem:[%s945_s18 + $0x78] sm:$0xff] }
  0x2b   : > { %vm480_vm5 = vcmp.gt.f32.partialorder %v1011_v55, 0.0  ;;  %v1060_v45 = vadd.f32 %v977_v25, %v444_v33  ;;  %v1063_v46 = vadd.f32 %v977_v25, %v445_v34  ;;  %v446_v47 = vadd.f32 %v430_v29, %v391_v35 }
  0x2c   : > { %v787_v43 = vpop.eup %786  ;;  %v521_v50 = vmul.f32 1.442695, %v498_v38  ;;  %v447_v53 = vadd.f32 %v431_v32, %v392_v39  ;;  %v432_v54 = vmul.f32 %v933_v1, %v409_v37  ;;  %v393_v59 = vadd.f32 %v950_v2, %v370_v36 }
  0x2d   : > { %v789_v48 = vpop.eup %788  ;;  %v728_v49 = vadd.f32 -1.0, %v787_v43  ;;  %v499_v58 = vmin.f32 %v1060_v45, 0.0  ;;  %v371_v60 = vmul.f32 %v928_v0, %v348_v42  ;;  %v500_v4 = vmin.f32 %v1063_v46, 0.0 }
  0x2e   : > { %v791_v56 = vpop.eup %790  ;;  %v729_v57 = vadd.f32 -1.0, %v789_v48  ;;  %800 = vpow2.f32 %v521_v50  ;;  %v1084_v9 = vadd.f32 %v977_v25, %v446_v47  ;;  %v1091_v13 = vadd.f32 %v977_v25, %v447_v53 }
  0x2f   : > { %v793_v61 = vpop.eup %792  ;;  %v555_v62 = vsel %vm475_vm0, %v991_v40, %v728_v49  ;;  %v730_v63 = vadd.f32 -1.0, %v791_v56  ;;  %v523_v8 = vmul.f32 1.442695, %v499_v58  ;;  %v525_v12 = vmul.f32 1.442695, %v500_v4 }
  0x30   : > { %v795_v5 = vpop.eup %794  ;;  %571 = vst [vmem:[%s1069_s30] sm:$0xff] %v555_v62  ;;  %v556_v6 = vsel %vm476_vm1, %v994_v41, %v729_v57  ;;  %v731_v7 = vadd.f32 -1.0, %v793_v61  ;;  %vm481_vm6 = vcmp.gt.f32.partialorder %v1019_v3, 0.0  ;;  %v501_v18 = vmin.f32 %v1084_v9, 0.0 }
  0x31   : > { %v797_v40 = vpop.eup %796  ;;  %572 = vst [vmem:[%s1069_s30 + $0x8] sm:$0xff] %v556_v6  ;;  %v557_v10 = vsel %vm477_vm2, %v998_v44, %v730_v63  ;;  %v732_v11 = vadd.f32 -1.0, %v795_v5  ;;  %802 = vpow2.f32 %v523_v8  ;;  %v502_v21 = vmin.f32 %v1091_v13, 0.0 }
  0x32   : > { %573 = vst [vmem:[%s1069_s30 + $0x10] sm:$0xff] %v557_v10  ;;  %v558_v41 = vsel %vm478_vm3, %v1005_v51, %v731_v7  ;;  %v733_v14 = vadd.f32 -1.0, %v797_v40  ;;  %v799_v17 = vpop.eup %798  ;;  %804 = vpow2.f32 %v525_v12  ;;  %v448_v22 = vadd.f32 %v432_v54, %v393_v59 }
  0x33   : > { %574 = vst [vmem:[%s1069_s30 + $0x18] sm:$0xff] %v558_v41  ;;  %v559_v44 = vsel %vm479_vm4, %v1008_v52, %v732_v11  ;;  %v734_v20 = vadd.f32 -1.0, %v799_v17  ;;  %v527_v52 = vmul.f32 1.442695, %v501_v18  ;;  %v394_v24 = vadd.f32 %v950_v2, %v371_v60 }
  0x34   : > { %575 = vst [vmem:[%s1069_s30 + $0x20] sm:$0xff] %v559_v44  ;;  %v560_v51 = vsel %vm480_vm5, %v1011_v55, %v733_v14  ;;  %v433_v26 = vmul.f32 %v933_v1, %v410_v15  ;;  %v372_v27 = vmul.f32 %v928_v0, %v349_v16  ;;  %v529_v31 = vmul.f32 1.442695, %v502_v21 }
  0x35   : > { %576 = vst [vmem:[%s1069_s30 + $0x28] sm:$0xff] %v560_v51  ;;  %v561_v29 = vsel %vm481_vm6, %v1019_v3, %v734_v20  ;;  %v471_v55 = vadd.f32 %v977_v25, %v448_v22  ;;  %v434_v32 = vmul.f32 %v933_v1, %v411_v19  ;;  %806 = vpow2.f32 %v527_v52 }
  0x36   : > { %577 = vst [vmem:[%s1069_s30 + $0x30] sm:$0xff] %v561_v29  ;;  %v449_v33 = vadd.f32 %v433_v26, %v394_v24  ;;  %v395_v34 = vadd.f32 %v950_v2, %v372_v27  ;;  %v373_v35 = vmul.f32 %v928_v0, %v350_v23  ;;  %808 = vpow2.f32 %v529_v31 }
  0x37   : > { %v503_v36 = vmin.f32 %v471_v55, 0.0  ;;  %v435_v37 = vmul.f32 %v933_v1, %v412_v28  ;;  %vm482_vm7 = vcmp.gt.f32.partialorder %v1046_v30, 0.0  ;;  %vm483_vm8 = vcmp.gt.f32.partialorder %v1060_v45, 0.0 }
  0x38   : > { %v801_v38 = vpop.eup %800  ;;  %v472_v3 = vadd.f32 %v977_v25, %v449_v33  ;;  %v450_v39 = vadd.f32 %v434_v32, %v395_v34  ;;  %v396_v42 = vadd.f32 %v950_v2, %v373_v35  ;;  %vm484_vm9 = vcmp.gt.f32.partialorder %v1063_v46, 0.0 }
  0x39   : > { %v735_v43 = vadd.f32 -1.0, %v801_v38  ;;  %v531_v47 = vmul.f32 1.442695, %v503_v36  ;;  %vm485_vm10 = vcmp.gt.f32.partialorder %v1084_v9, 0.0  ;;  %vm486_vm11 = vcmp.gt.f32.partialorder %v1091_v13, 0.0 }
  0x3a   : > { %v504_v48 = vmin.f32 %v472_v3, 0.0  ;;  %v473_v49 = vadd.f32 %v977_v25, %v450_v39  ;;  %v451_v50 = vadd.f32 %v435_v37, %v396_v42  ;;  %vm487_vm12 = vcmp.gt.f32.partialorder %v471_v55, 0.0 }
  0x3b   : > { %v803_v0 = vpop.eup %802  ;;  %v562_v53 = vsel %vm482_vm7, %v1046_v30, %v735_v43  ;;  %810 = vpow2.f32 %v531_v47  ;;  %vm488_vm13 = vcmp.gt.f32.partialorder %v472_v3, 0.0 }
  0x3c   : > { %v805_v1 = vpop.eup %804  ;;  %578 = vst [vmem:[%s1069_s30 + $0x38] sm:$0xff] %v562_v53  ;;  %v736_v54 = vadd.f32 -1.0, %v803_v0  ;;  %v533_v2 = vmul.f32 1.442695, %v504_v48  ;;  %v505_v56 = vmin.f32 %v473_v49, 0.0  ;;  %v474_v58 = vadd.f32 %v977_v25, %v451_v50 }
  0x3d   : > { %v737_v57 = vadd.f32 -1.0, %v805_v1  ;;  %vm489_vm14 = vcmp.gt.f32.partialorder %v473_v49, 0.0 }
  0x3e   : > { %v563_v59 = vsel %vm483_vm8, %v1060_v45, %v736_v54  ;;  %812 = vpow2.f32 %v533_v2  ;;  %v535_v60 = vmul.f32 1.442695, %v505_v56  ;;  %v506_v61 = vmin.f32 %v474_v58, 0.0 }
  0x3f   : > { %579 = vst [vmem:[%s1069_s30 + $0x40] sm:$0xff] %v563_v59  ;;  %v564_v30 = vsel %vm484_vm9, %v1063_v46, %v737_v57  ;;  %v807_v62 = vpop.eup %806  ;;  %vm490_vm15 = vcmp.gt.f32.partialorder %v474_v58, 0.0 }
  0x40   : > { %580 = vst [vmem:[%s1069_s30 + $0x48] sm:$0xff] %v564_v30  ;;  %814 = vpow2.f32 %v535_v60  ;;  %v809_v63 = vpop.eup %808  ;;  %v738_v4 = vadd.f32 -1.0, %v807_v62  ;;  %v537_v25 = vmul.f32 1.442695, %v506_v61 }
  0x41   : > { %v739_v45 = vadd.f32 -1.0, %v809_v63 }
  0x42   : > { %v565_v5 = vsel %vm485_vm10, %v1084_v9, %v738_v4  ;;  %816 = vpow2.f32 %v537_v25 }
  0x43   : > { %581 = vst [vmem:[%s1069_s30 + $0x50] sm:$0xff] %v565_v5  ;;  %v566_v46 = vsel %vm486_vm11, %v1091_v13, %v739_v45 }
  0x44   : > { %582 = vst [vmem:[%s1069_s30 + $0x58] sm:$0xff] %v566_v46 }
  0x45   : > { %v811_v6 = vpop.eup %810 }
  0x46   : > { %v740_v7 = vadd.f32 -1.0, %v811_v6 }
  0x48   : > { %v813_v8 = vpop.eup %812  ;;  %v567_v40 = vsel %vm487_vm12, %v471_v55, %v740_v7 }
  0x49   : > { %583 = vst [vmem:[%s1069_s30 + $0x60] sm:$0xff] %v567_v40  ;;  %v741_v10 = vadd.f32 -1.0, %v813_v8 }
  0x4a   : > { %v815_v11 = vpop.eup %814 }
  0x4b   : > { %v568_v12 = vsel %vm488_vm13, %v472_v3, %v741_v10  ;;  %v742_v9 = vadd.f32 -1.0, %v815_v11 }
  0x4c   : > { %584 = vst [vmem:[%s1069_s30 + $0x68] sm:$0xff] %v568_v12  ;;  %v817_v41 = vpop.eup %816 }
  0x4d   : > { %v569_v14 = vsel %vm489_vm14, %v473_v49, %v742_v9  ;;  %v743_v13 = vadd.f32 -1.0, %v817_v41 }
  0x4e   : > { %585 = vst [vmem:[%s1069_s30 + $0x70] sm:$0xff] %v569_v14 }
  0x4f   : > { %v570_v15 = vsel %vm490_vm15, %v474_v58, %v743_v13 }
  0x50   : > { %586 = vst [vmem:[%s1069_s30 + $0x78] sm:$0xff] %v570_v15 }
  0x51 PF: > { %s16_s25 = sadd.s32 1, %s856_s25   ;;  %s1171_s21 = smov %s848_s23 }
  0x52   : > { %p13_p7 = scmp.ge.s32.totalorder %s16_s25, 6   ;;  %s1172_s22 = smov %s852_s24 }
  0x53   : > { %s1173_s23 = smov %s1176_s26  ;;  %s1174_s24 = smov %s1180_s27 }
  0x54   :  { %15 = sbr.rel (!%p13_p7) target bundleno = 3 (0x3), region = 77 }

// kernel: _lambda_.4
= control target key start
LH: loop header
LB: loop body
LE: loop exit
PB: predicated region body
PF: predicated region fallthrough
CT: control target
= control target key end

     0   :  { %s3039_s27 = smov 0   ;;  %s3041_s28 = smov 0   ;;  %s4031_s0 = inlined_call_operand.vmem [shape: f32[2,16,18,128], index: 0, kind: input, shape index: {}, may-alias: {0,1,2}]   ;;  %s4032_s1 = inlined_call_operand.vmem [shape: f32[2,16,18,128], index: 1, kind: input, shape index: {}, may-alias: {0,1,2}]   ;;  %s4033_s2 = inlined_call_operand.vmem [shape: f32[2,16,18,128], index: 2, kind: input, shape index: {}, may-alias: {0,1,2}]   ;;  %s4034_s3 = inlined_call_operand.vmem [shape: bf16[1152,128], index: 3, kind: input, shape index: {}]   ;;  %s4035_s4 = inlined_call_operand.vmem [shape: f32[1,128], index: 4, kind: input, shape index: {}]   ;;  %s4036_s5 = inlined_call_operand.vmem [shape: f32[1,128], index: 5, kind: input, shape index: {}]   ;;  %s4037_s6 = inlined_call_operand.vmem [shape: f32[1,128], index: 6, kind: input, shape index: {}]   ;;  %s4038_s7 = inlined_call_operand.vmem [shape: f32[2,16,16,128], index: 7, kind: output, shape index: {0}]   ;;  %s4039_s8 = inlined_call_operand.vmem [shape: f32[2,2,2,128], index: 8, kind: output, shape index: {1}]  }
   0x1   :  { %s3043_s29 = smov 0   ;;  %s3045_s30 = smov 0  }
   0x2   :  { %s3047_s9 = smov 0  }
   0x3 LB: > { %s28_s10 = sadd.s32 1, %s2984_s29  ;;  %s31_s11 = sadd.s32 1, %s2988_s30  ;;  %s2992_s9 = sphi %s3047_s9, %s19_s9   ;;  %s2988_s30 = sphi %s3045_s30, %s4046_s30   ;;  %s2984_s29 = sphi %s3043_s29, %s4045_s29   ;;  %s2980_s28 = sphi %s3041_s28, %s4044_s28   ;;  %s2976_s27 = sphi %s3039_s27, %s4043_s27  }
   0x4   : > { %p29_p0 = scmp.ge.s32.totalorder %s28_s10, 2  ;;  %p2325_p1 = scmp.ge.s32.totalorder %s2992_s9, 1 }
   0x5   : > { %p353_p2 = scmp.lt.s32.totalorder %s2992_s9, 5 }
   0x6   : > { %s4048_s10 = smov (%p29_p0, %s28_s10), 0  ;;  %s4050_s11 = smov (!%p29_p0, %s31_s11), %s2988_s30 }
   0x7   : > { %p354_p3 = pnand %p2325_p1, %p353_p2  ;;  %p33_p4 = scmp.ge.s32.totalorder %s4050_s11, 2 }
   0x8   : > { %v2820_v0 = vld [vmem:[%s4034_s3 + $0x40] sm:$0xff] (!%p354_p3)   ;;  %v2824_v4 = vld [vmem:[%s4034_s3 + $0x48] sm:$0xff] (!%p354_p3)   ;;  %s3089_s22 = sshll.u32 (!%p354_p3), %s2976_s27, 3  ;;  %p432_p5 = scmp.lt.s32.totalorder (!%p354_p3), %s2980_s28, 1  ;;  %v2828_v8 = vld [vmem:[%s4034_s3 + $0x50] sm:$0xff] (!%p354_p3)   ;;  %vm804_vm4 = vcmask (!%p354_p3), 1046528  }
   0x9   : > { %s4052_s11 = smov (%p33_p4, %s4050_s11), 0  ;;  %357 = sbr.rel (%p354_p3) target bundleno = 459 (0x1cb), region = 48 }
   0xa   : > { %4040 = sst [smem:[#allocation2_spill]] %s4052_s11  ;;  %v2821_v1 = vld [vmem:[%s4034_s3 + $0xc0] sm:$0xff] (!%p354_p3)   ;;  %2456 = vmatprep.subr.bf16.mxu0 (!%p354_p3), %v2820_v0  ;;  %v2825_v5 = vld [vmem:[%s4034_s3 + $0xc8] sm:$0xff] (!%p354_p3)   ;;  %s2329_s14 = sadd.s32 (!%p354_p3), 4294967295, %s3089_s22  ;;  %v2829_v9 = vld [vmem:[%s4034_s3 + $0xd0] sm:$0xff] (!%p354_p3)   ;;  %vm861_vm6 = vcmask (!%p354_p3), 1045504  }
   0xb   : > { %v2822_v2 = vld [vmem:[%s4034_s3] sm:$0xff] (!%p354_p3)   ;;  %2520 = vmatprep.subr.bf16.mxu1 (!%p354_p3), %v2821_v1  ;;  %v2826_v6 = vld [vmem:[%s4034_s3 + $0x8] sm:$0xff] (!%p354_p3)   ;;  %p444_p6 = scmp.gt.s32.totalorder (!%p354_p3), %s2329_s14, 0  ;;  %p434_p7 = scmp.lt.s32.totalorder (!%p354_p3), %s3089_s22, 15  ;;  %v2830_v10 = vld [vmem:[%s4034_s3 + $0x10] sm:$0xff] (!%p354_p3)  }
   0xc   : > { %v2823_v3 = vld [vmem:[%s4034_s3 + $0x80] sm:$0xff] (!%p354_p3)   ;;  %2457 = vmatpush3.bf16.msra.mxu0 (!%p354_p3), %v2822_v2  ;;  %v2827_v7 = vld [vmem:[%s4034_s3 + $0x88] sm:$0xff] (!%p354_p3)   ;;  %p2330_p8 = scmp.lt.s32.totalorder (!%p354_p3), %s2329_s14, 15  ;;  %v2831_v11 = vld [vmem:[%s4034_s3 + $0x90] sm:$0xff] (!%p354_p3)   ;;  %p489_p10 = scmp.lt.s32.totalorder (!%p354_p3), %s2976_s27, 1 }
   0xd   : > { %2521 = vmatpush3.bf16.msra.mxu1 (!%p354_p3), %v2823_v3  ;;  %2458 = vmatprep.subr.bf16.mxu0 (!%p354_p3), %v2824_v4  ;;  %v2832_v12 = vld [vmem:[%s4034_s3 + $0x58] sm:$0xff] (!%p354_p3)   ;;  %v2836_v16 = vld [vmem:[%s4034_s3 + $0x60] sm:$0xff] (!%p354_p3)   ;;  %v2840_v20 = vld [vmem:[%s4034_s3 + $0x68] sm:$0xff] (!%p354_p3)  }
   0xe   : > { %2522 = vmatprep.subr.bf16.mxu1 (!%p354_p3), %v2825_v5  ;;  %v2833_v13 = vld [vmem:[%s4034_s3 + $0xd8] sm:$0xff] (!%p354_p3)   ;;  %v2837_v17 = vld [vmem:[%s4034_s3 + $0xe0] sm:$0xff] (!%p354_p3)   ;;  %v2841_v21 = vld [vmem:[%s4034_s3 + $0xe8] sm:$0xff] (!%p354_p3)  }
   0xf   : > { %v2834_v14 = vld [vmem:[%s4034_s3 + $0x18] sm:$0xff] (!%p354_p3)   ;;  %v2838_v18 = vld [vmem:[%s4034_s3 + $0x20] sm:$0xff] (!%p354_p3)   ;;  %v2842_v22 = vld [vmem:[%s4034_s3 + $0x28] sm:$0xff] (!%p354_p3)  }
  0x10   : > { %2459 = vmatpush3.bf16.msra.mxu0 %v2826_v6  ;;  %s445_s24 = scalar_select %p444_p6, %s2329_s14, 0  ;;  %v2835_v15 = vld [vmem:[%s4034_s3 + $0x98] sm:$0xff]   ;;  %v2839_v19 = vld [vmem:[%s4034_s3 + $0xa0] sm:$0xff]   ;;  %v2843_v23 = vld [vmem:[%s4034_s3 + $0xa8] sm:$0xff]  }
  0x11   : > { %2523 = vmatpush3.bf16.msra.mxu1 %v2827_v7  ;;  %2460 = vmatprep.subr.bf16.mxu0 %v2828_v8  ;;  %s4054_s28 = smov (!%p432_p5, %s2980_s28), 1  ;;  %v2844_v24 = vld [vmem:[%s4034_s3 + $0x70] sm:$0xff]   ;;  %v2848_v28 = vld [vmem:[%s4034_s3 + $0x78] sm:$0xff]   ;;  %v3212_v34 = vld [vmem:[%s4036_s5] ss:$0 sm:$0xff]  ;;  %s4062_s27 = smov (!%p489_p10, %s2976_s27), 1 }
  0x12   : > { %2524 = vmatprep.subr.bf16.mxu1 %v2829_v9  ;;  %s3132_s17 = scalar_select %p434_p7, %s3089_s22, 15  ;;  %v2845_v25 = vld [vmem:[%s4034_s3 + $0xf0] sm:$0xff]   ;;  %v2849_v29 = vld [vmem:[%s4034_s3 + $0xf8] sm:$0xff]   ;;  %v3221_v37 = vld [vmem:[%s4037_s6] ss:$0 sm:$0xff] }
  0x13   : > { %s4056_s24 = smov (!%p2330_p8, %s445_s24), 15  ;;  %s3145_s26 = smul.u32 48, %s4054_s28  ;;  %v2846_v26 = vld [vmem:[%s4034_s3 + $0x30] sm:$0xff]   ;;  %v2850_v30 = vld [vmem:[%s4034_s3 + $0x38] sm:$0xff]   ;;  %v2852_v46 = vld [vmem:[%s4034_s3 + $0x140] sm:$0xff]  }
  0x14   : > { %2461 = vmatpush3.bf16.msra.mxu0 %v2830_v10  ;;  %s2776_s14 = smul.u32 3, %s3132_s17  ;;  %v2847_v27 = vld [vmem:[%s4034_s3 + $0xb0] sm:$0xff]   ;;  %v2851_v31 = vld [vmem:[%s4034_s3 + $0xb8] sm:$0xff]  }
  0x15   : > { %2525 = vmatpush3.bf16.msra.mxu1 %v2831_v11  ;;  %2462 = vmatprep.subr.bf16.mxu0 %v2832_v12  ;;  %s2778_s18 = smul.u32 3, %s4056_s24  ;;  %s460_s24 = sadd.s32 8, %s3089_s22  ;;  %v2857_v11 = vld [vmem:[%s4034_s3 + $0x1c0] sm:$0xff]  }
  0x16   : > { %2526 = vmatprep.subr.bf16.mxu1 %v2833_v13  ;;  %s438_s13 = sadd.s32 %s3145_s26, %s2776_s14  ;;  %p3184_p9 = scmp.lt.s32.totalorder %s460_s24, 15 }
  0x17   : > { %s452_s16 = sadd.s32 %s2778_s18, %s3145_s26  ;;  %s2327_s25 = sshll.u32 %s438_s13, 3 }
  0x18   : > { %2463 = vmatpush3.bf16.msra.mxu0 %v2834_v14  ;;  %s2335_s11 = sshll.u32 %s452_s16, 3  ;;  %s3194_s22 = scalar_lea.vmem %s4031_s0, %s2327_s25 }
  0x19   : > { %2527 = vmatpush3.bf16.msra.mxu1 %v2835_v15  ;;  %2464 = vmatprep.subr.bf16.mxu0 %v2836_v16  ;;  %s454_s18 = scalar_lea.vmem %s4032_s1, %s2335_s11  ;;  %s4058_s24 = smov (!%p3184_p9, %s460_s24), 15  ;;  %v499_v32 = vld [vmem:[%s3194_s22] sm:$0xff]  ;;  %v500_v33 = vld [vmem:[%s3194_s22 + $0x8] sm:$0xff]  ;;  %v502_v49 = vld [vmem:[%s3194_s22 + $0x18] sm:$0xff] }
  0x1a   : > { %2528 = vmatprep.subr.bf16.mxu1 %v2837_v17  ;;  %s4060_s24 = smov (!%p3184_p9, %s4058_s24), 15  ;;  %v536_v35 = vmul.f32 %v3212_v34, %v499_v32  ;;  %v537_v36 = vmul.f32 %v3212_v34, %v500_v33  ;;  %v496_v38 = vld [vmem:[%s454_s18] sm:$0xff]  ;;  %v497_v39 = vld [vmem:[%s454_s18 + $0x8] sm:$0xff]  ;;  %v498_v40 = vld [vmem:[%s454_s18 + $0x10] sm:$0x3]  ;;  %v539_v59 = vmul.f32 %v3212_v34, %v502_v49  ;;  %s2342_s13 = sshll.u32 %s3132_s17, 1 }
  0x1b   : > { %v533_v41 = vmul.f32 %v3212_v34, %v496_v38  ;;  %v534_v42 = vmul.f32 %v3212_v34, %v497_v39  ;;  %v535_v45 = vmul.f32 %v3212_v34, %v498_v40  ;;  %s3235_s15 = smul.u32 3, %s4060_s24  ;;  %v503_v52 = vld [vmem:[%s3194_s22 + $0x20] sm:$0xff]  ;;  %v501_v55 = vld [vmem:[%s3194_s22 + $0x10] sm:$0x3]  ;;  %v504_v5 = vld [vmem:[%s3194_s22 + $0x28] sm:$0x3] }
  0x1c   : > { %2465 = vmatpush3.bf16.msra.mxu0 %v2838_v18  ;;  %v3226_v43 = vadd.f32 %v3221_v37, %v536_v35  ;;  %v3229_v44 = vadd.f32 %v3221_v37, %v537_v36  ;;  %v540_v62 = vmul.f32 %v3212_v34, %v503_v52  ;;  %v3259_v0 = vadd.f32 %v3221_v37, %v539_v59  ;;  %v505_v4 = vld [vmem:[%s3194_s22 + $0x30] sm:$0xff]  ;;  %v506_v8 = vld [vmem:[%s3194_s22 + $0x38] sm:$0xff]  ;;  %s2343_s16 = sshll.u32 %s4054_s28, 5 }
  0x1d   : > { %2529 = vmatpush3.bf16.msra.mxu1 %v2839_v19  ;;  %2466 = vmatprep.subr.bf16.mxu0 %v2840_v20  ;;  %v3238_v47 = vadd.f32 %v3221_v37, %v533_v41  ;;  %v3241_v48 = vadd.f32 %v3221_v37, %v534_v42  ;;  %s469_s18 = sadd.s32 %s3235_s15, %s3145_s26  ;;  %v3250_v53 = vadd.f32 %v3221_v37, %v535_v45  ;;  %s483_s25 = sadd.s32 %s2343_s16, %s2342_s13 }
  0x1e   : > { %2530 = vmatprep.subr.bf16.mxu1 %v2841_v21  ;;  %v633_v50 = vmin.f32 %v3226_v43, 0.0  ;;  %v634_v51 = vmin.f32 %v3229_v44, 0.0  ;;  %v538_v1 = vmul.f32 %v3212_v34, %v501_v55  ;;  %v3263_v3 = vadd.f32 %v3221_v37, %v540_v62  ;;  %v508_v21 = vld [vmem:[%s3194_s22 + $0x48] sm:$0xff]  ;;  %s2344_s17 = sshll.u32 %s483_s25, 3 }
  0x1f   : > { %v630_v54 = vmin.f32 %v3238_v47, 0.0  ;;  %v631_v58 = vmin.f32 %v3241_v48, 0.0  ;;  %v632_v60 = vmin.f32 %v3250_v53, 0.0  ;;  %v636_v6 = vmin.f32 %v3259_v0, 0.0  ;;  %s3964_s12 = scalar_lea.vmem %s4038_s7, %s2344_s17 }
  0x20   : > { %2467 = vmatpush3.bf16.msra.mxu0 %v2842_v22  ;;  %v666_v56 = vmul.f32 1.442695, %v633_v50  ;;  %v668_v57 = vmul.f32 1.442695, %v634_v51  ;;  %v3269_v7 = vadd.f32 %v3221_v37, %v538_v1  ;;  %v637_v9 = vmin.f32 %v3263_v3, 0.0  ;;  %v509_v22 = vld [vmem:[%s3194_s22 + $0x50] sm:$0xff] }
  0x21   : > { %2531 = vmatpush3.bf16.msra.mxu1 %v2843_v23  ;;  %2468 = vmatprep.subr.bf16.mxu0 %v2844_v24  ;;  %v660_v61 = vmul.f32 1.442695, %v630_v54  ;;  %v662_v63 = vmul.f32 1.442695, %v631_v58  ;;  %v664_v2 = vmul.f32 1.442695, %v632_v60  ;;  %v542_v10 = vmul.f32 %v3212_v34, %v505_v4 }
  0x22   : > { %2532 = vmatprep.subr.bf16.mxu1 %v2845_v25  ;;  %2892 = vpow2.f32 %v666_v56  ;;  %v672_v12 = vmul.f32 1.442695, %v636_v6  ;;  %v635_v13 = vmin.f32 %v3269_v7, 0.0  ;;  %v674_v14 = vmul.f32 1.442695, %v637_v9 }
  0x23   : > { %2894 = vpow2.f32 %v668_v57  ;;  %v543_v15 = vmul.f32 %v3212_v34, %v506_v8  ;;  %v3280_v16 = vadd.f32 %v3221_v37, %v542_v10  ;;  %v541_v17 = vmul.f32 %v3212_v34, %v504_v5 }
  0x24   : > { %2469 = vmatpush3.bf16.msra.mxu0 %v2846_v26  ;;  %2896 = vpow2.f32 %v660_v61  ;;  %vm603_vm0 = vcmp.gt.f32.partialorder %v3226_v43, 0.0  ;;  %vm604_vm1 = vcmp.gt.f32.partialorder %v3229_v44, 0.0  ;;  %v670_v18 = vmul.f32 1.442695, %v635_v13 }
  0x25   : > { %2533 = vmatpush3.bf16.msra.mxu1 %v2847_v27  ;;  %2470 = vmatprep.subr.bf16.mxu0 %v2848_v28  ;;  %2898 = vpow2.f32 %v662_v63  ;;  %vm600_vm2 = vcmp.gt.f32.partialorder %v3238_v47, 0.0  ;;  %v3287_v19 = vadd.f32 %v3221_v37, %v543_v15  ;;  %v639_v20 = vmin.f32 %v3280_v16, 0.0  ;;  %v507_v28 = vld [vmem:[%s3194_s22 + $0x40] sm:$0x3] }
  0x26   : > { %2534 = vmatprep.subr.bf16.mxu1 %v2849_v29  ;;  %2900 = vpow2.f32 %v664_v2  ;;  %vm601_vm3 = vcmp.gt.f32.partialorder %v3241_v48, 0.0  ;;  %v3294_v23 = vadd.f32 %v3221_v37, %v541_v17  ;;  %v545_v24 = vmul.f32 %v3212_v34, %v508_v21  ;;  %v2853_v21 = vld [vmem:[%s4034_s3 + $0x100] sm:$0xff]  }
  0x27   : > { %2902 = vpow2.f32 %v672_v12  ;;  %vm602_vm5 = vcmp.gt.f32.partialorder %v3250_v53, 0.0  ;;  %v640_v25 = vmin.f32 %v3287_v19, 0.0  ;;  %v678_v26 = vmul.f32 1.442695, %v639_v20  ;;  %v2859_v12 = vld [vmem:[%s4034_s3 + $0x180] sm:$0xff]  }
  0x28   : > { %2471 = vmatpush3.bf16.msra.mxu0 %v2850_v30  ;;  %2904 = vpow2.f32 %v674_v14  ;;  %v546_v27 = vmul.f32 %v3212_v34, %v509_v22  ;;  %vm606_vm7 = vcmp.gt.f32.partialorder %v3259_v0, 0.0  ;;  %v638_v30 = vmin.f32 %v3294_v23, 0.0 }
  0x29   : > { %2535 = vmatpush3.bf16.msra.mxu1 %v2851_v31  ;;  %2584 = vmatprep.subr.bf16.mxu0 %v2852_v46  ;;  %2906 = vpow2.f32 %v670_v18  ;;  %v3304_v31 = vadd.f32 %v3221_v37, %v545_v24  ;;  %vm607_vm8 = vcmp.gt.f32.partialorder %v3263_v3, 0.0  ;;  %v680_v35 = vmul.f32 1.442695, %v640_v25  ;;  %v2854_v25 = vld [vmem:[%s4034_s3 + $0x148] sm:$0xff]  }
  0x2a   : > { %2648 = vmatprep.subr.bf16.mxu1 %v2857_v11  ;;  %2908 = vpow2.f32 %v678_v26  ;;  %vm605_vm9 = vcmp.gt.f32.partialorder %v3269_v7, 0.0  ;;  %v676_v39 = vmul.f32 1.442695, %v638_v30  ;;  %v3309_v40 = vmul.f32 %v3212_v34, %v507_v28 }
  0x2b   : > { %2910 = vpow2.f32 %v680_v35  ;;  %v3317_v46 = vadd.f32 %v3221_v37, %v546_v27  ;;  %vm609_vm10 = vcmp.gt.f32.partialorder %v3280_v16, 0.0  ;;  %v642_v54 = vmin.f32 %v3304_v31, 0.0 }
  0x2c   : > { %v2893_v29 = vpop.eup %2892  ;;  %2912 = vpow2.f32 %v676_v39  ;;  %vm610_vm11 = vcmp.gt.f32.partialorder %v3287_v19, 0.0  ;;  %vm608_vm12 = vcmp.gt.f32.partialorder %v3294_v23, 0.0  ;;  %vm612_vm13 = vcmp.gt.f32.partialorder %v3304_v31, 0.0 }
  0x2d   : > { %v2895_v32 = vpop.eup %2894  ;;  %v2352_v33 = vadd.f32 -1.0, %v2893_v29  ;;  %vm613_vm14 = vcmp.gt.f32.partialorder %v3317_v46, 0.0 }
  0x2e   : > { %v2897_v36 = vpop.eup %2896  ;;  %v2353_v38 = vadd.f32 -1.0, %v2895_v32 }
  0x2f   : > { %v2899_v41 = vpop.eup %2898  ;;  %v3314_v42 = vsel %vm603_vm0, %v3226_v43, %v2352_v33  ;;  %v2349_v45 = vadd.f32 -1.0, %v2897_v36  ;;  %v2855_v33 = vld [vmem:[%s4034_s3 + $0x108] sm:$0xff]  }
  0x30   : > { %v2901_v49 = vpop.eup %2900  ;;  %v3322_v50 = vsel %vm604_vm1, %v3229_v44, %v2353_v38  ;;  %v810_v51 = vrot.slane %v3314_v42, 1  ;;  %v2350_v52 = vadd.f32 -1.0, %v2899_v41  ;;  %v867_v55 = vrot.slane %v3314_v42, 2 }
  0x31   : > { %v811_v43 = vrot.slane %v3322_v50, 1  ;;  %v3331_v56 = vpack.c.bf16 %v3322_v50, %v3314_v42  ;;  %v2351_v57 = vadd.f32 -1.0, %v2901_v49  ;;  %v2903_v58 = vpop.eup %2902  ;;  %v868_v44 = vrot.slane %v3322_v50, 2  ;;  %v2856_v42 = vld [vmem:[%s4034_s3 + $0x150] sm:$0xff]  }
  0x32   : > { %v750_v59 = vsel %vm600_vm2, %v3238_v47, %v2349_v45  ;;  %v751_v60 = vsel %vm601_vm3, %v3241_v48, %v2350_v52  ;;  %v2905_v61 = vpop.eup %2904  ;;  %v643_v47 = vmin.f32 %v3317_v46, 0.0  ;;  %v2355_v48 = vadd.f32 -1.0, %v2903_v58  ;;  %v2858_v50 = vld [vmem:[%s4034_s3 + $0x110] sm:$0xff]  }
  0x33   : > { %1694 = vmatprep.mubr.bf16.mxu1 %v3331_v56  ;;  %v752_v62 = vsel %vm602_vm5, %v3250_v53, %v2351_v57  ;;  %v805_v63 = vrot.slane %v750_v59, 1  ;;  %v806_v1 = vrot.slane %v751_v60, 1  ;;  %v862_v2 = vrot.slane %v750_v59, 2  ;;  %v2907_v4 = vpop.eup %2906 }
  0x34   : > { %v808_v5 = vrot.slane %v752_v62, 1  ;;  %v865_v6 = vrot.slane %v752_v62, 2  ;;  %v863_v8 = vrot.slane %v751_v60, 2  ;;  %v2356_v10 = vadd.f32 -1.0, %v2905_v61  ;;  %v2909_v17 = vpop.eup %2908  ;;  %v2860_v62 = vld [vmem:[%s4034_s3 + $0x158] sm:$0xff]  }
  0x35   : > { %v807_v9 = vsel %vm804_vm4, %v805_v63, %v806_v1  ;;  %v2354_v11 = vadd.f32 -1.0, %v2907_v4  ;;  %v952_v15 = vpack.c.bf16 %v751_v60, %v750_v59  ;;  %v756_v22 = vsel %vm606_vm7, %v3259_v0, %v2355_v48  ;;  %v2861_v0 = vld [vmem:[%s4034_s3 + $0x1c8] sm:$0xff]   ;;  %v2911_v29 = vpop.eup %2910  ;;  %v510_v63 = vld [vmem:[%s3194_s22 + $0x58] sm:$0x3] }
  0x36   : > { %v809_v53 = vsel %vm804_vm4, %v806_v1, %v808_v5  ;;  %v864_v13 = vsel %vm861_vm6, %v862_v2, %v863_v8  ;;  %v866_v14 = vsel %vm861_vm6, %v863_v8, %v865_v6  ;;  %v3361_v24 = vsel %vm607_vm8, %v3263_v3, %v2356_v10  ;;  %v2867_v1 = vld [vmem:[%s4034_s3 + $0x190] sm:$0xff]   ;;  %v514_v5 = vld [vmem:[%s3194_s22 + $0x78] sm:$0xff] }
  0x37   : > { %v953_v18 = vpack.c.bf16 %v809_v53, %v807_v9  ;;  %v954_v20 = vpack.c.bf16 %v866_v14, %v864_v13  ;;  %v815_v26 = vrot.slane %v756_v22, 1  ;;  %v816_v27 = vrot.slane %v3361_v24, 1  ;;  %v2869_v48 = vld [vmem:[%s4034_s3 + $0x1d8] sm:$0xff]   ;;  %v515_v13 = vld [vmem:[%s3194_s22 + $0x80] sm:$0xff] }
  0x38   : > { %v812_v28 = vsel %vm804_vm4, %v810_v51, %v811_v43  ;;  %v872_v3 = vrot.slane %v756_v22, 2  ;;  %v3375_v30 = vpack.c.bf16 %v3361_v24, %v756_v22  ;;  %v755_v32 = vsel %vm605_vm9, %v3269_v7, %v2354_v11  ;;  %v2863_v7 = vld [vmem:[%s4034_s3 + $0x188] sm:$0xff]  }
  0x39   : > { %1597 = vmatprep.mubr.bf16.mxu0 %v953_v18  ;;  %1695 = vmatmul.mubr.bf16.vlgmr.msra.gmra.mrb[0].mxu1 %v954_v20  ;;  %v2358_v35 = vadd.f32 -1.0, %v2909_v17  ;;  %v813_v36 = vrot.slane %v755_v32, 1  ;;  %v869_v38 = vsel %vm861_vm6, %v867_v55, %v868_v44  ;;  %v870_v39 = vrot.slane %v755_v32, 2  ;;  %v2913_v55 = vpop.eup %2912  ;;  %v2864_v17 = vld [vmem:[%s4034_s3 + $0x160] sm:$0xff]   ;;  %v513_v20 = vld [vmem:[%s3194_s22 + $0x70] sm:$0x3] }
  0x3a   : > { %1598 = vmatmul.mubr.bf16.vlgmr.msra.gmra.mrb[0].mxu0 %v952_v15  ;;  %v2359_v41 = vadd.f32 -1.0, %v2911_v29  ;;  %2649 = vmatpush3.bf16.msra.mxu1 %v2859_v12  ;;  %v684_v49 = vmul.f32 1.442695, %v642_v54  ;;  %v686_v51 = vmul.f32 1.442695, %v643_v47  ;;  %v3398_v52 = vadd.f32 %v3221_v37, %v3309_v40  ;;  %v511_v54 = vld [vmem:[%s3194_s22 + $0x60] sm:$0xff] }
  0x3b   : > { %2585 = vmatpush3.bf16.msra.mxu0 %v2853_v21  ;;  %1702 = vmatprep.mubr.bf16.mxu1 %v3375_v30  ;;  %v3394_v45 = vsel %vm609_vm10, %v3280_v16, %v2358_v35  ;;  %v873_v57 = vrot.slane %v3361_v24, 2  ;;  %v814_v58 = vsel %vm804_vm4, %v811_v43, %v813_v36  ;;  %v871_v59 = vsel %vm861_vm6, %v868_v44, %v870_v39  ;;  %v512_v43 = vld [vmem:[%s3194_s22 + $0x68] sm:$0xff]  ;;  %v2865_v44 = vld [vmem:[%s4034_s3 + $0x1d0] sm:$0xff]   ;;  %v2862_v12 = vld [vmem:[%s4034_s3 + $0x118] sm:$0xff]  }
  0x3c   : > { %2586 = vmatprep.subr.bf16.mxu0 %v2854_v25  ;;  %v3408_v16 = vsel %vm610_vm11, %v3287_v19, %v2359_v41  ;;  %2650 = vmatprep.subr.bf16.mxu1 %v2861_v0  ;;  %v3411_v40 = vpack.c.bf16 %v814_v58, %v812_v28  ;;  %v3413_v60 = vpack.c.bf16 %v871_v59, %v869_v38  ;;  %v2357_v61 = vadd.f32 -1.0, %v2913_v55  ;;  %v2871_v25 = vld [vmem:[%s4034_s3 + $0x198] sm:$0xff]   ;;  %v2873_v0 = vld [vmem:[%s4034_s3 + $0x1e0] sm:$0xff]  }
  0x3d   : > { %v3425_v19 = vpack.c.bf16 %v3408_v16, %v3394_v45  ;;  %2914 = vpow2.f32 %v684_v49  ;;  %v817_v2 = vsel %vm804_vm4, %v815_v26, %v816_v27  ;;  %v641_v4 = vmin.f32 %v3398_v52, 0.0  ;;  %v518_v35 = vld [vmem:[%s3194_s22 + $0x98] sm:$0xff]  ;;  %v2866_v38 = vld [vmem:[%s4034_s3 + $0x120] sm:$0xff]  }
  0x3e   : > { %2651 = vmatpush3.bf16.msra.mxu1 %v2863_v7  ;;  %1605 = vmatprep.mubr.bf16.mxu0 %v3411_v40  ;;  %2916 = vpow2.f32 %v686_v51  ;;  %v758_v6 = vsel %vm608_vm12, %v3294_v23, %v2357_v61  ;;  %v874_v8 = vsel %vm861_vm6, %v872_v3, %v873_v57  ;;  %v548_v47 = vmul.f32 %v3212_v34, %v511_v54  ;;  %v2875_v7 = vld [vmem:[%s4034_s3 + $0x1a0] sm:$0xff]   ;;  %v2876_v61 = vld [vmem:[%s4034_s3 + $0x1e8] sm:$0xff]  }
  0x3f   : > { %2587 = vmatpush3.bf16.msra.mxu0 %v2855_v33  ;;  %v549_v9 = vmul.f32 %v3212_v34, %v512_v43  ;;  %v818_v10 = vrot.slane %v758_v6, 1  ;;  %v875_v11 = vrot.slane %v758_v6, 2  ;;  %v682_v23 = vmul.f32 1.442695, %v641_v4  ;;  %2652 = vmatprep.subr.bf16.mxu1 %v2865_v44  ;;  %v2868_v43 = vld [vmem:[%s4034_s3 + $0x168] sm:$0xff]  }
  0x40   : > { %2588 = vmatprep.subr.bf16.mxu0 %v2856_v42  ;;  %v547_v53 = vmul.f32 %v3212_v34, %v510_v63  ;;  %v3460_v14 = vadd.f32 %v3221_v37, %v548_v47  ;;  %v551_v18 = vmul.f32 %v3212_v34, %v514_v5  ;;  %v820_v26 = vrot.slane %v3394_v45, 1 }
  0x41   : > { %1703 = vmatmul.mubr.bf16.gmra.mrb[4].mxu1 %v3413_v60  ;;  %v3463_v15 = vadd.f32 %v3221_v37, %v549_v9  ;;  %v876_v21 = vsel %vm861_vm6, %v873_v57, %v875_v11  ;;  %2918 = vpow2.f32 %v682_v23  ;;  %v821_v28 = vrot.slane %v3408_v16, 1  ;;  %v516_v9 = vld [vmem:[%s3194_s22 + $0x88] sm:$0x3] }
  0x42   : > { %1606 = vmatmul.mubr.bf16.gmra.mrb[4].mxu0 %v3331_v56  ;;  %1710 = vmatprep.mubr.bf16.mxu1 %v3425_v19  ;;  %v819_v56 = vsel %vm804_vm4, %v816_v27, %v818_v10  ;;  %v3475_v22 = vadd.f32 %v3221_v37, %v547_v53  ;;  %v517_v27 = vld [vmem:[%s3194_s22 + $0x90] sm:$0xff]  ;;  %v3488_v29 = vpack.c.bf16 %v876_v21, %v874_v8  ;;  %v645_v3 = vmin.f32 %v3460_v14, 0.0  ;;  %v2870_v8 = vld [vmem:[%s4034_s3 + $0x128] sm:$0xff]  }
  0x43   : > { %2589 = vmatpush3.bf16.msra.mxu0 %v2858_v50  ;;  %2653 = vmatpush3.bf16.msra.mxu1 %v2867_v1  ;;  %v3482_v24 = vpack.c.bf16 %v819_v56, %v817_v2  ;;  %v646_v32 = vmin.f32 %v3463_v15, 0.0  ;;  %v877_v36 = vrot.slane %v3394_v45, 2  ;;  %v552_v39 = vmul.f32 %v3212_v34, %v515_v13  ;;  %v2877_v23 = vld [vmem:[%s4034_s3 + $0x1a8] sm:$0xff]   ;;  %v2879_v56 = vld [vmem:[%s4034_s3 + $0x1f0] sm:$0xff]   ;;  %v2882_v45 = vld [vmem:[%s4034_s3 + $0x1f8] sm:$0xff]  }
  0x44   : > { %2590 = vmatprep.subr.bf16.mxu0 %v2860_v62  ;;  %2654 = vmatprep.subr.bf16.mxu1 %v2869_v48  ;;  %v644_v33 = vmin.f32 %v3475_v22, 0.0  ;;  %v3501_v41 = vadd.f32 %v3221_v37, %v551_v18  ;;  %v550_v42 = vmul.f32 %v3212_v34, %v513_v20  ;;  %v690_v49 = vmul.f32 1.442695, %v645_v3  ;;  %v2872_v48 = vld [vmem:[%s4034_s3 + $0x170] sm:$0xff]  }
  0x45   : > { %1613 = vmatprep.mubr.bf16.mxu0 %v3482_v24  ;;  %v692_v51 = vmul.f32 1.442695, %v646_v32  ;;  %v554_v57 = vmul.f32 %v3212_v34, %v517_v27  ;;  %v878_v59 = vrot.slane %v3408_v16, 2  ;;  %v3510_v54 = vadd.f32 %v3221_v37, %v552_v39  ;;  %v2874_v18 = vld [vmem:[%s4034_s3 + $0x130] sm:$0xff]   ;;  %v2883_v16 = vld [vmem:[%s4034_s3 + $0x1b8] sm:$0xff]  }
  0x46   : > { %v688_v55 = vmul.f32 1.442695, %v644_v33  ;;  %v648_v50 = vmin.f32 %v3501_v41, 0.0  ;;  %v555_v44 = vmul.f32 %v3212_v34, %v518_v35  ;;  %vm611_vm15 = vcmp.gt.f32.partialorder %v3398_v52, 0.0  ;;  %v521_v20 = vld [vmem:[%s3194_s22 + $0xb0] sm:$0xff] }
  0x47   : > { %2591 = vmatpush3.bf16.msra.mxu0 %v2862_v12  ;;  %2655 = vmatpush3.bf16.msra.mxu1 %v2871_v25  ;;  %v2915_v58 = vpop.eup %2914  ;;  %2920 = vpow2.f32 %v690_v49  ;;  %v649_v2 = vmin.f32 %v3510_v54, 0.0  ;;  %v3525_v4 = vadd.f32 %v3221_v37, %v550_v42  ;;  %vm615_vm0 = vcmp.gt.f32.partialorder %v3460_v14, 0.0  ;;  %v520_v12 = vld [vmem:[%s3194_s22 + $0xa8] sm:$0xff]  ;;  %v2881_v35 = vld [vmem:[%s4034_s3 + $0x1b0] sm:$0xff]  }
  0x48   : > { %2592 = vmatprep.subr.bf16.mxu0 %v2864_v17  ;;  %2656 = vmatprep.subr.bf16.mxu1 %v2873_v0  ;;  %v2917_v62 = vpop.eup %2916  ;;  %v2361_v63 = vadd.f32 -1.0, %v2915_v58  ;;  %2922 = vpow2.f32 %v692_v51  ;;  %v696_v6 = vmul.f32 1.442695, %v648_v50  ;;  %v3537_v47 = vadd.f32 %v3221_v37, %v554_v57 }
  0x49   : > { %1711 = vmatmul.mubr.bf16.gmra.mrb[8].mxu1 %v3488_v29  ;;  %v2362_v1 = vadd.f32 -1.0, %v2917_v62  ;;  %2924 = vpow2.f32 %v688_v55  ;;  %vm616_vm1 = vcmp.gt.f32.partialorder %v3463_v15, 0.0  ;;  %v698_v10 = vmul.f32 1.442695, %v649_v2  ;;  %v2880_v62 = vld [vmem:[%s4034_s3 + $0x138] sm:$0xff]  }
  0x4a   : > { %1614 = vmatmul.mubr.bf16.gmra.mrb[8].mxu0 %v3375_v30  ;;  %v3530_v5 = vsel %vm612_vm13, %v3304_v31, %v2361_v63  ;;  %v3550_v11 = vadd.f32 %v3221_v37, %v555_v44  ;;  %v822_v17 = vsel %vm804_vm4, %v820_v26, %v821_v28  ;;  %vm614_vm2 = vcmp.gt.f32.partialorder %v3475_v22, 0.0  ;;  %v2878_v26 = vld [vmem:[%s4034_s3 + $0x178] sm:$0xff]  }
  0x4b   : > { %2593 = vmatpush3.bf16.msra.mxu0 %v2866_v38  ;;  %2657 = vmatpush3.bf16.msra.mxu1 %v2875_v7  ;;  %v3546_v31 = vsel %vm613_vm14, %v3317_v46, %v2362_v1  ;;  %v2919_v53 = vpop.eup %2918  ;;  %v825_v13 = vrot.slane %v3530_v5, 1  ;;  %2926 = vpow2.f32 %v696_v6  ;;  %v882_v21 = vrot.slane %v3530_v5, 2 }
  0x4c   : > { %2594 = vmatprep.subr.bf16.mxu0 %v2868_v43  ;;  %2658 = vmatprep.subr.bf16.mxu1 %v2876_v61  ;;  %v3559_v46 = vpack.c.bf16 %v3546_v31, %v3530_v5  ;;  %v2360_v25 = vadd.f32 -1.0, %v2919_v53  ;;  %2928 = vpow2.f32 %v698_v10  ;;  %v647_v27 = vmin.f32 %v3525_v4, 0.0 }
  0x4d   : > { %v826_v0 = vrot.slane %v3546_v31, 1  ;;  %v883_v3 = vrot.slane %v3546_v31, 2  ;;  %v879_v32 = vsel %vm861_vm6, %v877_v36, %v878_v59  ;;  %v651_v33 = vmin.f32 %v3537_v47, 0.0 }
  0x4e   : > { %1718 = vmatprep.mubr.bf16.mxu1 %v3559_v46  ;;  %v761_v38 = vsel %vm611_vm15, %v3398_v52, %v2360_v25  ;;  %v694_v39 = vmul.f32 1.442695, %v647_v27  ;;  %v652_v42 = vmin.f32 %v3550_v11, 0.0  ;;  %v553_v7 = vmul.f32 %v3212_v34, %v516_v9 }
  0x4f   : > { %2595 = vmatpush3.bf16.msra.mxu0 %v2870_v8  ;;  %2659 = vmatpush3.bf16.msra.mxu1 %v2877_v23  ;;  %v823_v36 = vrot.slane %v761_v38, 1  ;;  %v880_v49 = vrot.slane %v761_v38, 2  ;;  %v702_v51 = vmul.f32 1.442695, %v651_v33  ;;  %v557_v55 = vmul.f32 %v3212_v34, %v520_v12  ;;  %v3628_v8 = vld [vmem:[%s4034_s3 + $0x200] sm:$0xff]  }
  0x50   : > { %2596 = vmatprep.subr.bf16.mxu0 %v2872_v48  ;;  %2660 = vmatprep.subr.bf16.mxu1 %v2879_v56  ;;  %2930 = vpow2.f32 %v694_v39  ;;  %v704_v57 = vmul.f32 1.442695, %v652_v42  ;;  %v3601_v52 = vadd.f32 %v3221_v37, %v553_v7  ;;  %v558_v58 = vmul.f32 %v3212_v34, %v521_v20 }
  0x51   : > { %v2921_v50 = vpop.eup %2920  ;;  %v824_v43 = vsel %vm804_vm4, %v821_v28, %v823_v36  ;;  %v881_v44 = vsel %vm861_vm6, %v878_v59, %v880_v49  ;;  %2932 = vpow2.f32 %v702_v51  ;;  %v3611_v61 = vadd.f32 %v3221_v37, %v557_v55 }
  0x52   : > { %v2923_v63 = vpop.eup %2922  ;;  %v3616_v1 = vpack.c.bf16 %v824_v43, %v822_v17  ;;  %v3618_v2 = vpack.c.bf16 %v881_v44, %v879_v32  ;;  %v2364_v5 = vadd.f32 -1.0, %v2921_v50  ;;  %2934 = vpow2.f32 %v704_v57 }
  0x53   : > { %2597 = vmatpush3.bf16.msra.mxu0 %v2874_v18  ;;  %2661 = vmatpush3.bf16.msra.mxu1 %v2881_v35  ;;  %v2925_v28 = vpop.eup %2924  ;;  %v2365_v59 = vadd.f32 -1.0, %v2923_v63  ;;  %vm618_vm3 = vcmp.gt.f32.partialorder %v3501_v41, 0.0  ;;  %v650_v6 = vmin.f32 %v3601_v52, 0.0  ;;  %v827_v10 = vsel %vm804_vm4, %v825_v13, %v826_v0 }
  0x54   : > { %2598 = vmatprep.subr.bf16.mxu0 %v2878_v26  ;;  %2662 = vmatprep.subr.bf16.mxu1 %v2882_v45  ;;  %v765_v9 = vsel %vm615_vm0, %v3460_v14, %v2364_v5  ;;  %v2363_v48 = vadd.f32 -1.0, %v2925_v28  ;;  %vm619_vm5 = vcmp.gt.f32.partialorder %v3510_v54, 0.0  ;;  %v884_v53 = vsel %vm861_vm6, %v882_v21, %v883_v3  ;;  %v522_v28 = vld [vmem:[%s3194_s22 + $0xb8] sm:$0x3] }
  0x55   : > { %1621 = vmatprep.mubr.bf16.mxu0 %v3616_v1  ;;  %1719 = vmatmul.mubr.bf16.gmra.mrb[12].mxu1 %v3618_v2  ;;  %v2927_v23 = vpop.eup %2926  ;;  %v766_v12 = vsel %vm616_vm1, %v3463_v15, %v2365_v59  ;;  %v700_v17 = vmul.f32 1.442695, %v650_v6  ;;  %v3647_v14 = vadd.f32 %v3221_v37, %v558_v58  ;;  %v830_v20 = vrot.slane %v765_v9, 1 }
  0x56   : > { %1622 = vmatmul.mubr.bf16.gmra.mrb[12].mxu0 %v3425_v19  ;;  %v2929_v18 = vpop.eup %2928  ;;  %v3649_v13 = vpack.c.bf16 %v766_v12, %v765_v9  ;;  %v764_v56 = vsel %vm614_vm2, %v3475_v22, %v2363_v48  ;;  %v654_v25 = vmin.f32 %v3611_v61, 0.0  ;;  %v2367_v26 = vadd.f32 -1.0, %v2927_v23 }
  0x57   : > { %2599 = vmatpush3.bf16.msra.mxu0 %v2880_v62  ;;  %2663 = vmatpush3.bf16.msra.mxu1 %v2883_v16  ;;  %v828_v15 = vrot.slane %v764_v56, 1  ;;  %v885_v27 = vrot.slane %v764_v56, 2  ;;  %v2368_v21 = vadd.f32 -1.0, %v2929_v18  ;;  %v831_v32 = vrot.slane %v766_v12, 1 }
  0x58   : > { %2728 = vmatprep.subr.bf16.mxu0 %v3628_v8  ;;  %2760 = vmatprep.subr.bf16.mxu1 %v3628_v8  ;;  %v887_v33 = vrot.slane %v765_v9, 2  ;;  %v888_v35 = vrot.slane %v766_v12, 2  ;;  %2936 = vpow2.f32 %v700_v17  ;;  %v768_v39 = vsel %vm618_vm3, %v3501_v41, %v2367_v26 }
  0x59   : > { %1726 = vmatprep.mubr.bf16.mxu1 %v3649_v13  ;;  %v829_v22 = vsel %vm804_vm4, %v826_v0, %v828_v15  ;;  %v886_v38 = vsel %vm861_vm6, %v883_v3, %v885_v27  ;;  %v3670_v42 = vsel %vm619_vm5, %v3510_v54, %v2368_v21  ;;  %vm617_vm7 = vcmp.gt.f32.partialorder %v3525_v4, 0.0  ;;  %v519_v0 = vld [vmem:[%s3194_s22 + $0xa0] sm:$0x3]  ;;  %s2340_s22 = sshll.u32 %s469_s18, 3 }
  0x5a   : > { %v2931_v7 = vpop.eup %2930  ;;  %v3672_v45 = vpack.c.bf16 %v829_v22, %v827_v10  ;;  %v3674_v36 = vpack.c.bf16 %v886_v38, %v884_v53  ;;  %v3679_v3 = vpack.c.bf16 %v3670_v42, %v768_v39  ;;  %vm621_vm8 = vcmp.gt.f32.partialorder %v3537_v47, 0.0  ;;  %s471_s24 = scalar_lea.vmem %s4033_s2, %s2340_s22  ;;  %s2345_s22 = sshll.u32 %s4054_s28, 1 }
  0x5b   : > { %v2933_v31 = vpop.eup %2932  ;;  %v2366_v49 = vadd.f32 -1.0, %v2931_v7  ;;  %vm622_vm9 = vcmp.gt.f32.partialorder %v3550_v11, 0.0  ;;  %v832_v54 = vsel %vm804_vm4, %v830_v20, %v831_v32  ;;  %v655_v55 = vmin.f32 %v3647_v14, 0.0  ;;  %s492_s21 = sadd.s32 %s2345_s22, %s4062_s27 }
  0x5c   : > { %v2935_v41 = vpop.eup %2934  ;;  %1629 = vmatprep.mubr.bf16.mxu0 %v3672_v45  ;;  %v2370_v51 = vadd.f32 -1.0, %v2933_v31  ;;  %v708_v57 = vmul.f32 1.442695, %v654_v25  ;;  %v889_v50 = vsel %vm861_vm6, %v887_v33, %v888_v35  ;;  %v556_v44 = vmul.f32 %v3212_v34, %v519_v0  ;;  %s2346_s14 = sshll.u32 %s492_s21, 1 }
  0x5d   : > { %1727 = vmatmul.mubr.bf16.gmra.mrb[16].mxu1 %v3674_v36  ;;  %v767_v58 = vsel %vm617_vm7, %v3525_v4, %v2366_v49  ;;  %v2371_v43 = vadd.f32 -1.0, %v2935_v41  ;;  %vm620_vm10 = vcmp.gt.f32.partialorder %v3601_v52, 0.0  ;;  %v710_v4 = vmul.f32 1.442695, %v655_v55  ;;  %s494_s15 = scalar_lea.vmem %s4039_s8, %s2346_s14 }
  0x5e   : > { %1630 = vmatmul.mubr.bf16.gmra.mrb[16].mxu0 %v3559_v46  ;;  %1734 = vmatprep.mubr.bf16.mxu1 %v3679_v3  ;;  %v833_v62 = vrot.slane %v767_v58, 1  ;;  %v890_v63 = vrot.slane %v767_v58, 2  ;;  %v3697_v5 = vsel %vm621_vm8, %v3537_v47, %v2370_v51  ;;  %2938 = vpow2.f32 %v708_v57 }
  0x5f   : > { %v3702_v16 = vsel %vm622_vm9, %v3550_v11, %v2371_v43  ;;  %v835_v59 = vrot.slane %v768_v39, 1  ;;  %v836_v6 = vrot.slane %v3670_v42, 1  ;;  %2940 = vpow2.f32 %v710_v4 }
  0x60   : > { %v834_v9 = vsel %vm804_vm4, %v831_v32, %v833_v62  ;;  %v891_v48 = vsel %vm861_vm6, %v888_v35, %v890_v63  ;;  %v3715_v23 = vpack.c.bf16 %v3702_v16, %v3697_v5  ;;  %v892_v12 = vrot.slane %v768_v39, 2 }
  0x61   : > { %v3709_v10 = vpack.c.bf16 %v834_v9, %v832_v54  ;;  %v3711_v47 = vpack.c.bf16 %v891_v48, %v889_v50  ;;  %v893_v53 = vrot.slane %v3670_v42, 2  ;;  %v593_v17 = vadd.f32 %v3221_v37, %v556_v44 }
  0x62   : > { %v2937_v11 = vpop.eup %2936  ;;  %v559_v18 = vmul.f32 %v3212_v34, %v522_v28  ;;  %v837_v27 = vsel %vm804_vm4, %v835_v59, %v836_v6  ;;  %vm624_vm11 = vcmp.gt.f32.partialorder %v3611_v61, 0.0  ;;  %vm625_vm12 = vcmp.gt.f32.partialorder %v3647_v14, 0.0 }
  0x63   : > { %1637 = vmatprep.mubr.bf16.mxu0 %v3709_v10  ;;  %v2369_v20 = vadd.f32 -1.0, %v2937_v11  ;;  %v653_v56 = vmin.f32 %v593_v17, 0.0  ;;  %v894_v34 = vsel %vm861_vm6, %v892_v12, %v893_v53  ;;  %v840_v55 = vrot.slane %v3697_v5, 1 }
  0x64   : > { %v596_v25 = vadd.f32 %v3221_v37, %v559_v18  ;;  %v841_v57 = vrot.slane %v3702_v16, 1  ;;  %v898_v58 = vrot.slane %v3702_v16, 2  ;;  %vm623_vm13 = vcmp.gt.f32.partialorder %v593_v17, 0.0  ;;  %v523_v18 = vld [vmem:[%s471_s24] sm:$0xff] }
  0x65   : > { %1735 = vmatmul.mubr.bf16.gmra.mrb[20].mxu1 %v3711_v47  ;;  %v770_v15 = vsel %vm620_vm10, %v3601_v52, %v2369_v20  ;;  %v706_v32 = vmul.f32 1.442695, %v653_v56  ;;  %v524_v20 = vld [vmem:[%s471_s24 + $0x8] sm:$0xff] }
  0x66   : > { %1638 = vmatmul.mubr.bf16.gmra.mrb[20].mxu0 %v3649_v13  ;;  %1742 = vmatprep.mubr.bf16.mxu1 %v3715_v23  ;;  %v838_v26 = vrot.slane %v770_v15, 1  ;;  %v895_v21 = vrot.slane %v770_v15, 2  ;;  %v656_v33 = vmin.f32 %v596_v25, 0.0  ;;  %v842_v63 = vsel %vm804_vm4, %v840_v55, %v841_v57  ;;  %v2885_v56 = vld [vmem:[%s4034_s3 + $0x208] sm:$0xff]   ;;  %v2952_v15 = vld [vmem:[%s4036_s5] ss:$0 sm:$0xff] }
  0x67   : > { %2942 = vpow2.f32 %v706_v32  ;;  %vm626_vm14 = vcmp.gt.f32.partialorder %v596_v25, 0.0 }
  0x68   : > { %v2939_v35 = vpop.eup %2938  ;;  %v839_v22 = vsel %vm804_vm4, %v836_v6, %v838_v26  ;;  %v896_v37 = vsel %vm861_vm6, %v893_v53, %v895_v21  ;;  %v712_v42 = vmul.f32 1.442695, %v656_v33  ;;  %v2887_v33 = vld [vmem:[%s4034_s3 + $0x218] sm:$0xff]  }
  0x69   : > { %v3733_v38 = vpack.c.bf16 %v839_v22, %v837_v27  ;;  %v3735_v39 = vpack.c.bf16 %v896_v37, %v894_v34  ;;  %v2373_v52 = vadd.f32 -1.0, %v2939_v35  ;;  %v2941_v7 = vpop.eup %2940  ;;  %v561_v27 = vmul.f32 %v2952_v15, %v524_v20  ;;  %v2888_v37 = vld [vmem:[%s4034_s3 + $0x220] sm:$0xff]  }
  0x6a   : > { %2944 = vpow2.f32 %v712_v42  ;;  %v2374_v0 = vadd.f32 -1.0, %v2941_v7  ;;  %v2889_v42 = vld [vmem:[%s4034_s3 + $0x228] sm:$0xff]   ;;  %v2890_v7 = vld [vmem:[%s4034_s3 + $0x230] sm:$0xff]  }
  0x6b   : > { %1645 = vmatprep.mubr.bf16.mxu0 %v3733_v38  ;;  %v3741_v31 = vsel %vm624_vm11, %v3611_v61, %v2373_v52  ;;  %v897_v61 = vrot.slane %v3697_v5, 2 }
  0x6c   : > { %v928_v49 = vrot.slane %v3741_v31, 2  ;;  %v3746_v41 = vsel %vm625_vm12, %v3647_v14, %v2374_v0 }
  0x6d   : > { %1743 = vmatmul.mubr.bf16.gmra.mrb[24].mxu1 %v3735_v39  ;;  %v929_v54 = vrot.slane %v3746_v41, 2  ;;  %v3751_v51 = vpack.c.bf16 %v3746_v41, %v3741_v31  ;;  %v899_v4 = vsel %vm861_vm6, %v897_v61, %v898_v58  ;;  %v922_v55 = vrot.slane %v3746_v41, 1 }
  0x6e   : > { %1646 = vmatmul.mubr.bf16.gmra.mrb[24].mxu0 %v3679_v3 }
  0x6f   : > { %1750 = vmatprep.mubr.bf16.mxu1 %v3751_v51  ;;  %v930_v50 = vsel %vm861_vm6, %v928_v49, %v929_v54 }
  0x71   : > { %v2943_v14 = vpop.eup %2942 }
  0x72   : > { %v2372_v43 = vadd.f32 -1.0, %v2943_v14 }
  0x74   : > { %v2945_v44 = vpop.eup %2944  ;;  %v773_v62 = vsel %vm623_vm13, %v593_v17, %v2372_v43 }
  0x75   : > { %v843_v28 = vrot.slane %v773_v62, 1  ;;  %v900_v59 = vrot.slane %v773_v62, 2  ;;  %v2375_v5 = vadd.f32 -1.0, %v2945_v44 }
  0x77   : > { %v844_v16 = vsel %vm804_vm4, %v841_v57, %v843_v28  ;;  %v901_v6 = vsel %vm861_vm6, %v898_v58, %v900_v59  ;;  %v3767_v11 = vsel %vm626_vm14, %v596_v25, %v2375_v5  ;;  %v525_v25 = vld [vmem:[%s471_s24 + $0x10] sm:$0x3] }
  0x78   : > { %v3763_v9 = vpack.c.bf16 %v844_v16, %v842_v63  ;;  %v3765_v48 = vpack.c.bf16 %v901_v6, %v899_v4  ;;  %v931_v12 = vrot.slane %v3767_v11, 2  ;;  %v562_v26 = vmul.f32 %v2952_v15, %v525_v25 }
  0x7a   : > { %1653 = vmatprep.mubr.bf16.mxu0 %v3763_v9  ;;  %1751 = vmatmul.mubr.bf16.gmra.mrb[28].mxu1 %v3765_v48  ;;  %v932_v53 = vsel %vm861_vm6, %v929_v54, %v931_v12  ;;  %v921_v54 = vrot.slane %v3741_v31, 1 }
  0x7b   : > { %1654 = vmatmul.mubr.bf16.gmra.mrb[28].mxu0 %v3715_v23  ;;  %1888 = vmatprep.mubr.bf16.mxu1 %v3482_v24  ;;  %v3782_v17 = vpack.c.bf16 %v932_v53, %v930_v50 }
  0x7c   : > { %1791 = vmatprep.mubr.bf16.mxu0 %v3413_v60  ;;  %v560_v60 = vmul.f32 %v2952_v15, %v523_v18  ;;  %v923_v31 = vsel %vm804_vm4, %v921_v54, %v922_v55 }
  0x82   : > { %1889 = vmatmul.mubr.bf16.vlgmr.msra.gmra.mrb[32].mxu1 %v3375_v30  ;;  %v2886_v30 = vld [vmem:[%s4034_s3 + $0x210] sm:$0xff]  }
  0x83   : > { %1792 = vmatmul.mubr.bf16.vlgmr.msra.gmra.mrb[32].mxu0 %v3411_v40  ;;  %1896 = vmatprep.mubr.bf16.mxu1 %v3616_v1  ;;  %v2953_v40 = vld [vmem:[%s4037_s6] ss:$0 sm:$0xff] }
  0x84   : > { %2729 = vmatpush3.bf16.msra.mxu0 %v3628_v8  ;;  %1799 = vmatprep.mubr.bf16.mxu0 %v3488_v29  ;;  %v3802_v34 = vadd.f32 %v2953_v40, %v560_v60  ;;  %v3804_v21 = vadd.f32 %v2953_v40, %v561_v27  ;;  %v3806_v32 = vadd.f32 %v2953_v40, %v562_v26 }
  0x85   : > { %2730 = vmatprep.subr.bf16.mxu0 %v2885_v56  ;;  %2768 = vmatpush3.bf16.msra.mxu1 %v3628_v8 }
  0x86   : > { %2761 = vmatprep.subr.bf16.mxu1 %v2885_v56  ;;  %v657_v8 = vmin.f32 %v3802_v34, 0.0  ;;  %v658_v35 = vmin.f32 %v3804_v21, 0.0  ;;  %v659_v22 = vmin.f32 %v3806_v32, 0.0  ;;  %vm627_vm15 = vcmp.gt.f32.partialorder %v3802_v34, 0.0 }
  0x87   : > { %vm628_vm0 = vcmp.gt.f32.partialorder %v3804_v21, 0.0  ;;  %vm629_vm1 = vcmp.gt.f32.partialorder %v3806_v32, 0.0 }
  0x88   : > { %2731 = vmatpush3.bf16.msra.mxu0 %v2885_v56  ;;  %v716_v52 = vmul.f32 1.442695, %v658_v35 }
  0x89   : > { %2732 = vmatprep.subr.bf16.mxu0 %v2886_v30  ;;  %2769 = vmatpush3.bf16.msra.mxu1 %v2885_v56 }
  0x8a   : > { %1897 = vmatmul.mubr.bf16.gmra.mrb[36].mxu1 %v3425_v19  ;;  %2762 = vmatprep.subr.bf16.mxu1 %v2886_v30  ;;  %v714_v19 = vmul.f32 1.442695, %v657_v8 }
  0x8b   : > { %1800 = vmatmul.mubr.bf16.gmra.mrb[36].mxu0 %v3482_v24  ;;  %1904 = vmatprep.mubr.bf16.mxu1 %v3672_v45  ;;  %v718_v24 = vmul.f32 1.442695, %v659_v22 }
  0x8c   : > { %1807 = vmatprep.mubr.bf16.mxu0 %v3618_v2  ;;  %2733 = vmatpush3.bf16.msra.mxu0 %v2886_v30  ;;  %2946 = vpow2.f32 %v714_v19 }
  0x8d   : > { %2734 = vmatprep.subr.bf16.mxu0 %v2887_v33  ;;  %2770 = vmatpush3.bf16.msra.mxu1 %v2886_v30  ;;  %2948 = vpow2.f32 %v716_v52 }
  0x8e   : > { %2763 = vmatprep.subr.bf16.mxu1 %v2887_v33  ;;  %2950 = vpow2.f32 %v718_v24 }
  0x90   : > { %2735 = vmatpush3.bf16.msra.mxu0 %v2887_v33 }
  0x91   : > { %2736 = vmatprep.subr.bf16.mxu0 %v2888_v37  ;;  %2771 = vmatpush3.bf16.msra.mxu1 %v2887_v33 }
  0x92   : > { %1905 = vmatmul.mubr.bf16.gmra.mrb[40].mxu1 %v3559_v46  ;;  %2764 = vmatprep.subr.bf16.mxu1 %v2888_v37  ;;  %v2891_v46 = vld [vmem:[%s4034_s3 + $0x238] sm:$0xff]  }
  0x93   : > { %1808 = vmatmul.mubr.bf16.gmra.mrb[40].mxu0 %v3616_v1  ;;  %1912 = vmatprep.mubr.bf16.mxu1 %v3709_v10 }
  0x94   : > { %1815 = vmatprep.mubr.bf16.mxu0 %v3674_v36  ;;  %2737 = vmatpush3.bf16.msra.mxu0 %v2888_v37 }
  0x95   : > { %2738 = vmatprep.subr.bf16.mxu0 %v2889_v42  ;;  %2772 = vmatpush3.bf16.msra.mxu1 %v2888_v37 }
  0x96   : > { %2765 = vmatprep.subr.bf16.mxu1 %v2889_v42  ;;  %v2947_v1 = vpop.eup %2946 }
  0x97   : > { %v2949_v0 = vpop.eup %2948  ;;  %v2376_v57 = vadd.f32 -1.0, %v2947_v1 }
  0x98   : > { %2739 = vmatpush3.bf16.msra.mxu0 %v2889_v42  ;;  %v2951_v49 = vpop.eup %2950 }
  0x99   : > { %2740 = vmatprep.subr.bf16.mxu0 %v2890_v7  ;;  %2773 = vmatpush3.bf16.msra.mxu1 %v2889_v42  ;;  %v2378_v61 = vadd.f32 -1.0, %v2951_v49  ;;  %v777_v58 = vsel %vm627_vm15, %v3802_v34, %v2376_v57 }
  0x9a   : > { %1913 = vmatmul.mubr.bf16.gmra.mrb[44].mxu1 %v3649_v13  ;;  %2766 = vmatprep.subr.bf16.mxu1 %v2890_v7  ;;  %v924_v13 = vrot.slane %v3767_v11, 1  ;;  %v938_v43 = vrot.slane %v777_v58, 1 }
  0x9b   : > { %1816 = vmatmul.mubr.bf16.gmra.mrb[44].mxu0 %v3672_v45  ;;  %1920 = vmatprep.mubr.bf16.mxu1 %v3733_v38  ;;  %v2377_v45 = vadd.f32 -1.0, %v2949_v0  ;;  %v779_v50 = vsel %vm629_vm1, %v3806_v32, %v2378_v61 }
  0x9c   : > { %1823 = vmatprep.mubr.bf16.mxu0 %v3711_v47  ;;  %2741 = vmatpush3.bf16.msra.mxu0 %v2890_v7  ;;  %v925_v41 = vsel %vm804_vm4, %v922_v55, %v924_v13  ;;  %v941_v62 = vrot.slane %v779_v50, 1  ;;  %v948_v59 = vrot.slane %v779_v50, 2 }
  0x9d   : > { %2742 = vmatprep.subr.bf16.mxu0 %v2891_v46  ;;  %2774 = vmatpush3.bf16.msra.mxu1 %v2890_v7  ;;  %v977_v14 = vpack.c.bf16 %v925_v41, %v923_v31 }
  0x9e   : > { %2767 = vmatprep.subr.bf16.mxu1 %v2891_v46 }
  0xa0   : > { %2743 = vmatpush3.bf16.msra.mxu0 %v2891_v46 }
  0xa1   : > { %2775 = vmatpush3.bf16.msra.mxu1 %v2891_v46 }
  0xa2   : > { %1921 = vmatmul.mubr.bf16.gmra.mrb[48].mxu1 %v3679_v3  ;;  %v778_v3 = vsel %vm628_vm0, %v3804_v21, %v2377_v45 }
  0xa3   : > { %1824 = vmatmul.mubr.bf16.gmra.mrb[48].mxu0 %v3709_v10  ;;  %1928 = vmatprep.mubr.bf16.mxu1 %v3763_v9  ;;  %v939_v44 = vrot.slane %v778_v3, 1  ;;  %v979_v28 = vpack.c.bf16 %v778_v3, %v777_v58 }
  0xa4   : > { %1831 = vmatprep.mubr.bf16.mxu0 %v3735_v39 }
  0xa5   : > { %v940_v10 = vsel %vm804_vm4, %v938_v43, %v939_v44  ;;  %v942_v63 = vsel %vm804_vm4, %v939_v44, %v941_v62  ;;  %vm2108_vm4 = vcmask 1040384  }
  0xa6   : > { %v980_v4 = vpack.c.bf16 %v942_v63, %v940_v10 }
  0xaa   : > { %1929 = vmatmul.mubr.bf16.gmra.mrb[52].mxu1 %v3715_v23  ;;  %v945_v23 = vrot.slane %v777_v58, 2 }
  0xab   : > { %1832 = vmatmul.mubr.bf16.gmra.mrb[52].mxu0 %v3733_v38  ;;  %1936 = vmatprep.mubr.bf16.mxu1 %v977_v14  ;;  %v946_v38 = vrot.slane %v778_v3, 2 }
  0xac   : > { %1839 = vmatprep.mubr.bf16.mxu0 %v3765_v48 }
  0xad   : > { %v949_v5 = vsel %vm861_vm6, %v946_v38, %v948_v59 }
  0xb2   : > { %1937 = vmatmul.mubr.bf16.gmra.mrb[56].mxu1 %v3751_v51  ;;  %v947_v51 = vsel %vm861_vm6, %v945_v23, %v946_v38 }
  0xb3   : > { %1840 = vmatmul.mubr.bf16.gmra.mrb[56].mxu0 %v3763_v9  ;;  %1944 = vmatprep.mubr.bf16.mxu1 %v980_v4  ;;  %v981_v16 = vpack.c.bf16 %v949_v5, %v947_v51  ;;  %v3873_v9 = vld [vmem:[%s4035_s4] ss:$0 sm:$0xff] }
  0xb4   : > { %1847 = vmatprep.mubr.bf16.mxu0 %v3782_v17 }
  0xba   : > { %1945 = vmatmul.mubr.bf16.gmra.mrb[60].mxu1 %v979_v28 }
  0xbb   : > { %1848 = vmatmul.mubr.bf16.gmra.mrb[60].mxu0 %v977_v14  ;;  %2752 = vmatprep.mubr.bf16.mxu1 %v3735_v39 }
  0xbc   : > { %2744 = vmatprep.mubr.bf16.mxu0 %v3488_v29 }
  0xc2   : > { %2753 = vmatmul.mubr.bf16.vlgmr.msra.gmra.mrb[64].mxu1 %v3765_v48 }
  0xc3   : > { %2745 = vmatmul.mubr.bf16.vlgmr.msra.gmra.mrb[64].mxu0 %v3618_v2  ;;  %2756 = vmatprep.mubr.bf16.mxu1 %v3782_v17 }
  0xc4   : > { %2748 = vmatprep.mubr.bf16.mxu0 %v3674_v36 }
  0xca   : > { %2757 = vmatmul.mubr.bf16.gmra.mrb[68].mxu1 %v981_v16 }
  0xcb   : > { %2749 = vmatmul.mubr.bf16.gmra.mrb[68].mxu0 %v3711_v47 }
 0x10c   : > { %v2536_v29 = vpop.f32.mrb[0].mxu1 }
 0x10d   : > { %v2472_v39 = vpop.f32.mrb[0].mxu0  ;;  %v2537_v6 = vpop.f32.mrb[1].mxu1 }
 0x10e   : > { %v2473_v2 = vpop.f32.mrb[1].mxu0  ;;  %v2538_v48 = vadd.f32 %v2537_v6, %v2536_v29  ;;  %v2539_v11 = vpop.f32.mrb[2].mxu1 }
 0x10f   : > { %v2474_v12 = vadd.f32 %v2473_v2, %v2472_v39  ;;  %v2475_v53 = vpop.f32.mrb[2].mxu0  ;;  %v2540_v17 = vpop.f32.mrb[3].mxu1 }
 0x110   : > { %v2476_v18 = vpop.f32.mrb[3].mxu0  ;;  %v2541_v36 = vadd.f32 %v2540_v17, %v2539_v11 }
 0x111   : > { %v1600_v20 = vadd.f32 %v2474_v12, %v3873_v9  ;;  %v2477_v56 = vadd.f32 %v2476_v18, %v2475_v53 }
 0x113   : > { %v1603_v47 = vadd.f32 %v2477_v56, %v3873_v9  ;;  %v3877_v25 = vadd.f32 %v2538_v48, %v1600_v20 }
 0x114   : > { %v2542_v15 = vpop.f32.mrb[4].mxu1 }
 0x115   : > { %v3879_v60 = vadd.f32 %v2541_v36, %v1603_v47  ;;  %v2478_v27 = vpop.f32.mrb[4].mxu0  ;;  %v2543_v26 = vpop.f32.mrb[5].mxu1 }
 0x116   : > { %v2479_v30 = vpop.f32.mrb[5].mxu0  ;;  %v2544_v40 = vadd.f32 %v2543_v26, %v2542_v15  ;;  %v2545_v34 = vpop.f32.mrb[6].mxu1 }
 0x117   : > { %v2480_v21 = vadd.f32 %v2479_v30, %v2478_v27  ;;  %v2481_v32 = vpop.f32.mrb[6].mxu0  ;;  %v2546_v33 = vpop.f32.mrb[7].mxu1 }
 0x118   : > { %v2482_v8 = vpop.f32.mrb[7].mxu0  ;;  %v2547_v35 = vadd.f32 %v2546_v33, %v2545_v34 }
 0x119   : > { %v1608_v22 = vadd.f32 %v2480_v21, %v3873_v9  ;;  %v2483_v37 = vadd.f32 %v2482_v8, %v2481_v32 }
 0x11b   : > { %v1611_v19 = vadd.f32 %v2483_v37, %v3873_v9  ;;  %v3883_v52 = vadd.f32 %v2544_v40, %v1608_v22 }
 0x11c   : > { %v2548_v24 = vpop.f32.mrb[8].mxu1 }
 0x11d   : > { %v3885_v42 = vadd.f32 %v2547_v35, %v1611_v19  ;;  %v2484_v7 = vpop.f32.mrb[8].mxu0  ;;  %v2549_v46 = vpop.f32.mrb[9].mxu1 }
 0x11e   : > { %v2485_v1 = vpop.f32.mrb[9].mxu0  ;;  %v2550_v0 = vadd.f32 %v2549_v46, %v2548_v24  ;;  %v2551_v49 = vpop.f32.mrb[10].mxu1 }
 0x11f   : > { %v2486_v54 = vadd.f32 %v2485_v1, %v2484_v7  ;;  %v2487_v55 = vpop.f32.mrb[10].mxu0  ;;  %v2552_v13 = vpop.f32.mrb[11].mxu1 }
 0x120   : > { %v2488_v57 = vpop.f32.mrb[11].mxu0  ;;  %v2553_v45 = vadd.f32 %v2552_v13, %v2551_v49 }
 0x121   : > { %v1616_v61 = vadd.f32 %v2486_v54, %v3873_v9  ;;  %v2489_v31 = vadd.f32 %v2488_v57, %v2487_v55 }
 0x123   : > { %v1619_v41 = vadd.f32 %v2489_v31, %v3873_v9  ;;  %v3889_v58 = vadd.f32 %v2550_v0, %v1616_v61 }
 0x125   : > { %v3891_v3 = vadd.f32 %v2553_v45, %v1619_v41 }
 0x128   : > { %v2554_v50 = vpop.f32.mrb[12].mxu1 }
 0x129   : > { %v2490_v14 = vpop.f32.mrb[12].mxu0  ;;  %v2555_v43 = vpop.f32.mrb[13].mxu1 }
 0x12a   : > { %v2491_v44 = vpop.f32.mrb[13].mxu0  ;;  %v2556_v62 = vadd.f32 %v2555_v43, %v2554_v50  ;;  %v2557_v10 = vpop.f32.mrb[14].mxu1 }
 0x12b   : > { %v2492_v63 = vadd.f32 %v2491_v44, %v2490_v14  ;;  %v2493_v4 = vpop.f32.mrb[14].mxu0  ;;  %v2558_v28 = vpop.f32.mrb[15].mxu1 }
 0x12c   : > { %v2494_v23 = vpop.f32.mrb[15].mxu0  ;;  %v2559_v38 = vadd.f32 %v2558_v28, %v2557_v10 }
 0x12d   : > { %v1624_v59 = vadd.f32 %v2492_v63, %v3873_v9  ;;  %v2495_v51 = vadd.f32 %v2494_v23, %v2493_v4 }
 0x12f   : > { %v1627_v5 = vadd.f32 %v2495_v51, %v3873_v9  ;;  %v3895_v16 = vadd.f32 %v2556_v62, %v1624_v59 }
 0x130   : > { %v2560_v29 = vpop.f32.mrb[16].mxu1 }
 0x131   : > { %v3897_v39 = vadd.f32 %v2559_v38, %v1627_v5  ;;  %v2496_v6 = vpop.f32.mrb[16].mxu0  ;;  %v2561_v2 = vpop.f32.mrb[17].mxu1 }
 0x132   : > { %v2497_v48 = vpop.f32.mrb[17].mxu0  ;;  %v2562_v11 = vadd.f32 %v2561_v2, %v2560_v29  ;;  %v2563_v12 = vpop.f32.mrb[18].mxu1 }
 0x133   : > { %v2498_v53 = vadd.f32 %v2497_v48, %v2496_v6  ;;  %v2499_v17 = vpop.f32.mrb[18].mxu0  ;;  %v2564_v18 = vpop.f32.mrb[19].mxu1 }
 0x134   : > { %v2500_v36 = vpop.f32.mrb[19].mxu0  ;;  %v2565_v20 = vadd.f32 %v2564_v18, %v2563_v12 }
 0x135   : > { %v1632_v56 = vadd.f32 %v2498_v53, %v3873_v9  ;;  %v2501_v47 = vadd.f32 %v2500_v36, %v2499_v17 }
 0x137   : > { %v1635_v15 = vadd.f32 %v2501_v47, %v3873_v9  ;;  %v3901_v27 = vadd.f32 %v2562_v11, %v1632_v56 }
 0x138   : > { %v2566_v26 = vpop.f32.mrb[20].mxu1 }
 0x139   : > { %v3903_v30 = vadd.f32 %v2565_v20, %v1635_v15  ;;  %v2502_v40 = vpop.f32.mrb[20].mxu0  ;;  %v2567_v34 = vpop.f32.mrb[21].mxu1 }
 0x13a   : > { %v2503_v21 = vpop.f32.mrb[21].mxu0  ;;  %v2568_v32 = vadd.f32 %v2567_v34, %v2566_v26  ;;  %v2569_v33 = vpop.f32.mrb[22].mxu1 }
 0x13b   : > { %v2504_v8 = vadd.f32 %v2503_v21, %v2502_v40  ;;  %v2505_v35 = vpop.f32.mrb[22].mxu0  ;;  %v2570_v22 = vpop.f32.mrb[23].mxu1 }
 0x13c   : > { %v2506_v37 = vpop.f32.mrb[23].mxu0  ;;  %v2571_v19 = vadd.f32 %v2570_v22, %v2569_v33 }
 0x13d   : > { %v1640_v24 = vadd.f32 %v2504_v8, %v3873_v9  ;;  %v2507_v7 = vadd.f32 %v2506_v37, %v2505_v35 }
 0x13f   : > { %v1643_v46 = vadd.f32 %v2507_v7, %v3873_v9  ;;  %v3907_v1 = vadd.f32 %v2568_v32, %v1640_v24 }
 0x140   : > { %v2572_v0 = vpop.f32.mrb[24].mxu1 }
 0x141   : > { %v3909_v49 = vadd.f32 %v2571_v19, %v1643_v46  ;;  %v2508_v54 = vpop.f32.mrb[24].mxu0  ;;  %v2573_v55 = vpop.f32.mrb[25].mxu1 }
 0x142   : > { %v2509_v13 = vpop.f32.mrb[25].mxu0  ;;  %v2574_v57 = vadd.f32 %v2573_v55, %v2572_v0  ;;  %v2575_v45 = vpop.f32.mrb[26].mxu1 }
 0x143   : > { %v2510_v61 = vadd.f32 %v2509_v13, %v2508_v54  ;;  %v2511_v31 = vpop.f32.mrb[26].mxu0  ;;  %v2576_v41 = vpop.f32.mrb[27].mxu1 }
 0x144   : > { %v2512_v50 = vpop.f32.mrb[27].mxu0  ;;  %v2577_v14 = vadd.f32 %v2576_v41, %v2575_v45 }
 0x145   : > { %v1648_v43 = vadd.f32 %v2510_v61, %v3873_v9  ;;  %v2513_v44 = vadd.f32 %v2512_v50, %v2511_v31 }
 0x147   : > { %v1651_v62 = vadd.f32 %v2513_v44, %v3873_v9  ;;  %v3913_v10 = vadd.f32 %v2574_v57, %v1648_v43 }
 0x149   : > { %v3915_v63 = vadd.f32 %v2577_v14, %v1651_v62 }
 0x14d   : > { %v2578_v4 = vpop.f32.mrb[28].mxu1 }
 0x14e   : > { %v2514_v28 = vpop.f32.mrb[28].mxu0  ;;  %v2579_v23 = vpop.f32.mrb[29].mxu1 }
 0x14f   : > { %v2515_v38 = vpop.f32.mrb[29].mxu0  ;;  %v2580_v59 = vadd.f32 %v2579_v23, %v2578_v4  ;;  %v2581_v51 = vpop.f32.mrb[30].mxu1 }
 0x150   : > { %v2516_v5 = vadd.f32 %v2515_v38, %v2514_v28  ;;  %v2517_v29 = vpop.f32.mrb[30].mxu0  ;;  %v2582_v6 = vpop.f32.mrb[31].mxu1 }
 0x151   : > { %v2518_v2 = vpop.f32.mrb[31].mxu0  ;;  %v2583_v48 = vadd.f32 %v2582_v6, %v2581_v51 }
 0x152   : > { %v1656_v11 = vadd.f32 %v2516_v5, %v3873_v9  ;;  %v2519_v12 = vadd.f32 %v2518_v2, %v2517_v29 }
 0x154   : > { %v1659_v53 = vadd.f32 %v2519_v12, %v3873_v9  ;;  %v3919_v17 = vadd.f32 %v2580_v59, %v1656_v11 }
 0x155   : > { %v2664_v18 = vpop.f32.mrb[32].mxu1 }
 0x156   : > { %v3921_v36 = vadd.f32 %v2583_v48, %v1659_v53  ;;  %v2600_v20 = vpop.f32.mrb[32].mxu0  ;;  %v2665_v56 = vpop.f32.mrb[33].mxu1 }
 0x157   : > { %v2601_v47 = vpop.f32.mrb[33].mxu0  ;;  %v2666_v15 = vadd.f32 %v2665_v56, %v2664_v18  ;;  %v2667_v26 = vpop.f32.mrb[34].mxu1 }
 0x158   : > { %v2602_v40 = vadd.f32 %v2601_v47, %v2600_v20  ;;  %v2603_v34 = vpop.f32.mrb[34].mxu0  ;;  %v2668_v21 = vpop.f32.mrb[35].mxu1 }
 0x159   : > { %v2604_v32 = vpop.f32.mrb[35].mxu0  ;;  %v2669_v33 = vadd.f32 %v2668_v21, %v2667_v26 }
 0x15a   : > { %v1794_v8 = vadd.f32 %v2602_v40, %v3877_v25  ;;  %v2605_v35 = vadd.f32 %v2604_v32, %v2603_v34 }
 0x15c   : > { %v1797_v9 = vadd.f32 %v2605_v35, %v3879_v60  ;;  %v3925_v22 = vadd.f32 %v2666_v15, %v1794_v8 }
 0x15d   : > { %v2670_v37 = vpop.f32.mrb[36].mxu1 }
 0x15e   : > { %v2606_v19 = vpop.f32.mrb[36].mxu0  ;;  %v2671_v24 = vpop.f32.mrb[37].mxu1  ;;  %v3927_v7 = vadd.f32 %v2669_v33, %v1797_v9 }
 0x15f   : > { %v2607_v46 = vpop.f32.mrb[37].mxu0  ;;  %v2672_v0 = vadd.f32 %v2671_v24, %v2670_v37  ;;  %v2673_v54 = vpop.f32.mrb[38].mxu1 }
 0x160   : > { %v2608_v55 = vadd.f32 %v2607_v46, %v2606_v19  ;;  %v2609_v13 = vpop.f32.mrb[38].mxu0  ;;  %v2674_v57 = vpop.f32.mrb[39].mxu1 }
 0x161   : > { %v2610_v45 = vpop.f32.mrb[39].mxu0  ;;  %v2675_v61 = vadd.f32 %v2674_v57, %v2673_v54 }
 0x162   : > { %v1802_v25 = vadd.f32 %v2608_v55, %v3883_v52  ;;  %v2611_v31 = vadd.f32 %v2610_v45, %v2609_v13 }
 0x164   : > { %v1805_v60 = vadd.f32 %v2611_v31, %v3885_v42  ;;  %v3931_v41 = vadd.f32 %v2672_v0, %v1802_v25 }
 0x165   : > { %v2676_v50 = vpop.f32.mrb[40].mxu1 }
 0x166   : > { %v2612_v14 = vpop.f32.mrb[40].mxu0  ;;  %v2677_v43 = vpop.f32.mrb[41].mxu1  ;;  %v3933_v44 = vadd.f32 %v2675_v61, %v1805_v60 }
 0x167   : > { %v2613_v62 = vpop.f32.mrb[41].mxu0  ;;  %v2678_v4 = vadd.f32 %v2677_v43, %v2676_v50  ;;  %v2679_v28 = vpop.f32.mrb[42].mxu1 }
 0x168   : > { %v2614_v23 = vadd.f32 %v2613_v62, %v2612_v14  ;;  %v2615_v38 = vpop.f32.mrb[42].mxu0  ;;  %v2680_v59 = vpop.f32.mrb[43].mxu1 }
 0x169   : > { %v2616_v51 = vpop.f32.mrb[43].mxu0  ;;  %v2681_v5 = vadd.f32 %v2680_v59, %v2679_v28 }
 0x16a   : > { %v1810_v52 = vadd.f32 %v2614_v23, %v3889_v58  ;;  %v2617_v29 = vadd.f32 %v2616_v51, %v2615_v38 }
 0x16c   : > { %v1813_v42 = vadd.f32 %v2617_v29, %v3891_v3  ;;  %v3937_v6 = vadd.f32 %v2678_v4, %v1810_v52 }
 0x16d   : > { %v2682_v2 = vpop.f32.mrb[44].mxu1 }
 0x16e   : > { %v2618_v48 = vpop.f32.mrb[44].mxu0  ;;  %v2683_v11 = vpop.f32.mrb[45].mxu1  ;;  %v3939_v12 = vadd.f32 %v2681_v5, %v1813_v42 }
 0x16f   : > { %v2619_v53 = vpop.f32.mrb[45].mxu0  ;;  %v2684_v18 = vadd.f32 %v2683_v11, %v2682_v2  ;;  %v2685_v20 = vpop.f32.mrb[46].mxu1 }
 0x170   : > { %v2620_v56 = vadd.f32 %v2619_v53, %v2618_v48  ;;  %v2621_v47 = vpop.f32.mrb[46].mxu0  ;;  %v2686_v15 = vpop.f32.mrb[47].mxu1 }
 0x171   : > { %v2622_v26 = vpop.f32.mrb[47].mxu0  ;;  %v2687_v40 = vadd.f32 %v2686_v15, %v2685_v20 }
 0x172   : > { %v1818_v58 = vadd.f32 %v2620_v56, %v3895_v16  ;;  %v2623_v34 = vadd.f32 %v2622_v26, %v2621_v47 }
 0x174   : > { %v1821_v3 = vadd.f32 %v2623_v34, %v3897_v39  ;;  %v3943_v21 = vadd.f32 %v2684_v18, %v1818_v58 }
 0x175   : > { %v2688_v32 = vpop.f32.mrb[48].mxu1 }
 0x176   : > { %v2624_v33 = vpop.f32.mrb[48].mxu0  ;;  %v2689_v8 = vpop.f32.mrb[49].mxu1  ;;  %v3945_v35 = vadd.f32 %v2687_v40, %v1821_v3 }
 0x177   : > { %v2625_v9 = vpop.f32.mrb[49].mxu0  ;;  %v2690_v37 = vadd.f32 %v2689_v8, %v2688_v32  ;;  %v2691_v19 = vpop.f32.mrb[50].mxu1 }
 0x178   : > { %v2626_v24 = vadd.f32 %v2625_v9, %v2624_v33  ;;  %v2627_v46 = vpop.f32.mrb[50].mxu0  ;;  %v2692_v0 = vpop.f32.mrb[51].mxu1 }
 0x179   : > { %v2628_v54 = vpop.f32.mrb[51].mxu0  ;;  %v2693_v55 = vadd.f32 %v2692_v0, %v2691_v19 }
 0x17a   : > { %v1826_v16 = vadd.f32 %v2626_v24, %v3901_v27  ;;  %v2629_v13 = vadd.f32 %v2628_v54, %v2627_v46 }
 0x17c   : > { %v1829_v39 = vadd.f32 %v2629_v13, %v3903_v30  ;;  %v1923_v57 = vadd.f32 %v2690_v37, %v1826_v16 }
 0x17d   : > { %v2694_v45 = vpop.f32.mrb[52].mxu1 }
 0x17e   : > { %v2630_v61 = vpop.f32.mrb[52].mxu0  ;;  %v2695_v25 = vpop.f32.mrb[53].mxu1  ;;  %v3949_v31 = vadd.f32 %v2693_v55, %v1829_v39 }
 0x17f   : > { %v2631_v60 = vpop.f32.mrb[53].mxu0  ;;  %v2696_v50 = vadd.f32 %v2695_v25, %v2694_v45  ;;  %v2697_v14 = vpop.f32.mrb[54].mxu1 }
 0x180   : > { %v2632_v43 = vadd.f32 %v2631_v60, %v2630_v61  ;;  %v2633_v62 = vpop.f32.mrb[54].mxu0  ;;  %v2698_v4 = vpop.f32.mrb[55].mxu1 }
 0x181   : > { %v2634_v28 = vpop.f32.mrb[55].mxu0  ;;  %v2699_v23 = vadd.f32 %v2698_v4, %v2697_v14 }
 0x182   : > { %v1834_v38 = vadd.f32 %v2632_v43, %v3907_v1  ;;  %v2635_v27 = vadd.f32 %v2634_v28, %v2633_v62 }
 0x184   : > { %v1837_v59 = vadd.f32 %v2635_v27, %v3909_v49  ;;  %v1931_v30 = vadd.f32 %v2696_v50, %v1834_v38 }
 0x185   : > { %v2700_v51 = vpop.f32.mrb[56].mxu1 }
 0x186   : > { %v2636_v5 = vpop.f32.mrb[56].mxu0  ;;  %v2701_v52 = vpop.f32.mrb[57].mxu1  ;;  %v1934_v29 = vadd.f32 %v2699_v23, %v1837_v59 }
 0x187   : > { %v2637_v42 = vpop.f32.mrb[57].mxu0  ;;  %v2702_v2 = vadd.f32 %v2701_v52, %v2700_v51  ;;  %v2703_v48 = vpop.f32.mrb[58].mxu1 }
 0x188   : > { %v2638_v11 = vadd.f32 %v2637_v42, %v2636_v5  ;;  %v2639_v53 = vpop.f32.mrb[58].mxu0  ;;  %v2704_v18 = vpop.f32.mrb[59].mxu1 }
 0x189   : > { %v2640_v20 = vpop.f32.mrb[59].mxu0  ;;  %v2705_v56 = vadd.f32 %v2704_v18, %v2703_v48 }
 0x18a   : > { %v1842_v1 = vadd.f32 %v2638_v11, %v3913_v10  ;;  %v2641_v47 = vadd.f32 %v2640_v20, %v2639_v53 }
 0x18c   : > { %v1845_v49 = vadd.f32 %v2641_v47, %v3915_v63  ;;  %v1939_v15 = vadd.f32 %v2702_v2, %v1842_v1 }
 0x18d   : > { %v2706_v26 = vpop.f32.mrb[60].mxu1 }
 0x18e   : > { %v2642_v40 = vpop.f32.mrb[60].mxu0  ;;  %v2707_v58 = vpop.f32.mrb[61].mxu1  ;;  %v3957_v34 = vadd.f32 %v2705_v56, %v1845_v49 }
 0x18f   : > { %v2643_v3 = vpop.f32.mrb[61].mxu0  ;;  %v2708_v32 = vadd.f32 %v2707_v58, %v2706_v26  ;;  %v2709_v33 = vpop.f32.mrb[62].mxu1 }
 0x190   : > { %v2644_v8 = vadd.f32 %v2643_v3, %v2642_v40  ;;  %v2645_v9 = vpop.f32.mrb[62].mxu0  ;;  %v2710_v37 = vpop.f32.mrb[63].mxu1 }
 0x191   : > { %v2646_v19 = vpop.f32.mrb[63].mxu0  ;;  %v2711_v10 = vadd.f32 %v2710_v37, %v2709_v33 }
 0x192   : > { %v1850_v24 = vadd.f32 %v2644_v8, %v3919_v17  ;;  %v2647_v63 = vadd.f32 %v2646_v19, %v2645_v9 }
 0x194   : > { %v1853_v46 = vadd.f32 %v2647_v63, %v3921_v36  ;;  %v1947_v0 = vadd.f32 %v2708_v32, %v1850_v24 }
 0x195   : > { %v2754_v54 = vpop.f32.mrb[64].mxu1 }
 0x196   : > { %v3966_v55 = vadd.f32 %v2754_v54, %v1931_v30  ;;  %v2746_v16 = vpop.f32.mrb[64].mxu0  ;;  %v2019_v13 = vpop.f32.mrb[65].mxu1  ;;  %v1950_v17 = vadd.f32 %v2711_v10, %v1853_v46 }
 0x197   : > { %v1996_v39 = vadd.f32 %v2746_v16, %v3931_v41  ;;  %v3969_v36 = vadd.f32 %v2019_v13, %v1923_v57  ;;  %v1987_v45 = vpop.f32.mrb[65].mxu0  ;;  %v2755_v61 = vpop.f32.mrb[66].mxu1 }
 0x198   : > { %2121 = vst [vmem:[%s3964_s12 + $0x50] sm:$0xff] %v3966_v55  ;;  %v1988_v25 = vadd.f32 %v1987_v45, %v3925_v22  ;;  %v3974_v60 = vadd.f32 %v2755_v61, %v1934_v29  ;;  %v2747_v50 = vpop.f32.mrb[66].mxu0  ;;  %v2022_v14 = vpop.f32.mrb[67].mxu1  ;;  %v2081_v24 = vmul.f32 %v3966_v55, %v3966_v55 }
 0x199   : > { %2113 = vst [vmem:[%s3964_s12 + $0x10] sm:$0xff] %v1996_v39  ;;  %2119 = vst [vmem:[%s3964_s12 + $0x40] sm:$0xff] %v3969_v36  ;;  %v1999_v41 = vadd.f32 %v2747_v50, %v3933_v44  ;;  %v2023_v57 = vadd.f32 %v2022_v14, %v3949_v31  ;;  %v1990_v43 = vpop.f32.mrb[67].mxu0  ;;  %v2073_v38 = vmul.f32 %v1996_v39, %v1996_v39 }
 0x19a   : > { %2111 = vst [vmem:[%s3964_s12] sm:$0xff] %v1988_v25  ;;  %2122 = vst [vmem:[%s3964_s12 + $0x58] sm:$0xff] %v3974_v60  ;;  %v1991_v62 = vadd.f32 %v1990_v43, %v3927_v7  ;;  %v2071_v22 = vmul.f32 %v1988_v25, %v1988_v25  ;;  %v2079_v9 = vmul.f32 %v3969_v36, %v3969_v36 }
 0x19b   : > { %2114 = vst [vmem:[%s3964_s12 + $0x18] sm:$0xff] %v1999_v41  ;;  %2120 = vst [vmem:[%s3964_s12 + $0x48] sm:$0xff] %v2023_v57  ;;  %v2074_v29 = vmul.f32 %v1999_v41, %v1999_v41  ;;  %v2080_v19 = vmul.f32 %v2023_v57, %v2023_v57 }
 0x19c   : > { %v2050_v4 = vadd.f32 %v1991_v62, %v1988_v25  ;;  %v2072_v28 = vmul.f32 %v1991_v62, %v1991_v62  ;;  %2112 = vst [vmem:[%s3964_s12 + $0x8] sm:$0xff] %v1991_v62 }
 0x19d   : > { %v2758_v23 = vpop.f32.mrb[68].mxu1 }
 0x19e   : > { %v2051_v27 = vadd.f32 %v2050_v4, %v1996_v39  ;;  %v2087_v44 = vadd.f32 %v2072_v28, %v2071_v22  ;;  %v2044_v31 = vadd.f32 %v2758_v23, %v1947_v0  ;;  %v2750_v59 = vpop.f32.mrb[68].mxu0  ;;  %v2035_v30 = vpop.f32.mrb[69].mxu1  ;;  %v2082_v0 = vmul.f32 %v3974_v60, %v3974_v60 }
 0x19f   : > { %v2012_v51 = vadd.f32 %v2750_v59, %v3943_v21  ;;  %v2036_v5 = vadd.f32 %v2035_v30, %v1939_v15  ;;  %v2003_v7 = vpop.f32.mrb[69].mxu0  ;;  %v2759_v52 = vpop.f32.mrb[70].mxu1 }
 0x1a0   : > { %v2088_v42 = vadd.f32 %v2087_v44, %v2073_v38  ;;  %2125 = vst [vmem:[%s3964_s12 + $0x70] sm:$0xff] %v2044_v31  ;;  %v2004_v2 = vadd.f32 %v2003_v7, %v3937_v6  ;;  %v2052_v48 = vadd.f32 %v2051_v27, %v1999_v41  ;;  %v2751_v11 = vpop.f32.mrb[70].mxu0  ;;  %v2038_v53 = vpop.f32.mrb[71].mxu1  ;;  %v2047_v18 = vadd.f32 %v2759_v52, %v1950_v17 }
 0x1a1   : > { %2117 = vst [vmem:[%s3964_s12 + $0x30] sm:$0xff] %v2012_v51  ;;  %2123 = vst [vmem:[%s3964_s12 + $0x60] sm:$0xff] %v2036_v5  ;;  %v2015_v21 = vadd.f32 %v2751_v11, %v3945_v35  ;;  %v2006_v20 = vpop.f32.mrb[71].mxu0  ;;  %v2039_v49 = vadd.f32 %v2038_v53, %v3957_v34  ;;  %v2077_v58 = vmul.f32 %v2012_v51, %v2012_v51 }
 0x1a2   : > { %v2053_v56 = vadd.f32 %v2052_v48, %v2004_v2  ;;  %v2075_v1 = vmul.f32 %v2004_v2, %v2004_v2  ;;  %v2089_v47 = vadd.f32 %v2088_v42, %v2074_v29  ;;  %2115 = vst [vmem:[%s3964_s12 + $0x20] sm:$0xff] %v2004_v2  ;;  %2126 = vst [vmem:[%s3964_s12 + $0x78] sm:$0xff] %v2047_v18 }
 0x1a3   : > { %2118 = vst [vmem:[%s3964_s12 + $0x38] sm:$0xff] %v2015_v21  ;;  %v2007_v6 = vadd.f32 %v2006_v20, %v3939_v12  ;;  %2124 = vst [vmem:[%s3964_s12 + $0x68] sm:$0xff] %v2039_v49  ;;  %v2078_v35 = vmul.f32 %v2015_v21, %v2015_v21  ;;  %v2083_v13 = vmul.f32 %v2036_v5, %v2036_v5 }
 0x1a4   : > { %v2090_v15 = vadd.f32 %v2089_v47, %v2075_v1  ;;  %v2085_v25 = vmul.f32 %v2044_v31, %v2044_v31  ;;  %v2086_v41 = vmul.f32 %v2047_v18, %v2047_v18 }
 0x1a5   : > { %v2054_v26 = vadd.f32 %v2053_v56, %v2007_v6  ;;  %v2076_v40 = vmul.f32 %v2007_v6, %v2007_v6  ;;  %2116 = vst [vmem:[%s3964_s12 + $0x28] sm:$0xff] %v2007_v6 }
 0x1a7   : > { %v2055_v3 = vadd.f32 %v2054_v26, %v2012_v51  ;;  %v2091_v32 = vadd.f32 %v2090_v15, %v2076_v40 }
 0x1a9   : > { %v2056_v33 = vadd.f32 %v2055_v3, %v2015_v21  ;;  %v2092_v8 = vadd.f32 %v2091_v32, %v2077_v58 }
 0x1ab   : > { %v2057_v34 = vadd.f32 %v2056_v33, %v3969_v36  ;;  %v2093_v37 = vadd.f32 %v2092_v8, %v2078_v35  ;;  %v2084_v36 = vmul.f32 %v2039_v49, %v2039_v49 }
 0x1ad   : > { %v2058_v10 = vadd.f32 %v2057_v34, %v2023_v57  ;;  %v2094_v12 = vadd.f32 %v2093_v37, %v2079_v9 }
 0x1af   : > { %v2059_v63 = vadd.f32 %v2058_v10, %v3966_v55  ;;  %v2095_v46 = vadd.f32 %v2094_v12, %v2080_v19 }
 0x1b1   : > { %v2060_v54 = vadd.f32 %v2059_v63, %v3974_v60  ;;  %v2096_v16 = vadd.f32 %v2095_v46, %v2081_v24 }
 0x1b3   : > { %v2061_v17 = vadd.f32 %v2060_v54, %v2036_v5  ;;  %v2097_v39 = vadd.f32 %v2096_v16, %v2082_v0 }
 0x1b5   : > { %v2062_v45 = vadd.f32 %v2061_v17, %v2039_v49  ;;  %v2098_v61 = vadd.f32 %v2097_v39, %v2083_v13 }
 0x1b7   : > { %v2063_v50 = vadd.f32 %v2062_v45, %v2044_v31  ;;  %v2099_v14 = vadd.f32 %v2098_v61, %v2084_v36 }
 0x1b9   : > { %v2064_v55 = vadd.f32 %v2063_v50, %v2047_v18  ;;  %v2100_v57 = vadd.f32 %v2099_v14, %v2085_v25 }
 0x1bb   : > { %v2065_v43 = vrot.slane %v2064_v55, 4  ;;  %v2101_v62 = vadd.f32 %v2100_v57, %v2086_v41 }
 0x1bd   : > { %v2066_v60 = vadd.f32 %v2065_v43, %v2064_v55  ;;  %v2102_v22 = vrot.slane %v2101_v62, 4 }
 0x1bf   : > { %v2067_v4 = vrot.slane %v2066_v60, 2  ;;  %v2103_v28 = vadd.f32 %v2102_v22, %v2101_v62 }
 0x1c1   : > { %v2068_v23 = vadd.f32 %v2067_v4, %v2066_v60  ;;  %v2104_v38 = vrot.slane %v2103_v28, 2 }
 0x1c3   : > { %v2069_v27 = vrot.slane %v2068_v23, 1  ;;  %v2105_v44 = vadd.f32 %v2104_v38, %v2103_v28 }
 0x1c5   : > { %v2106_v31 = vrot.slane %v2105_v44, 1  ;;  %v2070_v59 = vadd.f32 %v2069_v27, %v2068_v23 }
 0x1c7   : > { %v2107_v30 = vadd.f32 %v2106_v31, %v2105_v44 }
 0x1c9   : > { %v2109_v51 = vsel %vm2108_vm4, %v2070_v59, %v2107_v30 }
 0x1ca   : > { %2110 = vst [vmem:[%s494_s15] sm:$0x3] %v2109_v51 }
 0x1cb PF: > { %s19_s9 = sadd.s32 1, %s2992_s9   ;;  %s4042_s18 = sld [smem:[#allocation2_spill]] }
 0x1cc   : > { %p16_p11 = scmp.ge.s32.totalorder %s19_s9, 6   ;;  %s4043_s27 = smov %s2984_s29 }
 0x1cd   : > { %s4044_s28 = smov %s2988_s30  ;;  %s4045_s29 = smov %s4048_s10 }
 0x1ce   :  { %18 = sbr.rel (!%p16_p11) target bundleno = 3 (0x3), region = 96 }
 0x1d1   : > { %s4046_s30 = smov %s4042_s18 }

// kernel: _lambda_.3
= control target key start
LH: loop header
LB: loop body
LE: loop exit
PB: predicated region body
PF: predicated region fallthrough
CT: control target
= control target key end

     0   :  { %s3304_s13 = smov 0   ;;  %s3306_s14 = smov 0   ;;  %s4120_s0 = inlined_call_operand.vmem [shape: f32[2,16,18,128], index: 0, kind: input, shape index: {}, may-alias: {0,1,2}]   ;;  %s4121_s1 = inlined_call_operand.vmem [shape: f32[2,16,18,128], index: 1, kind: input, shape index: {}, may-alias: {0,1,2}]   ;;  %s4122_s2 = inlined_call_operand.vmem [shape: f32[2,16,18,128], index: 2, kind: input, shape index: {}, may-alias: {0,1,2}]   ;;  %s4123_s3 = inlined_call_operand.vmem [shape: bf16[1152,128], index: 3, kind: input, shape index: {}]   ;;  %s4124_s4 = inlined_call_operand.vmem [shape: f32[1,128], index: 4, kind: input, shape index: {}]   ;;  %s4125_s5 = inlined_call_operand.vmem [shape: bf16[128,128], index: 5, kind: input, shape index: {}]   ;;  %s4126_s6 = inlined_call_operand.vmem [shape: f32[1,128], index: 6, kind: input, shape index: {}]   ;;  %s4127_s7 = inlined_call_operand.vmem [shape: f32[2,16,18,128], index: 7, kind: output, shape index: {0}]   ;;  %s4128_s8 = inlined_call_operand.vmem [shape: f32[2,16,16,128], index: 8, kind: output, shape index: {1}]   ;;  %s4129_s9 = inlined_call_operand.vmem [shape: f32[2,2,2,128], index: 9, kind: output, shape index: {2}]   ;;  %s4130_s10 = inlined_call_operand.vmem [shape: f32[2,2,2,128], index: 10, kind: output, shape index: {3}]  }
   0x1   :  { %s3308_s15 = smov 0   ;;  %s3310_s16 = smov 0  }
   0x2   :  { %s3312_s17 = smov 0  }
   0x3 LB: > { %4133 = sst [smem:[#allocation2_spill]] %s3239_s15  ;;  %s30_s18 = sadd.s32 1, %s3239_s15  ;;  %s3247_s17 = sphi %s3312_s17, %s21_s17   ;;  %s3243_s16 = sphi %s3310_s16, %s4141_s16   ;;  %s3239_s15 = sphi %s3308_s15, %s4140_s15   ;;  %s3235_s14 = sphi %s3306_s14, %s4139_s14   ;;  %s3231_s13 = sphi %s3304_s13, %s4138_s13  }
   0x4   : > { %4134 = sst [smem:[#allocation3_spill]] %s3243_s16  ;;  %s33_s19 = sadd.s32 1, %s3243_s16 }
   0x5   : > { %p31_p0 = scmp.ge.s32.totalorder %s30_s18, 2  ;;  %p2621_p1 = scmp.ge.s32.totalorder %s3247_s17, 1 }
   0x6   : > { %p411_p2 = scmp.lt.s32.totalorder %s3247_s17, 5 }
   0x7   : > { %s4143_s18 = smov (%p31_p0, %s30_s18), 0  ;;  %s4145_s19 = smov (!%p31_p0, %s33_s19), %s3243_s16 }
   0x8   : > { %4135 = sst [smem:[#allocation4_spill]] %s4143_s18  ;;  %p412_p3 = pnand %p2621_p1, %p411_p2 }
   0x9   : > { %p35_p4 = scmp.ge.s32.totalorder %s4145_s19, 2  ;;  %v3129_v0 = vld [vmem:[%s4123_s3 + $0x40] sm:$0xff] (!%p412_p3)   ;;  %p512_p5 = scmp.lt.s32.totalorder (!%p412_p3), %s3235_s14, 1  ;;  %v3133_v4 = vld [vmem:[%s4123_s3 + $0x48] sm:$0xff] (!%p412_p3)   ;;  %v3137_v8 = vld [vmem:[%s4123_s3 + $0x50] sm:$0xff] (!%p412_p3)   ;;  %vm649_vm0 = vcmask (!%p412_p3), 1046528  }
   0xa   : > { %415 = sbr.rel (%p412_p3) target bundleno = 446 (0x1be), region = 48  ;;  %v3130_v1 = vld [vmem:[%s4123_s3 + $0xc0] sm:$0xff] (!%p412_p3)   ;;  %2733 = vmatprep.subr.bf16.mxu0 (!%p412_p3), %v3129_v0  ;;  %s3355_s30 = sshll.u32 (!%p412_p3), %s3231_s13, 3  ;;  %v3134_v5 = vld [vmem:[%s4123_s3 + $0xc8] sm:$0xff] (!%p412_p3)   ;;  %v3138_v9 = vld [vmem:[%s4123_s3 + $0xd0] sm:$0xff] (!%p412_p3)   ;;  %vm706_vm1 = vcmask (!%p412_p3), 1045504  }
   0xb   : > { %s4147_s19 = smov (%p35_p4, %s4145_s19), 0  ;;  %v3131_v2 = vld [vmem:[%s4123_s3] sm:$0xff] (!%p412_p3)   ;;  %2797 = vmatprep.subr.bf16.mxu1 (!%p412_p3), %v3130_v1  ;;  %p514_p6 = scmp.lt.s32.totalorder (!%p412_p3), %s3355_s30, 15  ;;  %v3135_v6 = vld [vmem:[%s4123_s3 + $0x8] sm:$0xff] (!%p412_p3)   ;;  %v3139_v10 = vld [vmem:[%s4123_s3 + $0x10] sm:$0xff] (!%p412_p3)   ;;  %vm2121_vm2 = vcmask (!%p412_p3), 1040384  }
   0xc   : > { %4136 = sst [smem:[#allocation5_spill]] %s4147_s19  ;;  %v3132_v3 = vld [vmem:[%s4123_s3 + $0x80] sm:$0xff] (!%p412_p3)   ;;  %2734 = vmatpush3.bf16.msra.mxu0 (!%p412_p3), %v3131_v2  ;;  %v3136_v7 = vld [vmem:[%s4123_s3 + $0x88] sm:$0xff] (!%p412_p3)   ;;  %s2625_s24 = sadd.s32 (!%p412_p3), 4294967295, %s3355_s30  ;;  %v3140_v11 = vld [vmem:[%s4123_s3 + $0x90] sm:$0xff] (!%p412_p3)  }
   0xd   : > { %2798 = vmatpush3.bf16.msra.mxu1 (!%p412_p3), %v3132_v3  ;;  %2735 = vmatprep.subr.bf16.mxu0 (!%p412_p3), %v3133_v4  ;;  %p524_p7 = scmp.gt.s32.totalorder (!%p412_p3), %s2625_s24, 0  ;;  %p2626_p8 = scmp.lt.s32.totalorder (!%p412_p3), %s2625_s24, 15  ;;  %v3141_v12 = vld [vmem:[%s4123_s3 + $0x58] sm:$0xff] (!%p412_p3)   ;;  %v3145_v16 = vld [vmem:[%s4123_s3 + $0x60] sm:$0xff] (!%p412_p3)   ;;  %v3149_v20 = vld [vmem:[%s4123_s3 + $0x68] sm:$0xff] (!%p412_p3)  }
   0xe   : > { %2799 = vmatprep.subr.bf16.mxu1 (!%p412_p3), %v3134_v5  ;;  %v3142_v13 = vld [vmem:[%s4123_s3 + $0xd8] sm:$0xff] (!%p412_p3)   ;;  %v3146_v17 = vld [vmem:[%s4123_s3 + $0xe0] sm:$0xff] (!%p412_p3)   ;;  %v3150_v21 = vld [vmem:[%s4123_s3 + $0xe8] sm:$0xff] (!%p412_p3)   ;;  %s540_s11 = sadd.s32 (!%p412_p3), 8, %s3355_s30  ;;  %p580_p10 = scmp.lt.s32.totalorder (!%p412_p3), %s3231_s13, 1 }
   0xf   : > { %v3143_v14 = vld [vmem:[%s4123_s3 + $0x18] sm:$0xff] (!%p412_p3)   ;;  %v3147_v18 = vld [vmem:[%s4123_s3 + $0x20] sm:$0xff] (!%p412_p3)   ;;  %v3151_v22 = vld [vmem:[%s4123_s3 + $0x28] sm:$0xff] (!%p412_p3)   ;;  %p3429_p9 = scmp.lt.s32.totalorder (!%p412_p3), %s540_s11, 15 }
  0x10   : > { %2736 = vmatpush3.bf16.msra.mxu0 (!%p412_p3), %v3135_v6  ;;  %v3144_v15 = vld [vmem:[%s4123_s3 + $0x98] sm:$0xff] (!%p412_p3)   ;;  %v3148_v19 = vld [vmem:[%s4123_s3 + $0xa0] sm:$0xff] (!%p412_p3)   ;;  %v3152_v23 = vld [vmem:[%s4123_s3 + $0xa8] sm:$0xff] (!%p412_p3)  }
  0x11   : > { %s4149_s14 = smov (!%p512_p5, %s3235_s14), 1  ;;  %2800 = vmatpush3.bf16.msra.mxu1 %v3136_v7  ;;  %2737 = vmatprep.subr.bf16.mxu0 %v3137_v8  ;;  %s4151_s24 = smov (!%p524_p7, %s2625_s24), 0  ;;  %v3153_v24 = vld [vmem:[%s4123_s3 + $0x70] sm:$0xff]   ;;  %v3157_v28 = vld [vmem:[%s4123_s3 + $0x78] sm:$0xff]   ;;  %v3161_v48 = vld [vmem:[%s4123_s3 + $0x140] sm:$0xff]  }
  0x12   : > { %s3378_s29 = scalar_select %p514_p6, %s3355_s30, 15  ;;  %2801 = vmatprep.subr.bf16.mxu1 %v3138_v9  ;;  %v3154_v25 = vld [vmem:[%s4123_s3 + $0xf0] sm:$0xff]   ;;  %v3158_v29 = vld [vmem:[%s4123_s3 + $0xf8] sm:$0xff]   ;;  %v3162_v52 = vld [vmem:[%s4123_s3 + $0x1c0] sm:$0xff]  }
  0x13   : > { %s4153_s24 = smov (!%p2626_p8, %s4151_s24), 15  ;;  %s2641_s12 = sshll.u32 %s4149_s14, 5  ;;  %v3155_v26 = vld [vmem:[%s4123_s3 + $0x30] sm:$0xff]   ;;  %v3159_v30 = vld [vmem:[%s4123_s3 + $0x38] sm:$0xff]   ;;  %v3163_v53 = vld [vmem:[%s4123_s3 + $0x100] sm:$0xff]  }
  0x14   : > { %2738 = vmatpush3.bf16.msra.mxu0 %v3139_v10  ;;  %s2640_s25 = sshll.u32 %s3378_s29, 1  ;;  %s3409_s28 = smul.u32 48, %s4149_s14  ;;  %v3156_v27 = vld [vmem:[%s4123_s3 + $0xb0] sm:$0xff]   ;;  %v3160_v31 = vld [vmem:[%s4123_s3 + $0xb8] sm:$0xff]   ;;  %v3164_v57 = vld [vmem:[%s4123_s3 + $0x180] sm:$0xff]  }
  0x15   : > { %2802 = vmatpush3.bf16.msra.mxu1 %v3140_v11  ;;  %2739 = vmatprep.subr.bf16.mxu0 %v3141_v12  ;;  %s3400_s22 = sadd.s32 %s2641_s12, %s2640_s25  ;;  %s3087_s25 = smul.u32 3, %s4153_s24  ;;  %v3165_v5 = vld [vmem:[%s4123_s3 + $0x148] sm:$0xff]  }
  0x16   : > { %2803 = vmatprep.subr.bf16.mxu1 %v3142_v13  ;;  %s3085_s23 = smul.u32 3, %s3378_s29  ;;  %s4155_s11 = smov (!%p3429_p9, %s540_s11), 15  ;;  %v3166_v9 = vld [vmem:[%s4123_s3 + $0x1c8] sm:$0xff]  }
  0x17   : > { %s532_s16 = sadd.s32 %s3087_s25, %s3409_s28  ;;  %s4157_s11 = smov (!%p3429_p9, %s4155_s11), 15  ;;  %v3167_v10 = vld [vmem:[%s4123_s3 + $0x108] sm:$0xff]  }
  0x18   : > { %2740 = vmatpush3.bf16.msra.mxu0 %v3143_v14  ;;  %s3437_s18 = sadd.s32 %s3409_s28, %s3085_s23  ;;  %s2631_s27 = sshll.u32 %s532_s16, 3  ;;  %v3168_v12 = vld [vmem:[%s4123_s3 + $0x188] sm:$0xff]  }
  0x19   : > { %2804 = vmatpush3.bf16.msra.mxu1 %v3144_v15  ;;  %2741 = vmatprep.subr.bf16.mxu0 %v3145_v16  ;;  %s2623_s21 = sshll.u32 %s3437_s18, 3  ;;  %s3459_s16 = smul.u32 3, %s4157_s11 }
  0x1a   : > { %2805 = vmatprep.subr.bf16.mxu1 %v3146_v17  ;;  %s534_s23 = scalar_lea.vmem %s4121_s1, %s2631_s27  ;;  %s3475_s11 = scalar_lea.vmem %s4120_s0, %s2623_s21 }
  0x1b   : > { %s549_s15 = sadd.s32 %s3459_s16, %s3409_s28  ;;  %v619_v32 = vld [vmem:[%s534_s23] sm:$0xff]  ;;  %v620_v33 = vld [vmem:[%s534_s23 + $0x8] sm:$0xff]  ;;  %v621_v34 = vld [vmem:[%s534_s23 + $0x10] sm:$0x3]  ;;  %s3979_s26 = scalar_lea.vmem %s4127_s7, %s2623_s21 }
  0x1c   : > { %2742 = vmatpush3.bf16.msra.mxu0 %v3147_v18  ;;  %v650_v35 = vrot.slane %v619_v32, 1  ;;  %v651_v36 = vrot.slane %v620_v33, 1  ;;  %v653_v37 = vrot.slane %v621_v34, 1  ;;  %v595_v38 = vld [vmem:[%s3475_s11] sm:$0xff]  ;;  %v596_v39 = vld [vmem:[%s3475_s11 + $0x8] sm:$0xff]  ;;  %v710_v40 = vrot.slane %v621_v34, 2 }
  0x1d   : > { %2806 = vmatpush3.bf16.msra.mxu1 %v3148_v19  ;;  %2743 = vmatprep.subr.bf16.mxu0 %v3149_v20  ;;  %v655_v41 = vrot.slane %v595_v38, 1  ;;  %v656_v42 = vrot.slane %v596_v39, 1  ;;  %v712_v43 = vrot.slane %v595_v38, 2  ;;  %v800_v46 = vpack.c.bf16 %v596_v39, %v595_v38  ;;  %v597_v58 = vld [vmem:[%s3475_s11 + $0x10] sm:$0x3]  ;;  %v598_v62 = vld [vmem:[%s3475_s11 + $0x18] sm:$0xff] }
  0x1e   : > { %2807 = vmatprep.subr.bf16.mxu1 %v3150_v21  ;;  %v652_v44 = vsel %vm649_vm0, %v650_v35, %v651_v36  ;;  %v654_v45 = vsel %vm649_vm0, %v651_v36, %v653_v37  ;;  %v797_v47 = vpack.c.bf16 %v620_v33, %v619_v32  ;;  %v707_v50 = vrot.slane %v619_v32, 2  ;;  %v599_v63 = vld [vmem:[%s3475_s11 + $0x20] sm:$0xff]  ;;  %v600_v13 = vld [vmem:[%s3475_s11 + $0x28] sm:$0x3]  ;;  %v601_v14 = vld [vmem:[%s3475_s11 + $0x30] sm:$0xff]  ;;  %s2636_s25 = sshll.u32 %s549_s15, 3 }
  0x1f   : > { %v798_v49 = vpack.c.bf16 %v654_v45, %v652_v44  ;;  %v708_v51 = vrot.slane %v620_v33, 2  ;;  %1539 = vmatprep.mubr.bf16.mxu1 %v800_v46  ;;  %v713_v54 = vrot.slane %v596_v39, 2  ;;  %v657_v60 = vsel %vm649_vm0, %v655_v41, %v656_v42  ;;  %v602_v19 = vld [vmem:[%s3475_s11 + $0x38] sm:$0xff]  ;;  %v3169_v20 = vld [vmem:[%s4123_s3 + $0x150] sm:$0xff]   ;;  %v603_v33 = vld [vmem:[%s3475_s11 + $0x40] sm:$0x3]  ;;  %s551_s28 = scalar_lea.vmem %s4122_s2, %s2636_s25 }
  0x20   : > { %2744 = vmatpush3.bf16.msra.mxu0 %v3151_v22  ;;  %v658_v61 = vrot.slane %v597_v58, 1  ;;  %v715_v0 = vrot.slane %v597_v58, 2  ;;  %v660_v1 = vrot.slane %v598_v62, 1  ;;  %v661_v3 = vrot.slane %v599_v63, 1  ;;  %v604_v37 = vld [vmem:[%s3475_s11 + $0x48] sm:$0xff]  ;;  %v605_v38 = vld [vmem:[%s3475_s11 + $0x50] sm:$0xff] }
  0x21   : > { %2808 = vmatpush3.bf16.msra.mxu1 %v3152_v23  ;;  %2745 = vmatprep.subr.bf16.mxu0 %v3153_v24  ;;  %v709_v55 = vsel %vm706_vm1, %v707_v50, %v708_v51  ;;  %v711_v56 = vsel %vm706_vm1, %v708_v51, %v710_v40  ;;  %v3505_v4 = vpack.c.bf16 %v599_v63, %v598_v62  ;;  %v717_v11 = vrot.slane %v598_v62, 2  ;;  %v3173_v41 = vld [vmem:[%s4123_s3 + $0x158] sm:$0xff]   ;;  %v3177_v58 = vld [vmem:[%s4123_s3 + $0x160] sm:$0xff]   ;;  %s4159_s13 = smov (!%p580_p10, %s3231_s13), 1  ;;  %s2643_s18 = sshll.u32 %s4149_s14, 1 }
  0x22   : > { %2809 = vmatprep.subr.bf16.mxu1 %v3154_v25  ;;  %1442 = vmatprep.mubr.bf16.mxu0 %v798_v49  ;;  %v799_v59 = vpack.c.bf16 %v711_v56, %v709_v55  ;;  %v659_v2 = vsel %vm649_vm0, %v656_v42, %v658_v61  ;;  %v714_v7 = vsel %vm706_vm1, %v712_v43, %v713_v54  ;;  %v718_v15 = vrot.slane %v599_v63, 2  ;;  %v3174_v42 = vld [vmem:[%s4123_s3 + $0x1d8] sm:$0xff]   ;;  %v3179_v61 = vld [vmem:[%s4123_s3 + $0x120] sm:$0xff]   ;;  %s583_s21 = sadd.s32 %s2643_s18, %s4159_s13 }
  0x23   : > { %v3510_v6 = vpack.c.bf16 %v659_v2, %v657_v60  ;;  %v716_v8 = vsel %vm706_vm1, %v713_v54, %v715_v0  ;;  %v662_v17 = vsel %vm649_vm0, %v660_v1, %v661_v3  ;;  %v663_v18 = vrot.slane %v600_v13, 1  ;;  %v3176_v49 = vld [vmem:[%s4123_s3 + $0x198] sm:$0xff]   ;;  %v3585_v54 = vld [vmem:[%s3475_s11 + $0x68] sm:$0xff]  ;;  %v3180_v2 = vld [vmem:[%s4123_s3 + $0x1a0] sm:$0xff]   ;;  %s2644_s25 = sshll.u32 %s583_s21, 1 }
  0x24   : > { %2746 = vmatpush3.bf16.msra.mxu0 %v3155_v26  ;;  %v3527_v16 = vpack.c.bf16 %v716_v8, %v714_v7  ;;  %v665_v21 = vrot.slane %v601_v14, 1  ;;  %v3534_v22 = vpack.c.bf16 %v602_v19, %v601_v14  ;;  %v720_v23 = vrot.slane %v600_v13, 2  ;;  %v3170_v26 = vld [vmem:[%s4123_s3 + $0x1d0] sm:$0xff]   ;;  %v606_v50 = vld [vmem:[%s3475_s11 + $0x58] sm:$0x3]  ;;  %s585_s27 = scalar_lea.vmem %s4129_s9, %s2644_s25  ;;  %s593_s15 = scalar_lea.vmem %s4130_s10, %s2644_s25 }
  0x25   : > { %2810 = vmatpush3.bf16.msra.mxu1 %v3156_v27  ;;  %2747 = vmatprep.subr.bf16.mxu0 %v3157_v28  ;;  %v664_v24 = vsel %vm649_vm0, %v661_v3, %v663_v18  ;;  %v666_v25 = vrot.slane %v602_v19, 1  ;;  %v3171_v28 = vld [vmem:[%s4123_s3 + $0x110] sm:$0xff]   ;;  %v723_v34 = vrot.slane %v602_v19, 2  ;;  %v668_v36 = vrot.slane %v603_v33, 1  ;;  %v3184_v18 = vld [vmem:[%s4123_s3 + $0x1a8] sm:$0xff]  }
  0x26   : > { %2811 = vmatprep.subr.bf16.mxu1 %v3158_v29  ;;  %v3540_v27 = vpack.c.bf16 %v664_v24, %v662_v17  ;;  %v3172_v29 = vld [vmem:[%s4123_s3 + $0x190] sm:$0xff]   ;;  %v721_v32 = vsel %vm706_vm1, %v718_v15, %v720_v23  ;;  %v670_v39 = vrot.slane %v604_v37, 1  ;;  %v671_v40 = vrot.slane %v605_v38, 1  ;;  %v612_v23 = vld [vmem:[%s3475_s11 + $0x88] sm:$0x3] }
  0x27   : > { %v667_v35 = vsel %vm649_vm0, %v665_v21, %v666_v25  ;;  %v669_v44 = vsel %vm649_vm0, %v666_v25, %v668_v36  ;;  %v673_v51 = vrot.slane %v606_v50, 1  ;;  %v727_v62 = vrot.slane %v604_v37, 2  ;;  %v609_v3 = vld [vmem:[%s3475_s11 + $0x70] sm:$0x3]  ;;  %v611_v21 = vld [vmem:[%s3475_s11 + $0x80] sm:$0xff] }
  0x28   : > { %2748 = vmatpush3.bf16.msra.mxu0 %v3159_v30  ;;  %v722_v30 = vrot.slane %v601_v14, 2  ;;  %v3566_v45 = vpack.c.bf16 %v669_v44, %v667_v35  ;;  %v676_v1 = vrot.slane %v3585_v54, 1  ;;  %v730_v8 = vrot.slane %v606_v50, 2  ;;  %v3183_v14 = vld [vmem:[%s4123_s3 + $0x128] sm:$0xff]   ;;  %v3187_v35 = vld [vmem:[%s4123_s3 + $0x130] sm:$0xff]   ;;  %v3189_v50 = vld [vmem:[%s4123_s3 + $0x178] sm:$0xff]  }
  0x29   : > { %2812 = vmatpush3.bf16.msra.mxu1 %v3160_v31  ;;  %2861 = vmatprep.subr.bf16.mxu0 %v3161_v48  ;;  %v719_v31 = vsel %vm706_vm1, %v717_v11, %v718_v15  ;;  %v3175_v48 = vld [vmem:[%s4123_s3 + $0x118] sm:$0xff]   ;;  %v3182_v11 = vld [vmem:[%s4123_s3 + $0x1e8] sm:$0xff]   ;;  %v733_v24 = vrot.slane %v3585_v54, 2  ;;  %v3188_v36 = vld [vmem:[%s4123_s3 + $0x1b0] sm:$0xff]  }
  0x2a   : > { %2925 = vmatprep.subr.bf16.mxu1 %v3162_v52  ;;  %v3563_v43 = vpack.c.bf16 %v721_v32, %v719_v31  ;;  %v672_v52 = vsel %vm649_vm0, %v670_v39, %v671_v40  ;;  %v724_v55 = vsel %vm706_vm1, %v722_v30, %v723_v34  ;;  %v681_v30 = vrot.slane %v611_v21, 1  ;;  %v3185_v32 = vld [vmem:[%s4123_s3 + $0x170] sm:$0xff]  }
  0x2b   : > { %1443 = vmatmul.mubr.bf16.vlgmr.msra.gmra.mrb[0].mxu0 %v797_v47  ;;  %v725_v47 = vrot.slane %v603_v33, 2  ;;  %v683_v31 = vrot.slane %v612_v23, 1  ;;  %v3186_v33 = vld [vmem:[%s4123_s3 + $0x1f0] sm:$0xff]  }
  0x2c   : > { %2862 = vmatpush3.bf16.msra.mxu0 %v3163_v53  ;;  %1540 = vmatmul.mubr.bf16.vlgmr.msra.gmra.mrb[0].mxu1 %v799_v59  ;;  %v3582_v53 = vld [vmem:[%s3475_s11 + $0x60] sm:$0xff] }
  0x2d   : > { %2926 = vmatpush3.bf16.msra.mxu1 %v3164_v57  ;;  %1547 = vmatprep.mubr.bf16.mxu1 %v3505_v4  ;;  %v726_v56 = vsel %vm706_vm1, %v723_v34, %v725_v47  ;;  %v674_v57 = vsel %vm649_vm0, %v671_v40, %v673_v51  ;;  %v3178_v59 = vld [vmem:[%s4123_s3 + $0x1e0] sm:$0xff]   ;;  %v675_v0 = vrot.slane %v3582_v53, 1  ;;  %v3612_v7 = vpack.c.bf16 %v3585_v54, %v3582_v53  ;;  %v613_v40 = vld [vmem:[%s3475_s11 + $0x90] sm:$0xff]  ;;  %v614_v47 = vld [vmem:[%s3475_s11 + $0x98] sm:$0xff] }
  0x2e   : > { %2863 = vmatprep.subr.bf16.mxu0 %v3165_v5  ;;  %1450 = vmatprep.mubr.bf16.mxu0 %v3510_v6  ;;  %v3597_v60 = vpack.c.bf16 %v674_v57, %v672_v52  ;;  %v3602_v63 = vpack.c.bf16 %v726_v56, %v724_v55  ;;  %v728_v5 = vrot.slane %v605_v38, 2  ;;  %v732_v19 = vrot.slane %v3582_v53, 2  ;;  %v3190_v53 = vld [vmem:[%s4123_s3 + $0x1f8] sm:$0xff]  }
  0x2f   : > { %2927 = vmatprep.subr.bf16.mxu1 %v3166_v9  ;;  %v678_v9 = vrot.slane %v609_v3, 1  ;;  %v684_v39 = vsel %vm649_vm0, %v681_v30, %v683_v31  ;;  %v686_v52 = vrot.slane %v614_v47, 1  ;;  %v3191_v56 = vld [vmem:[%s4123_s3 + $0x138] sm:$0xff]   ;;  %v3681_v57 = vpack.c.bf16 %v614_v47, %v613_v40  ;;  %v3729_v31 = vld [vmem:[%s551_s28] sm:$0xff] }
  0x30   : > { %2864 = vmatpush3.bf16.msra.mxu0 %v3167_v10  ;;  %v3181_v10 = vld [vmem:[%s4123_s3 + $0x168] sm:$0xff]   ;;  %v729_v15 = vsel %vm706_vm1, %v727_v62, %v728_v5  ;;  %v731_v17 = vsel %vm706_vm1, %v728_v5, %v730_v8  ;;  %v3696_v62 = vld [vmem:[%s4125_s5] sm:$0xff]   ;;  %v617_v8 = vld [vmem:[%s3475_s11 + $0xb0] sm:$0xff] }
  0x31   : > { %2928 = vmatpush3.bf16.msra.mxu1 %v3168_v12  ;;  %2865 = vmatprep.subr.bf16.mxu0 %v3169_v20  ;;  %v677_v12 = vsel %vm649_vm0, %v675_v0, %v676_v1  ;;  %v679_v13 = vsel %vm649_vm0, %v676_v1, %v678_v9  ;;  %v610_v20 = vld [vmem:[%s3475_s11 + $0x78] sm:$0xff]  ;;  %v616_v5 = vld [vmem:[%s3475_s11 + $0xa8] sm:$0xff] }
  0x32   : > { %2929 = vmatprep.subr.bf16.mxu1 %v3170_v26  ;;  %v3639_v25 = vpack.c.bf16 %v679_v13, %v677_v12  ;;  %v680_v26 = vrot.slane %v610_v20, 1  ;;  %v3649_v34 = vpack.c.bf16 %v611_v21, %v610_v20  ;;  %v743_v12 = vrot.slane %v614_v47, 2 }
  0x33   : > { %1451 = vmatmul.mubr.bf16.gmra.mrb[4].mxu0 %v800_v46  ;;  %v3568_v46 = vpack.c.bf16 %v605_v38, %v604_v37  ;;  %v737_v37 = vrot.slane %v610_v20, 2  ;;  %v3715_v13 = vpack.c.bf16 %v617_v8, %v616_v5 }
  0x34   : > { %1548 = vmatmul.mubr.bf16.gmra.mrb[4].mxu1 %v3527_v16  ;;  %1458 = vmatprep.mubr.bf16.mxu0 %v3540_v27  ;;  %v682_v38 = vsel %vm649_vm0, %v680_v26, %v681_v30 }
  0x35   : > { %1555 = vmatprep.mubr.bf16.mxu1 %v3534_v22  ;;  %2866 = vmatpush3.bf16.msra.mxu0 %v3171_v28  ;;  %v735_v28 = vrot.slane %v609_v3, 2  ;;  %v3671_v51 = vpack.c.bf16 %v684_v39, %v682_v38 }
  0x36   : > { %2930 = vmatpush3.bf16.msra.mxu1 %v3172_v29  ;;  %2867 = vmatprep.subr.bf16.mxu0 %v3173_v41  ;;  %v3641_v29 = vpack.c.bf16 %v731_v17, %v729_v15  ;;  %v738_v41 = vrot.slane %v611_v21, 2  ;;  %v766_v15 = vrot.slane %v616_v5, 1  ;;  %v767_v17 = vrot.slane %v617_v8, 1 }
  0x37   : > { %2931 = vmatprep.subr.bf16.mxu1 %v3174_v42  ;;  %v734_v42 = vsel %vm706_vm1, %v732_v19, %v733_v24  ;;  %v736_v44 = vsel %vm706_vm1, %v733_v24, %v735_v28  ;;  %v774_v19 = vrot.slane %v617_v8, 2  ;;  %v3207_v8 = vld [vmem:[%s4123_s3 + $0x238] sm:$0xff]  }
  0x38   : > { %v3676_v54 = vpack.c.bf16 %v736_v44, %v734_v42  ;;  %v768_v24 = vsel %vm649_vm0, %v766_v15, %v767_v17  ;;  %v790_v44 = vrot.slane %v3729_v31, 2 }
  0x39   : > { %2868 = vmatpush3.bf16.msra.mxu0 %v3175_v48  ;;  %v615_v48 = vld [vmem:[%s3475_s11 + $0xa0] sm:$0x3] }
  0x3a   : > { %2932 = vmatpush3.bf16.msra.mxu1 %v3176_v49  ;;  %2869 = vmatprep.subr.bf16.mxu0 %v3177_v58  ;;  %v685_v49 = vrot.slane %v613_v40, 1  ;;  %v688_v55 = vrot.slane %v615_v48, 1  ;;  %v740_v58 = vrot.slane %v612_v23, 2  ;;  %v618_v23 = vld [vmem:[%s3475_s11 + $0xb8] sm:$0x3]  ;;  %s2642_s11 = sshll.u32 %s3400_s22, 3 }
  0x3b   : > { %1459 = vmatmul.mubr.bf16.gmra.mrb[8].mxu0 %v3505_v4  ;;  %2933 = vmatprep.subr.bf16.mxu1 %v3178_v59  ;;  %v3192_v59 = vld [vmem:[%s4123_s3 + $0x1b8] sm:$0xff]   ;;  %v769_v26 = vrot.slane %v618_v23, 1  ;;  %v776_v30 = vrot.slane %v618_v23, 2  ;;  %s3971_s29 = scalar_lea.vmem %s4128_s8, %s2642_s11 }
  0x3c   : > { %1466 = vmatprep.mubr.bf16.mxu0 %v3566_v45  ;;  %1556 = vmatmul.mubr.bf16.gmra.mrb[8].mxu1 %v3563_v43  ;;  %v687_v0 = vsel %vm649_vm0, %v685_v49, %v686_v52  ;;  %v689_v1 = vsel %vm649_vm0, %v686_v52, %v688_v55  ;;  %v741_v3 = vsel %vm706_vm1, %v738_v41, %v740_v58  ;;  %v3196_v58 = vld [vmem:[%s4125_s5 + $0x8] sm:$0xff]  }
  0x3d   : > { %1563 = vmatprep.mubr.bf16.mxu1 %v3568_v46  ;;  %2870 = vmatpush3.bf16.msra.mxu0 %v3179_v61  ;;  %v3690_v61 = vld [vmem:[%s4123_s3 + $0x200] sm:$0xff]   ;;  %v3708_v9 = vpack.c.bf16 %v689_v1, %v687_v0  ;;  %v777_v39 = vsel %vm706_vm1, %v774_v19, %v776_v30  ;;  %v3198_v0 = vld [vmem:[%s4125_s5 + $0x10] sm:$0xff]  }
  0x3e   : > { %2934 = vmatpush3.bf16.msra.mxu1 %v3180_v2  ;;  %2871 = vmatprep.subr.bf16.mxu0 %v3181_v10  ;;  %v739_v2 = vsel %vm706_vm1, %v737_v37, %v738_v41  ;;  %v742_v10 = vrot.slane %v613_v40, 2  ;;  %v783_v37 = vrot.slane %v3729_v31, 1  ;;  %v3202_v1 = vld [vmem:[%s4125_s5 + $0x20] sm:$0xff]  }
  0x3f   : > { %2935 = vmatprep.subr.bf16.mxu1 %v3182_v11  ;;  %v3710_v11 = vpack.c.bf16 %v741_v3, %v739_v2  ;;  %v3203_v2 = vld [vmem:[%s4123_s3 + $0x228] sm:$0xff]   ;;  %v3205_v3 = vld [vmem:[%s4123_s3 + $0x230] sm:$0xff]  }
  0x40   : > { %v744_v20 = vsel %vm706_vm1, %v742_v10, %v743_v12 }
  0x41   : > { %2872 = vmatpush3.bf16.msra.mxu0 %v3183_v14  ;;  %v745_v14 = vrot.slane %v615_v48, 2 }
  0x42   : > { %2936 = vmatpush3.bf16.msra.mxu1 %v3184_v18  ;;  %2873 = vmatprep.subr.bf16.mxu0 %v3185_v32  ;;  %v773_v18 = vrot.slane %v616_v5, 2  ;;  %v3206_v5 = vld [vmem:[%s4125_s5 + $0x30] sm:$0xff]  }
  0x43   : > { %1467 = vmatmul.mubr.bf16.gmra.mrb[12].mxu0 %v3534_v22  ;;  %2937 = vmatprep.subr.bf16.mxu1 %v3186_v33  ;;  %v746_v21 = vsel %vm706_vm1, %v743_v12, %v745_v14  ;;  %v770_v33 = vsel %vm649_vm0, %v767_v17, %v769_v26 }
  0x44   : > { %1474 = vmatprep.mubr.bf16.mxu0 %v3597_v60  ;;  %1564 = vmatmul.mubr.bf16.gmra.mrb[12].mxu1 %v3602_v63  ;;  %v775_v28 = vsel %vm706_vm1, %v773_v18, %v774_v19  ;;  %v3731_v32 = vpack.c.bf16 %v746_v21, %v744_v20  ;;  %v3737_v38 = vpack.c.bf16 %v770_v33, %v768_v24 }
  0x45   : > { %1571 = vmatprep.mubr.bf16.mxu1 %v3612_v7  ;;  %2874 = vmatpush3.bf16.msra.mxu0 %v3187_v35  ;;  %v3734_v35 = vld [vmem:[%s551_s28 + $0x8] sm:$0xff]  ;;  %v3742_v42 = vpack.c.bf16 %v777_v39, %v775_v28 }
  0x46   : > { %2938 = vmatpush3.bf16.msra.mxu1 %v3188_v36  ;;  %2875 = vmatprep.subr.bf16.mxu0 %v3189_v50  ;;  %v624_v36 = vld [vmem:[%s551_s28 + $0x10] sm:$0x3]  ;;  %v784_v40 = vrot.slane %v3734_v35, 1  ;;  %v791_v47 = vrot.slane %v3734_v35, 2 }
  0x47   : > { %2939 = vmatprep.subr.bf16.mxu1 %v3190_v53  ;;  %v786_v41 = vrot.slane %v624_v36, 1  ;;  %v793_v50 = vrot.slane %v624_v36, 2 }
  0x48   : > { %v3748_v48 = vsel %vm649_vm0, %v783_v37, %v784_v40  ;;  %v3757_v53 = vsel %vm706_vm1, %v790_v44, %v791_v47 }
  0x49   : > { %2876 = vmatpush3.bf16.msra.mxu0 %v3191_v56  ;;  %v3751_v49 = vsel %vm649_vm0, %v784_v40, %v786_v41  ;;  %v3761_v55 = vsel %vm706_vm1, %v791_v47, %v793_v50  ;;  %v3195_v56 = vld [vmem:[%s4123_s3 + $0x208] sm:$0xff]  }
  0x4a   : > { %3021 = vmatprep.subr.bf16.mxu0 %v3690_v61  ;;  %2940 = vmatpush3.bf16.msra.mxu1 %v3192_v59  ;;  %v825_v52 = vpack.c.bf16 %v3751_v49, %v3748_v48  ;;  %v3197_v59 = vld [vmem:[%s4123_s3 + $0x210] sm:$0xff]  }
  0x4b   : > { %1475 = vmatmul.mubr.bf16.gmra.mrb[16].mxu0 %v3568_v46  ;;  %3053 = vmatprep.subr.bf16.mxu1 %v3696_v62 }
  0x4c   : > { %1482 = vmatprep.mubr.bf16.mxu0 %v3639_v25  ;;  %1572 = vmatmul.mubr.bf16.gmra.mrb[16].mxu1 %v3641_v29 }
  0x4d   : > { %1579 = vmatprep.mubr.bf16.mxu1 %v3649_v34 }
  0x53   : > { %1483 = vmatmul.mubr.bf16.gmra.mrb[20].mxu0 %v3612_v7 }
  0x54   : > { %1490 = vmatprep.mubr.bf16.mxu0 %v3671_v51  ;;  %1580 = vmatmul.mubr.bf16.gmra.mrb[20].mxu1 %v3676_v54 }
  0x55   : > { %1587 = vmatprep.mubr.bf16.mxu1 %v3681_v57 }
  0x5b   : > { %1491 = vmatmul.mubr.bf16.gmra.mrb[24].mxu0 %v3649_v34 }
  0x5c   : > { %1498 = vmatprep.mubr.bf16.mxu0 %v3708_v9  ;;  %1588 = vmatmul.mubr.bf16.gmra.mrb[24].mxu1 %v3710_v11 }
  0x5d   : > { %1595 = vmatprep.mubr.bf16.mxu1 %v3715_v13 }
  0x63   : > { %1499 = vmatmul.mubr.bf16.gmra.mrb[28].mxu0 %v3681_v57 }
  0x64   : > { %1636 = vmatprep.mubr.bf16.mxu0 %v3527_v16  ;;  %1596 = vmatmul.mubr.bf16.gmra.mrb[28].mxu1 %v3731_v32  ;;  %v826_v16 = vpack.c.bf16 %v3761_v55, %v3757_v53 }
  0x65   : > { %1733 = vmatprep.mubr.bf16.mxu1 %v3540_v27 }
  0x6b   : > { %1637 = vmatmul.mubr.bf16.vlgmr.msra.gmra.mrb[32].mxu0 %v3510_v6 }
  0x6c   : > { %3022 = vmatpush3.bf16.msra.mxu0 %v3690_v61  ;;  %1644 = vmatprep.mubr.bf16.mxu0 %v3563_v43  ;;  %v3200_v61 = vld [vmem:[%s4125_s5 + $0x18] sm:$0xff]  }
  0x6d   : > { %1734 = vmatmul.mubr.bf16.vlgmr.msra.gmra.mrb[32].mxu1 %v3505_v4  ;;  %3023 = vmatprep.subr.bf16.mxu0 %v3195_v56  ;;  %v3199_v4 = vld [vmem:[%s4123_s3 + $0x218] sm:$0xff]  }
  0x6e   : > { %3054 = vmatpush3.bf16.msra.mxu1 %v3696_v62  ;;  %1741 = vmatprep.mubr.bf16.mxu1 %v3566_v45  ;;  %v3201_v62 = vld [vmem:[%s4123_s3 + $0x220] sm:$0xff]  }
  0x6f   : > { %3055 = vmatprep.subr.bf16.mxu1 %v3196_v58 }
  0x70   : > { %3024 = vmatpush3.bf16.msra.mxu0 %v3195_v56 }
  0x71   : > { %3025 = vmatprep.subr.bf16.mxu0 %v3197_v59 }
  0x72   : > { %3056 = vmatpush3.bf16.msra.mxu1 %v3196_v58 }
  0x73   : > { %1645 = vmatmul.mubr.bf16.gmra.mrb[36].mxu0 %v3540_v27  ;;  %3057 = vmatprep.subr.bf16.mxu1 %v3198_v0 }
  0x74   : > { %1652 = vmatprep.mubr.bf16.mxu0 %v3602_v63  ;;  %3026 = vmatpush3.bf16.msra.mxu0 %v3197_v59 }
  0x75   : > { %1742 = vmatmul.mubr.bf16.gmra.mrb[36].mxu1 %v3534_v22  ;;  %3027 = vmatprep.subr.bf16.mxu0 %v3199_v4  ;;  %v3204_v22 = vld [vmem:[%s4125_s5 + $0x28] sm:$0xff]  }
  0x76   : > { %1749 = vmatprep.mubr.bf16.mxu1 %v3597_v60  ;;  %3058 = vmatpush3.bf16.msra.mxu1 %v3198_v0 }
  0x77   : > { %3059 = vmatprep.subr.bf16.mxu1 %v3200_v61 }
  0x78   : > { %3028 = vmatpush3.bf16.msra.mxu0 %v3199_v4 }
  0x79   : > { %3029 = vmatprep.subr.bf16.mxu0 %v3201_v62 }
  0x7a   : > { %3060 = vmatpush3.bf16.msra.mxu1 %v3200_v61 }
  0x7b   : > { %1653 = vmatmul.mubr.bf16.gmra.mrb[40].mxu0 %v3566_v45  ;;  %3061 = vmatprep.subr.bf16.mxu1 %v3202_v1 }
  0x7c   : > { %1660 = vmatprep.mubr.bf16.mxu0 %v3641_v29  ;;  %3030 = vmatpush3.bf16.msra.mxu0 %v3201_v62 }
  0x7d   : > { %1750 = vmatmul.mubr.bf16.gmra.mrb[40].mxu1 %v3568_v46  ;;  %3031 = vmatprep.subr.bf16.mxu0 %v3203_v2  ;;  %v3208_v46 = vld [vmem:[%s4125_s5 + $0x38] sm:$0xff]  }
  0x7e   : > { %1757 = vmatprep.mubr.bf16.mxu1 %v3639_v25  ;;  %3062 = vmatpush3.bf16.msra.mxu1 %v3202_v1 }
  0x7f   : > { %3063 = vmatprep.subr.bf16.mxu1 %v3204_v22 }
  0x80   : > { %3032 = vmatpush3.bf16.msra.mxu0 %v3203_v2 }
  0x81   : > { %3033 = vmatprep.subr.bf16.mxu0 %v3205_v3 }
  0x82   : > { %3064 = vmatpush3.bf16.msra.mxu1 %v3204_v22 }
  0x83   : > { %1661 = vmatmul.mubr.bf16.gmra.mrb[44].mxu0 %v3597_v60  ;;  %3065 = vmatprep.subr.bf16.mxu1 %v3206_v5 }
  0x84   : > { %1668 = vmatprep.mubr.bf16.mxu0 %v3676_v54  ;;  %3034 = vmatpush3.bf16.msra.mxu0 %v3205_v3 }
  0x85   : > { %1758 = vmatmul.mubr.bf16.gmra.mrb[44].mxu1 %v3612_v7  ;;  %3035 = vmatprep.subr.bf16.mxu0 %v3207_v8  ;;  %v824_v7 = vpack.c.bf16 %v3734_v35, %v3729_v31 }
  0x86   : > { %1765 = vmatprep.mubr.bf16.mxu1 %v3671_v51  ;;  %3066 = vmatpush3.bf16.msra.mxu1 %v3206_v5 }
  0x87   : > { %3067 = vmatprep.subr.bf16.mxu1 %v3208_v46 }
  0x88   : > { %3036 = vmatpush3.bf16.msra.mxu0 %v3207_v8 }
  0x8a   : > { %3068 = vmatpush3.bf16.msra.mxu1 %v3208_v46 }
  0x8b   : > { %1669 = vmatmul.mubr.bf16.gmra.mrb[48].mxu0 %v3639_v25 }
  0x8c   : > { %1676 = vmatprep.mubr.bf16.mxu0 %v3710_v11 }
  0x8d   : > { %1766 = vmatmul.mubr.bf16.gmra.mrb[48].mxu1 %v3649_v34 }
  0x8e   : > { %1773 = vmatprep.mubr.bf16.mxu1 %v3708_v9 }
  0x93   : > { %1677 = vmatmul.mubr.bf16.gmra.mrb[52].mxu0 %v3671_v51 }
  0x94   : > { %1684 = vmatprep.mubr.bf16.mxu0 %v3731_v32 }
  0x95   : > { %1774 = vmatmul.mubr.bf16.gmra.mrb[52].mxu1 %v3681_v57 }
  0x96   : > { %1781 = vmatprep.mubr.bf16.mxu1 %v3737_v38 }
  0x9b   : > { %1685 = vmatmul.mubr.bf16.gmra.mrb[56].mxu0 %v3708_v9 }
  0x9c   : > { %1692 = vmatprep.mubr.bf16.mxu0 %v3742_v42 }
  0x9d   : > { %1782 = vmatmul.mubr.bf16.gmra.mrb[56].mxu1 %v3715_v13 }
  0x9e   : > { %1789 = vmatprep.mubr.bf16.mxu1 %v825_v52 }
  0xa3   : > { %1693 = vmatmul.mubr.bf16.gmra.mrb[60].mxu0 %v3737_v38 }
  0xa4   : > { %3037 = vmatprep.mubr.bf16.mxu0 %v3563_v43 }
  0xa5   : > { %1790 = vmatmul.mubr.bf16.gmra.mrb[60].mxu1 %v824_v7 }
  0xa6   : > { %3069 = vmatprep.mubr.bf16.mxu1 %v3510_v6 }
  0xab   : > { %3038 = vmatmul.mubr.bf16.vlgmr.msra.gmra.mrb[64].mxu0 %v3602_v63 }
  0xac   : > { %3041 = vmatprep.mubr.bf16.mxu0 %v3641_v29 }
  0xad   : > { %3070 = vmatmul.mubr.bf16.vlgmr.msra.gmra.mrb[64].mxu1 %v3540_v27  ;;  %v3863_v27 = vld [vmem:[%s4124_s4] ss:$0 sm:$0xff] }
  0xae   : > { %3073 = vmatprep.mubr.bf16.mxu1 %v3566_v45 }
  0xb3   : > { %3042 = vmatmul.mubr.bf16.gmra.mrb[68].mxu0 %v3676_v54 }
  0xb4   : > { %3045 = vmatprep.mubr.bf16.mxu0 %v3710_v11 }
  0xb5   : > { %3074 = vmatmul.mubr.bf16.gmra.mrb[68].mxu1 %v3597_v60 }
  0xb6   : > { %3077 = vmatprep.mubr.bf16.mxu1 %v3639_v25 }
  0xbb   : > { %3046 = vmatmul.mubr.bf16.gmra.mrb[72].mxu0 %v3731_v32 }
  0xbc   : > { %3049 = vmatprep.mubr.bf16.mxu0 %v3742_v42 }
  0xbd   : > { %3078 = vmatmul.mubr.bf16.gmra.mrb[72].mxu1 %v3671_v51 }
  0xbe   : > { %3081 = vmatprep.mubr.bf16.mxu1 %v3708_v9 }
  0xc3   : > { %3050 = vmatmul.mubr.bf16.gmra.mrb[76].mxu0 %v826_v16 }
  0xc5   : > { %3082 = vmatmul.mubr.bf16.gmra.mrb[76].mxu1 %v3737_v38 }
  0xfe   : > { %v2749_v6 = vpop.f32.mrb[0].mxu0 }
  0xff   : > { %v2750_v43 = vpop.f32.mrb[1].mxu0  ;;  %v2813_v45 = vpop.f32.mrb[0].mxu1 }
 0x100   : > { %v2751_v60 = vadd.f32 %v2750_v43, %v2749_v6  ;;  %v2752_v63 = vpop.f32.mrb[2].mxu0  ;;  %v2814_v25 = vpop.f32.mrb[1].mxu1 }
 0x101   : > { %v2753_v29 = vpop.f32.mrb[3].mxu0  ;;  %v2815_v51 = vadd.f32 %v2814_v25, %v2813_v45  ;;  %v2816_v54 = vpop.f32.mrb[2].mxu1 }
 0x102   : > { %v1445_v34 = vadd.f32 %v2751_v60, %v3863_v27  ;;  %v2754_v57 = vadd.f32 %v2753_v29, %v2752_v63  ;;  %v2817_v9 = vpop.f32.mrb[3].mxu1 }
 0x103   : > { %v2818_v12 = vadd.f32 %v2817_v9, %v2816_v54 }
 0x104   : > { %v3866_v10 = vadd.f32 %v2815_v51, %v1445_v34  ;;  %v1448_v11 = vadd.f32 %v2754_v57, %v3863_v27 }
 0x106   : > { %v3869_v13 = vadd.f32 %v2818_v12, %v1448_v11  ;;  %v2755_v14 = vpop.f32.mrb[4].mxu0 }
 0x107   : > { %v2756_v15 = vpop.f32.mrb[5].mxu0  ;;  %v2819_v17 = vpop.f32.mrb[4].mxu1 }
 0x108   : > { %v2757_v18 = vadd.f32 %v2756_v15, %v2755_v14  ;;  %v2758_v19 = vpop.f32.mrb[6].mxu0  ;;  %v2820_v20 = vpop.f32.mrb[5].mxu1 }
 0x109   : > { %v2759_v21 = vpop.f32.mrb[7].mxu0  ;;  %v2821_v24 = vadd.f32 %v2820_v20, %v2819_v17  ;;  %v2822_v26 = vpop.f32.mrb[6].mxu1 }
 0x10a   : > { %v1453_v23 = vadd.f32 %v2757_v18, %v3863_v27  ;;  %v2760_v28 = vadd.f32 %v2759_v21, %v2758_v19  ;;  %v2823_v30 = vpop.f32.mrb[7].mxu1 }
 0x10b   : > { %v2824_v33 = vadd.f32 %v2823_v30, %v2822_v26 }
 0x10c   : > { %v3872_v31 = vadd.f32 %v2821_v24, %v1453_v23  ;;  %v1456_v32 = vadd.f32 %v2760_v28, %v3863_v27 }
 0x10e   : > { %v3875_v35 = vadd.f32 %v2824_v33, %v1456_v32  ;;  %v2761_v36 = vpop.f32.mrb[8].mxu0 }
 0x10f   : > { %v2762_v37 = vpop.f32.mrb[9].mxu0  ;;  %v2825_v38 = vpop.f32.mrb[8].mxu1 }
 0x110   : > { %v2763_v39 = vadd.f32 %v2762_v37, %v2761_v36  ;;  %v2764_v40 = vpop.f32.mrb[10].mxu0  ;;  %v2826_v41 = vpop.f32.mrb[9].mxu1 }
 0x111   : > { %v2765_v42 = vpop.f32.mrb[11].mxu0  ;;  %v2827_v47 = vadd.f32 %v2826_v41, %v2825_v38  ;;  %v2828_v48 = vpop.f32.mrb[10].mxu1 }
 0x112   : > { %v1461_v44 = vadd.f32 %v2763_v39, %v3863_v27  ;;  %v2766_v49 = vadd.f32 %v2765_v42, %v2764_v40  ;;  %v2829_v50 = vpop.f32.mrb[11].mxu1 }
 0x113   : > { %v2830_v55 = vadd.f32 %v2829_v50, %v2828_v48 }
 0x114   : > { %v3878_v52 = vadd.f32 %v2827_v47, %v1461_v44  ;;  %v1464_v53 = vadd.f32 %v2766_v49, %v3863_v27 }
 0x116   : > { %v3881_v16 = vadd.f32 %v2830_v55, %v1464_v53  ;;  %v2767_v56 = vpop.f32.mrb[12].mxu0 }
 0x117   : > { %v2768_v58 = vpop.f32.mrb[13].mxu0  ;;  %v2831_v59 = vpop.f32.mrb[12].mxu1 }
 0x118   : > { %v2769_v0 = vadd.f32 %v2768_v58, %v2767_v56  ;;  %v2770_v4 = vpop.f32.mrb[14].mxu0  ;;  %v2832_v61 = vpop.f32.mrb[13].mxu1 }
 0x119   : > { %v2771_v62 = vpop.f32.mrb[15].mxu0  ;;  %v2833_v2 = vadd.f32 %v2832_v61, %v2831_v59  ;;  %v2834_v22 = vpop.f32.mrb[14].mxu1 }
 0x11a   : > { %v1469_v1 = vadd.f32 %v2769_v0, %v3863_v27  ;;  %v2772_v3 = vadd.f32 %v2771_v62, %v2770_v4  ;;  %v2835_v5 = vpop.f32.mrb[15].mxu1 }
 0x11b   : > { %v2836_v7 = vadd.f32 %v2835_v5, %v2834_v22 }
 0x11c   : > { %v3884_v8 = vadd.f32 %v2833_v2, %v1469_v1  ;;  %v1472_v46 = vadd.f32 %v2772_v3, %v3863_v27 }
 0x11e   : > { %v3887_v6 = vadd.f32 %v2836_v7, %v1472_v46  ;;  %v2773_v43 = vpop.f32.mrb[16].mxu0 }
 0x11f   : > { %v2774_v45 = vpop.f32.mrb[17].mxu0  ;;  %v2837_v60 = vpop.f32.mrb[16].mxu1 }
 0x120   : > { %v2775_v63 = vadd.f32 %v2774_v45, %v2773_v43  ;;  %v2776_v25 = vpop.f32.mrb[18].mxu0  ;;  %v2838_v29 = vpop.f32.mrb[17].mxu1 }
 0x121   : > { %v2777_v34 = vpop.f32.mrb[19].mxu0  ;;  %v2839_v54 = vadd.f32 %v2838_v29, %v2837_v60  ;;  %v2840_v57 = vpop.f32.mrb[18].mxu1 }
 0x122   : > { %v1477_v51 = vadd.f32 %v2775_v63, %v3863_v27  ;;  %v2778_v9 = vadd.f32 %v2777_v34, %v2776_v25  ;;  %v2841_v11 = vpop.f32.mrb[19].mxu1 }
 0x123   : > { %v2842_v15 = vadd.f32 %v2841_v11, %v2840_v57 }
 0x124   : > { %v3890_v12 = vadd.f32 %v2839_v54, %v1477_v51  ;;  %v1480_v14 = vadd.f32 %v2778_v9, %v3863_v27 }
 0x126   : > { %v3893_v17 = vadd.f32 %v2842_v15, %v1480_v14  ;;  %v2779_v18 = vpop.f32.mrb[20].mxu0 }
 0x127   : > { %v2780_v19 = vpop.f32.mrb[21].mxu0  ;;  %v2843_v20 = vpop.f32.mrb[20].mxu1 }
 0x128   : > { %v2781_v21 = vadd.f32 %v2780_v19, %v2779_v18  ;;  %v2782_v23 = vpop.f32.mrb[22].mxu0  ;;  %v2844_v24 = vpop.f32.mrb[21].mxu1 }
 0x129   : > { %v2783_v26 = vpop.f32.mrb[23].mxu0  ;;  %v2845_v30 = vadd.f32 %v2844_v24, %v2843_v20  ;;  %v2846_v32 = vpop.f32.mrb[22].mxu1 }
 0x12a   : > { %v1485_v28 = vadd.f32 %v2781_v21, %v3863_v27  ;;  %v2784_v33 = vadd.f32 %v2783_v26, %v2782_v23  ;;  %v2847_v36 = vpop.f32.mrb[23].mxu1 }
 0x12b   : > { %v2848_v39 = vadd.f32 %v2847_v36, %v2846_v32 }
 0x12c   : > { %v3896_v37 = vadd.f32 %v2845_v30, %v1485_v28  ;;  %v1488_v38 = vadd.f32 %v2784_v33, %v3863_v27 }
 0x12e   : > { %v3899_v40 = vadd.f32 %v2848_v39, %v1488_v38  ;;  %v2785_v41 = vpop.f32.mrb[24].mxu0 }
 0x12f   : > { %v2786_v42 = vpop.f32.mrb[25].mxu0  ;;  %v2849_v44 = vpop.f32.mrb[24].mxu1 }
 0x130   : > { %v2787_v47 = vadd.f32 %v2786_v42, %v2785_v41  ;;  %v2788_v48 = vpop.f32.mrb[26].mxu0  ;;  %v2850_v49 = vpop.f32.mrb[25].mxu1 }
 0x131   : > { %v2789_v50 = vpop.f32.mrb[27].mxu0  ;;  %v2851_v55 = vadd.f32 %v2850_v49, %v2849_v44  ;;  %v2852_v56 = vpop.f32.mrb[26].mxu1 }
 0x132   : > { %v1493_v53 = vadd.f32 %v2787_v47, %v3863_v27  ;;  %v2790_v58 = vadd.f32 %v2789_v50, %v2788_v48  ;;  %v2853_v59 = vpop.f32.mrb[27].mxu1 }
 0x133   : > { %v2854_v61 = vadd.f32 %v2853_v59, %v2852_v56 }
 0x134   : > { %v3902_v0 = vadd.f32 %v2851_v55, %v1493_v53  ;;  %v1496_v4 = vadd.f32 %v2790_v58, %v3863_v27 }
 0x136   : > { %v3905_v62 = vadd.f32 %v2854_v61, %v1496_v4  ;;  %v2791_v1 = vpop.f32.mrb[28].mxu0 }
 0x137   : > { %v2792_v2 = vpop.f32.mrb[29].mxu0  ;;  %v2855_v22 = vpop.f32.mrb[28].mxu1 }
 0x138   : > { %v2793_v3 = vadd.f32 %v2792_v2, %v2791_v1  ;;  %v2794_v5 = vpop.f32.mrb[30].mxu0  ;;  %v2856_v46 = vpop.f32.mrb[29].mxu1 }
 0x139   : > { %v2795_v7 = vpop.f32.mrb[31].mxu0  ;;  %v2857_v45 = vadd.f32 %v2856_v46, %v2855_v22  ;;  %v2858_v60 = vpop.f32.mrb[30].mxu1 }
 0x13a   : > { %v1501_v43 = vadd.f32 %v2793_v3, %v3863_v27  ;;  %v2796_v63 = vadd.f32 %v2795_v7, %v2794_v5  ;;  %v2859_v25 = vpop.f32.mrb[31].mxu1 }
 0x13b   : > { %v2860_v51 = vadd.f32 %v2859_v25, %v2858_v60 }
 0x13c   : > { %v3908_v29 = vadd.f32 %v2857_v45, %v1501_v43  ;;  %v1504_v34 = vadd.f32 %v2796_v63, %v3863_v27 }
 0x13e   : > { %v3911_v54 = vadd.f32 %v2860_v51, %v1504_v34  ;;  %v2877_v57 = vpop.f32.mrb[32].mxu0 }
 0x13f   : > { %v2878_v9 = vpop.f32.mrb[33].mxu0 }
 0x140   : > { %v2941_v11 = vpop.f32.mrb[32].mxu1  ;;  %v2879_v14 = vadd.f32 %v2878_v9, %v2877_v57  ;;  %v2880_v15 = vpop.f32.mrb[34].mxu0 }
 0x141   : > { %v2942_v18 = vpop.f32.mrb[33].mxu1  ;;  %v2881_v19 = vpop.f32.mrb[35].mxu0 }
 0x142   : > { %v1639_v20 = vadd.f32 %v2879_v14, %v3866_v10  ;;  %v2943_v21 = vadd.f32 %v2942_v18, %v2941_v11  ;;  %v2944_v23 = vpop.f32.mrb[34].mxu1  ;;  %v2882_v24 = vadd.f32 %v2881_v19, %v2880_v15 }
 0x143   : > { %v2945_v26 = vpop.f32.mrb[35].mxu1 }
 0x144   : > { %v1642_v28 = vadd.f32 %v2882_v24, %v3869_v13  ;;  %v2946_v30 = vadd.f32 %v2945_v26, %v2944_v23  ;;  %v3915_v27 = vadd.f32 %v2943_v21, %v1639_v20 }
 0x146   : > { %v2883_v32 = vpop.f32.mrb[36].mxu0  ;;  %v3917_v33 = vadd.f32 %v2946_v30, %v1642_v28 }
 0x147   : > { %v2884_v36 = vpop.f32.mrb[37].mxu0 }
 0x148   : > { %v2947_v38 = vpop.f32.mrb[36].mxu1  ;;  %v2885_v39 = vadd.f32 %v2884_v36, %v2883_v32  ;;  %v2886_v41 = vpop.f32.mrb[38].mxu0 }
 0x149   : > { %v2948_v42 = vpop.f32.mrb[37].mxu1  ;;  %v2887_v44 = vpop.f32.mrb[39].mxu0 }
 0x14a   : > { %v1647_v10 = vadd.f32 %v2885_v39, %v3872_v31  ;;  %v2949_v47 = vadd.f32 %v2948_v42, %v2947_v38  ;;  %v2950_v48 = vpop.f32.mrb[38].mxu1  ;;  %v2888_v49 = vadd.f32 %v2887_v44, %v2886_v41 }
 0x14b   : > { %v2951_v50 = vpop.f32.mrb[39].mxu1 }
 0x14c   : > { %v1650_v13 = vadd.f32 %v2888_v49, %v3875_v35  ;;  %v2952_v53 = vadd.f32 %v2951_v50, %v2950_v48  ;;  %v3921_v55 = vadd.f32 %v2949_v47, %v1647_v10 }
 0x14e   : > { %v2889_v56 = vpop.f32.mrb[40].mxu0  ;;  %v3923_v58 = vadd.f32 %v2952_v53, %v1650_v13 }
 0x14f   : > { %v2890_v59 = vpop.f32.mrb[41].mxu0 }
 0x150   : > { %v2953_v4 = vpop.f32.mrb[40].mxu1  ;;  %v2891_v61 = vadd.f32 %v2890_v59, %v2889_v56  ;;  %v2892_v1 = vpop.f32.mrb[42].mxu0 }
 0x151   : > { %v2954_v2 = vpop.f32.mrb[41].mxu1  ;;  %v2893_v22 = vpop.f32.mrb[43].mxu0 }
 0x152   : > { %v1655_v31 = vadd.f32 %v2891_v61, %v3878_v52  ;;  %v2955_v3 = vadd.f32 %v2954_v2, %v2953_v4  ;;  %v2956_v5 = vpop.f32.mrb[42].mxu1  ;;  %v2894_v46 = vadd.f32 %v2893_v22, %v2892_v1 }
 0x153   : > { %v2957_v7 = vpop.f32.mrb[43].mxu1 }
 0x154   : > { %v1658_v35 = vadd.f32 %v2894_v46, %v3881_v16  ;;  %v2958_v43 = vadd.f32 %v2957_v7, %v2956_v5  ;;  %v3927_v45 = vadd.f32 %v2955_v3, %v1655_v31 }
 0x156   : > { %v2895_v60 = vpop.f32.mrb[44].mxu0  ;;  %v3929_v63 = vadd.f32 %v2958_v43, %v1658_v35 }
 0x157   : > { %v2896_v25 = vpop.f32.mrb[45].mxu0 }
 0x158   : > { %v2959_v34 = vpop.f32.mrb[44].mxu1  ;;  %v2897_v51 = vadd.f32 %v2896_v25, %v2895_v60  ;;  %v2898_v57 = vpop.f32.mrb[46].mxu0 }
 0x159   : > { %v2960_v9 = vpop.f32.mrb[45].mxu1  ;;  %v2899_v11 = vpop.f32.mrb[47].mxu0 }
 0x15a   : > { %v1663_v52 = vadd.f32 %v2897_v51, %v3884_v8  ;;  %v2961_v14 = vadd.f32 %v2960_v9, %v2959_v34  ;;  %v2962_v15 = vpop.f32.mrb[46].mxu1  ;;  %v2900_v18 = vadd.f32 %v2899_v11, %v2898_v57 }
 0x15b   : > { %v2963_v19 = vpop.f32.mrb[47].mxu1 }
 0x15c   : > { %v1666_v16 = vadd.f32 %v2900_v18, %v3887_v6  ;;  %v2964_v20 = vadd.f32 %v2963_v19, %v2962_v15  ;;  %v3933_v21 = vadd.f32 %v2961_v14, %v1663_v52 }
 0x15e   : > { %v2901_v23 = vpop.f32.mrb[48].mxu0  ;;  %v3935_v24 = vadd.f32 %v2964_v20, %v1666_v16 }
 0x15f   : > { %v2902_v26 = vpop.f32.mrb[49].mxu0 }
 0x160   : > { %v2965_v28 = vpop.f32.mrb[48].mxu1  ;;  %v2903_v30 = vadd.f32 %v2902_v26, %v2901_v23  ;;  %v2904_v32 = vpop.f32.mrb[50].mxu0 }
 0x161   : > { %v2966_v36 = vpop.f32.mrb[49].mxu1  ;;  %v2905_v38 = vpop.f32.mrb[51].mxu0 }
 0x162   : > { %v1671_v8 = vadd.f32 %v2903_v30, %v3890_v12  ;;  %v2967_v39 = vadd.f32 %v2966_v36, %v2965_v28  ;;  %v2968_v41 = vpop.f32.mrb[50].mxu1  ;;  %v2906_v42 = vadd.f32 %v2905_v38, %v2904_v32 }
 0x163   : > { %v2969_v44 = vpop.f32.mrb[51].mxu1 }
 0x164   : > { %v1674_v6 = vadd.f32 %v2906_v42, %v3893_v17  ;;  %v2970_v10 = vadd.f32 %v2969_v44, %v2968_v41  ;;  %v3939_v47 = vadd.f32 %v2967_v39, %v1671_v8  ;;  %v3963_v42 = vld [vmem:[%s4126_s6] ss:$0 sm:$0xff] }
 0x166   : > { %v2907_v48 = vpop.f32.mrb[52].mxu0  ;;  %v3941_v49 = vadd.f32 %v2970_v10, %v1674_v6 }
 0x167   : > { %v2908_v50 = vpop.f32.mrb[53].mxu0 }
 0x168   : > { %v2971_v13 = vpop.f32.mrb[52].mxu1  ;;  %v2909_v53 = vadd.f32 %v2908_v50, %v2907_v48  ;;  %v2910_v56 = vpop.f32.mrb[54].mxu0 }
 0x169   : > { %v2972_v59 = vpop.f32.mrb[53].mxu1  ;;  %v2911_v4 = vpop.f32.mrb[55].mxu0 }
 0x16a   : > { %v1679_v12 = vadd.f32 %v2909_v53, %v3896_v37  ;;  %v2973_v61 = vadd.f32 %v2972_v59, %v2971_v13  ;;  %v2974_v1 = vpop.f32.mrb[54].mxu1  ;;  %v2912_v2 = vadd.f32 %v2911_v4, %v2910_v56 }
 0x16b   : > { %v2975_v22 = vpop.f32.mrb[55].mxu1 }
 0x16c   : > { %v1682_v17 = vadd.f32 %v2912_v2, %v3899_v40  ;;  %v2976_v31 = vadd.f32 %v2975_v22, %v2974_v1  ;;  %v3945_v3 = vadd.f32 %v2973_v61, %v1679_v12 }
 0x16e   : > { %v2913_v5 = vpop.f32.mrb[56].mxu0  ;;  %v3947_v46 = vadd.f32 %v2976_v31, %v1682_v17 }
 0x16f   : > { %v2914_v7 = vpop.f32.mrb[57].mxu0 }
 0x170   : > { %v2977_v35 = vpop.f32.mrb[56].mxu1  ;;  %v2915_v43 = vadd.f32 %v2914_v7, %v2913_v5  ;;  %v2916_v60 = vpop.f32.mrb[58].mxu0 }
 0x171   : > { %v2978_v25 = vpop.f32.mrb[57].mxu1  ;;  %v2917_v34 = vpop.f32.mrb[59].mxu0 }
 0x172   : > { %v1687_v37 = vadd.f32 %v2915_v43, %v3902_v0  ;;  %v2979_v51 = vadd.f32 %v2978_v25, %v2977_v35  ;;  %v2980_v57 = vpop.f32.mrb[58].mxu1  ;;  %v2918_v9 = vadd.f32 %v2917_v34, %v2916_v60 }
 0x173   : > { %v2981_v11 = vpop.f32.mrb[59].mxu1 }
 0x174   : > { %v1690_v40 = vadd.f32 %v2918_v9, %v3905_v62  ;;  %v2982_v52 = vadd.f32 %v2981_v11, %v2980_v57  ;;  %v3951_v14 = vadd.f32 %v2979_v51, %v1687_v37 }
 0x176   : > { %v2919_v15 = vpop.f32.mrb[60].mxu0  ;;  %v3953_v18 = vadd.f32 %v2982_v52, %v1690_v40 }
 0x177   : > { %v2920_v19 = vpop.f32.mrb[61].mxu0 }
 0x178   : > { %v2983_v16 = vpop.f32.mrb[60].mxu1  ;;  %v2921_v20 = vadd.f32 %v2920_v19, %v2919_v15  ;;  %v2922_v23 = vpop.f32.mrb[62].mxu0 }
 0x179   : > { %v2984_v26 = vpop.f32.mrb[61].mxu1  ;;  %v2923_v28 = vpop.f32.mrb[63].mxu0 }
 0x17a   : > { %v1695_v0 = vadd.f32 %v2921_v20, %v3908_v29  ;;  %v2985_v30 = vadd.f32 %v2984_v26, %v2983_v16  ;;  %v2986_v32 = vpop.f32.mrb[62].mxu1  ;;  %v2924_v36 = vadd.f32 %v2923_v28, %v2922_v23 }
 0x17b   : > { %v2987_v62 = vpop.f32.mrb[63].mxu1 }
 0x17c   : > { %v1698_v38 = vadd.f32 %v2924_v36, %v3911_v54  ;;  %v2988_v8 = vadd.f32 %v2987_v62, %v2986_v32  ;;  %v3957_v39 = vadd.f32 %v2985_v30, %v1695_v0 }
 0x17e   : > { %v3039_v41 = vpop.f32.mrb[64].mxu0  ;;  %v3965_v44 = vadd.f32 %v2988_v8, %v1698_v38 }
 0x17f   : > { %v1841_v29 = vadd.f32 %v3039_v41, %v3921_v55  ;;  %v1832_v6 = vpop.f32.mrb[65].mxu0 }
 0x180   : > { %v3071_v54 = vpop.f32.mrb[64].mxu1  ;;  %v1833_v10 = vadd.f32 %v1832_v6, %v3915_v27  ;;  %v3040_v48 = vpop.f32.mrb[66].mxu0 }
 0x181   : > { %v2203_v55 = vrot.slane %v1841_v29, 7  ;;  %v2009_v50 = vadd.f32 %v3071_v54, %v3963_v42  ;;  %v2000_v13 = vpop.f32.mrb[65].mxu1  ;;  %v1844_v53 = vadd.f32 %v3040_v48, %v3923_v58  ;;  %v1835_v56 = vpop.f32.mrb[67].mxu0  ;;  %v2086_v61 = vmul.f32 %v1841_v29, %v1841_v29 }
 0x182   : > { %v2200_v59 = vrot.slane %v1833_v10, 7  ;;  %v2001_v27 = vadd.f32 %v3963_v42, %v2000_v13  ;;  %v3072_v4 = vpop.f32.mrb[66].mxu1  ;;  %v1836_v12 = vadd.f32 %v1835_v56, %v3917_v33  ;;  %v2084_v2 = vmul.f32 %v1833_v10, %v1833_v10 }
 0x183   : > { %v2265_v1 = vsel %vm2121_vm2, %v1841_v29, %v2203_v55  ;;  %2306 = vst [vmem:[%s3971_s29 + $0x10] sm:$0xff] %v2009_v50  ;;  %v2204_v22 = vrot.slane %v1844_v53, 7  ;;  %v2003_v17 = vpop.f32.mrb[67].mxu1  ;;  %v2147_v31 = vmul.f32 %v2009_v50, %v2009_v50  ;;  %v2249_v5 = vrot.slane %v1844_v53, 6 }
 0x184   : > { %2283 = vst [vmem:[%s3979_s26 + $0x18] sm:$0xff] %v2265_v1  ;;  %v2264_v58 = vsel %vm2121_vm2, %v1833_v10, %v2200_v59  ;;  %2304 = vst [vmem:[%s3971_s29] sm:$0xff] %v2001_v27  ;;  %v2012_v7 = vadd.f32 %v3072_v4, %v3963_v42  ;;  %v2063_v35 = vadd.f32 %v1836_v12, %v1833_v10  ;;  %v2201_v60 = vrot.slane %v1836_v12, 7 }
 0x185   : > { %2280 = vst [vmem:[%s3979_s26] sm:$0xff] %v2264_v58  ;;  %v2205_v33 = vsel %vm2121_vm2, %v2203_v55, %v2204_v22  ;;  %v2085_v43 = vmul.f32 %v1836_v12, %v1836_v12  ;;  %v2145_v25 = vmul.f32 %v2001_v27, %v2001_v27  ;;  %v2273_v34 = vsel %vm2121_vm2, %v2204_v22, %v2249_v5 }
 0x186   : > { %2284 = vst [vmem:[%s3979_s26 + $0x20] sm:$0xff] %v2205_v33  ;;  %2307 = vst [vmem:[%s3971_s29 + $0x18] sm:$0xff] %v2012_v7  ;;  %v2248_v37 = vrot.slane %v1836_v12, 6  ;;  %v2004_v51 = vadd.f32 %v3963_v42, %v2003_v17  ;;  %v3043_v57 = vpop.f32.mrb[68].mxu0  ;;  %v2064_v9 = vadd.f32 %v2063_v35, %v1841_v29  ;;  %v2202_v40 = vsel %vm2121_vm2, %v2200_v59, %v2201_v60 }
 0x187   : > { %2285 = vst [vmem:[%s3979_s26 + $0x28] sm:$0x3] %v2273_v34  ;;  %v2100_v11 = vadd.f32 %v2085_v43, %v2084_v2  ;;  %v4000_v52 = vadd.f32 %v3043_v57, %v3933_v21  ;;  %v1848_v15 = vpop.f32.mrb[69].mxu0  ;;  %2281 = vst [vmem:[%s3979_s26 + $0x8] sm:$0xff] %v2202_v40  ;;  %v2087_v0 = vmul.f32 %v1844_v53, %v1844_v53 }
 0x188   : > { %v2272_v19 = vsel %vm2121_vm2, %v2201_v60, %v2248_v37  ;;  %v2124_v16 = vadd.f32 %v2004_v51, %v2001_v27  ;;  %v2146_v20 = vmul.f32 %v2004_v51, %v2004_v51  ;;  %2305 = vst [vmem:[%s3971_s29 + $0x8] sm:$0xff] %v2004_v51  ;;  %v3075_v23 = vpop.f32.mrb[68].mxu1  ;;  %v1849_v26 = vadd.f32 %v1848_v15, %v3927_v45  ;;  %v3044_v28 = vpop.f32.mrb[70].mxu0 }
 0x189   : > { %v2101_v30 = vadd.f32 %v2100_v11, %v2086_v61  ;;  %2282 = vst [vmem:[%s3979_s26 + $0x10] sm:$0x3] %v2272_v19  ;;  %v2209_v32 = vrot.slane %v4000_v52, 7  ;;  %v4009_v21 = vadd.f32 %v3075_v23, %v3963_v42  ;;  %v2016_v36 = vpop.f32.mrb[69].mxu1  ;;  %v1851_v62 = vpop.f32.mrb[71].mxu0  ;;  %v2065_v41 = vadd.f32 %v2064_v9, %v1844_v53 }
 0x18a   : > { %v2125_v38 = vadd.f32 %v2124_v16, %v2009_v50  ;;  %v2161_v8 = vadd.f32 %v2146_v20, %v2145_v25  ;;  %v2088_v29 = vmul.f32 %v1849_v26, %v1849_v26  ;;  %v3076_v6 = vpop.f32.mrb[70].mxu1  ;;  %v2148_v45 = vmul.f32 %v2012_v7, %v2012_v7 }
 0x18b   : > { %v2267_v54 = vsel %vm2121_vm2, %v4000_v52, %v2209_v32  ;;  %2310 = vst [vmem:[%s3971_s29 + $0x30] sm:$0xff] %v4009_v21  ;;  %v2102_v10 = vadd.f32 %v2101_v30, %v2087_v0  ;;  %v2206_v48 = vrot.slane %v1849_v26, 7  ;;  %v2019_v55 = vpop.f32.mrb[71].mxu1  ;;  %v2066_v56 = vadd.f32 %v2065_v41, %v1849_v26 }
 0x18c   : > { %v2162_v13 = vadd.f32 %v2161_v8, %v2147_v31  ;;  %2289 = vst [vmem:[%s3979_s26 + $0x48] sm:$0xff] %v2267_v54  ;;  %v2017_v50 = vadd.f32 %v3963_v42, %v2016_v36  ;;  %v2126_v59 = vadd.f32 %v2125_v38, %v2012_v7  ;;  %v1860_v4 = vadd.f32 %v3044_v28, %v3935_v24 }
 0x18d   : > { %v2103_v53 = vadd.f32 %v2102_v10, %v2088_v29  ;;  %v2266_v27 = vsel %vm2121_vm2, %v1849_v26, %v2206_v48  ;;  %v2028_v12 = vadd.f32 %v3076_v6, %v3963_v42  ;;  %v1852_v22 = vadd.f32 %v1851_v62, %v3929_v63 }
 0x18e   : > { %2286 = vst [vmem:[%s3979_s26 + $0x30] sm:$0xff] %v2266_v27  ;;  %v2127_v61 = vadd.f32 %v2126_v59, %v2017_v50  ;;  %v2149_v1 = vmul.f32 %v2017_v50, %v2017_v50  ;;  %v2163_v2 = vadd.f32 %v2162_v13, %v2148_v45  ;;  %2308 = vst [vmem:[%s3971_s29 + $0x20] sm:$0xff] %v2017_v50  ;;  %v3047_v17 = vpop.f32.mrb[72].mxu0  ;;  %v2210_v5 = vrot.slane %v1860_v4, 7 }
 0x18f   : > { %v2090_v31 = vmul.f32 %v4000_v52, %v4000_v52  ;;  %v2151_v58 = vmul.f32 %v4009_v21, %v4009_v21  ;;  %v2251_v7 = vrot.slane %v1860_v4, 6  ;;  %2311 = vst [vmem:[%s3971_s29 + $0x38] sm:$0xff] %v2028_v12  ;;  %v1864_v24 = vpop.f32.mrb[73].mxu0  ;;  %v2067_v35 = vadd.f32 %v2066_v56, %v1852_v22 }
 0x190   : > { %v2164_v33 = vadd.f32 %v2163_v2, %v2149_v1  ;;  %v2089_v43 = vmul.f32 %v1852_v22, %v1852_v22  ;;  %v2207_v60 = vrot.slane %v1852_v22, 7  ;;  %v3079_v25 = vpop.f32.mrb[72].mxu1  ;;  %v3048_v63 = vpop.f32.mrb[74].mxu0  ;;  %v2211_v34 = vsel %vm2121_vm2, %v2209_v32, %v2210_v5 }
 0x191   : > { %v2275_v37 = vsel %vm2121_vm2, %v2210_v5, %v2251_v7  ;;  %v2250_v51 = vrot.slane %v1852_v22, 6  ;;  %v2020_v57 = vadd.f32 %v3963_v42, %v2019_v55  ;;  %v2032_v9 = vpop.f32.mrb[73].mxu1  ;;  %v1867_v11 = vpop.f32.mrb[75].mxu0  ;;  %2290 = vst [vmem:[%s3979_s26 + $0x50] sm:$0xff] %v2211_v34  ;;  %v2068_v40 = vadd.f32 %v2067_v35, %v4000_v52 }
 0x192   : > { %2291 = vst [vmem:[%s3979_s26 + $0x58] sm:$0x3] %v2275_v37  ;;  %v2104_v15 = vadd.f32 %v2103_v53, %v2089_v43  ;;  %v2208_v19 = vsel %vm2121_vm2, %v2206_v48, %v2207_v60  ;;  %v1873_v16 = vadd.f32 %v3047_v17, %v3945_v3  ;;  %v3080_v20 = vpop.f32.mrb[74].mxu1  ;;  %v4040_v0 = vadd.f32 %v3079_v25, %v3963_v42 }
 0x193   : > { %v2274_v23 = vsel %vm2121_vm2, %v2207_v60, %v2250_v51  ;;  %2287 = vst [vmem:[%s3979_s26 + $0x38] sm:$0xff] %v2208_v19  ;;  %v2128_v26 = vadd.f32 %v2127_v61, %v2020_v57  ;;  %v2150_v28 = vmul.f32 %v2020_v57, %v2020_v57  ;;  %2309 = vst [vmem:[%s3971_s29 + $0x28] sm:$0xff] %v2020_v57  ;;  %v2035_v30 = vpop.f32.mrb[75].mxu1 }
 0x194   : > { %v2091_v32 = vmul.f32 %v1860_v4, %v1860_v4  ;;  %v2105_v52 = vadd.f32 %v2104_v15, %v2090_v31  ;;  %2288 = vst [vmem:[%s3979_s26 + $0x40] sm:$0x3] %v2274_v23  ;;  %v2215_v36 = vrot.slane %v1873_v16, 7  ;;  %v1865_v62 = vadd.f32 %v1864_v24, %v3939_v47  ;;  %2314 = vst [vmem:[%s3971_s29 + $0x50] sm:$0xff] %v4040_v0 }
 0x195   : > { %v2152_v3 = vmul.f32 %v2028_v12, %v2028_v12  ;;  %v2129_v38 = vadd.f32 %v2128_v26, %v4009_v21  ;;  %v2165_v8 = vadd.f32 %v2164_v33, %v2150_v28  ;;  %v2069_v41 = vadd.f32 %v2068_v40, %v1860_v4 }
 0x196   : > { %v2269_v29 = vsel %vm2121_vm2, %v1873_v16, %v2215_v36  ;;  %v2092_v6 = vmul.f32 %v1865_v62, %v1865_v62  ;;  %v2106_v45 = vadd.f32 %v2105_v52, %v2091_v32  ;;  %v2212_v54 = vrot.slane %v1865_v62, 7  ;;  %v3051_v10 = vpop.f32.mrb[76].mxu0 }
 0x197   : > { %v2166_v48 = vadd.f32 %v2165_v8, %v2151_v58  ;;  %2295 = vst [vmem:[%s3979_s26 + $0x78] sm:$0xff] %v2269_v29  ;;  %v2070_v55 = vadd.f32 %v2069_v41, %v1865_v62  ;;  %v2033_v47 = vadd.f32 %v3963_v42, %v2032_v9  ;;  %v2130_v13 = vadd.f32 %v2129_v38, %v2028_v12  ;;  %v1880_v56 = vpop.f32.mrb[77].mxu0 }
 0x198   : > { %v2107_v21 = vadd.f32 %v2106_v45, %v2092_v6  ;;  %v2268_v50 = vsel %vm2121_vm2, %v1865_v62, %v2212_v54  ;;  %v1876_v59 = vadd.f32 %v3048_v63, %v3947_v46  ;;  %v2044_v53 = vadd.f32 %v3080_v20, %v3963_v42  ;;  %v3083_v27 = vpop.f32.mrb[76].mxu1  ;;  %v3052_v4 = vpop.f32.mrb[78].mxu0 }
 0x199   : > { %2292 = vst [vmem:[%s3979_s26 + $0x60] sm:$0xff] %v2268_v50  ;;  %v2131_v61 = vadd.f32 %v2130_v13, %v2033_v47  ;;  %v2153_v1 = vmul.f32 %v2033_v47, %v2033_v47  ;;  %v2167_v2 = vadd.f32 %v2166_v48, %v2152_v3  ;;  %2312 = vst [vmem:[%s3971_s29 + $0x40] sm:$0xff] %v2033_v47  ;;  %v2048_v17 = vpop.f32.mrb[77].mxu1  ;;  %v1883_v12 = vpop.f32.mrb[79].mxu0 }
 0x19a   : > { %v1868_v22 = vadd.f32 %v1867_v11, %v3941_v49  ;;  %v2094_v31 = vmul.f32 %v1873_v16, %v1873_v16  ;;  %v2155_v46 = vmul.f32 %v4040_v0, %v4040_v0  ;;  %v2216_v58 = vrot.slane %v1876_v59, 7  ;;  %2315 = vst [vmem:[%s3971_s29 + $0x58] sm:$0xff] %v2044_v53  ;;  %v3084_v7 = vpop.f32.mrb[78].mxu1 }
 0x19b   : > { %v2253_v5 = vrot.slane %v1876_v59, 6  ;;  %v2168_v24 = vadd.f32 %v2167_v2, %v2153_v1  ;;  %v2051_v60 = vpop.f32.mrb[79].mxu1  ;;  %v2036_v34 = vadd.f32 %v3963_v42, %v2035_v30  ;;  %v1889_v9 = vadd.f32 %v3051_v10, %v3957_v39 }
 0x19c   : > { %v2071_v33 = vadd.f32 %v2070_v55, %v1868_v22  ;;  %v2093_v35 = vmul.f32 %v1868_v22, %v1868_v22  ;;  %v2213_v43 = vrot.slane %v1868_v22, 7  ;;  %v2217_v49 = vsel %vm2121_vm2, %v2215_v36, %v2216_v58 }
 0x19d   : > { %v2277_v25 = vsel %vm2121_vm2, %v2216_v58, %v2253_v5  ;;  %v2252_v63 = vrot.slane %v1868_v22, 6  ;;  %2296 = vst [vmem:[%s3979_s26 + $0x80] sm:$0xff] %v2217_v49  ;;  %v2132_v40 = vadd.f32 %v2131_v61, %v2036_v34  ;;  %v2154_v15 = vmul.f32 %v2036_v34, %v2036_v34  ;;  %2313 = vst [vmem:[%s3971_s29 + $0x48] sm:$0xff] %v2036_v34 }
 0x19e   : > { %2297 = vst [vmem:[%s3979_s26 + $0x88] sm:$0x3] %v2277_v25  ;;  %v2072_v37 = vadd.f32 %v2071_v33, %v1873_v16  ;;  %v2108_v51 = vadd.f32 %v2107_v21, %v2093_v35  ;;  %v2214_v57 = vsel %vm2121_vm2, %v2212_v54, %v2213_v43  ;;  %v2057_v19 = vadd.f32 %v3083_v27, %v3963_v42 }
 0x19f   : > { %v2276_v11 = vsel %vm2121_vm2, %v2213_v43, %v2252_v63  ;;  %2293 = vst [vmem:[%s3979_s26 + $0x68] sm:$0xff] %v2214_v57  ;;  %v2095_v20 = vmul.f32 %v1876_v59, %v1876_v59  ;;  %v2221_v26 = vrot.slane %v1889_v9, 7  ;;  %v1881_v16 = vadd.f32 %v1880_v56, %v3951_v14 }
 0x1a0   : > { %v2109_v23 = vadd.f32 %v2108_v51, %v2094_v31  ;;  %2294 = vst [vmem:[%s3979_s26 + $0x70] sm:$0x3] %v2276_v11  ;;  %v2156_v28 = vmul.f32 %v2044_v53, %v2044_v53  ;;  %v2133_v30 = vadd.f32 %v2132_v40, %v4040_v0  ;;  %v2169_v32 = vadd.f32 %v2168_v24, %v2154_v15 }
 0x1a1   : > { %2318 = vst [vmem:[%s3971_s29 + $0x70] sm:$0xff] %v2057_v19  ;;  %v2073_v39 = vadd.f32 %v2072_v37, %v1876_v59  ;;  %v2271_v52 = vsel %vm2121_vm2, %v1889_v9, %v2221_v26  ;;  %v2096_v36 = vmul.f32 %v1881_v16, %v1881_v16  ;;  %v2218_v3 = vrot.slane %v1881_v16, 7 }
 0x1a2   : > { %v2110_v62 = vadd.f32 %v2109_v23, %v2095_v20  ;;  %v2170_v38 = vadd.f32 %v2169_v32, %v2155_v46  ;;  %2301 = vst [vmem:[%s3979_s26 + $0xa8] sm:$0xff] %v2271_v52  ;;  %v2049_v41 = vadd.f32 %v3963_v42, %v2048_v17  ;;  %v2134_v14 = vadd.f32 %v2133_v30, %v2044_v53 }
 0x1a3   : > { %v2074_v8 = vadd.f32 %v2073_v39, %v1881_v16  ;;  %v2270_v0 = vsel %vm2121_vm2, %v1881_v16, %v2218_v3  ;;  %v1892_v6 = vadd.f32 %v3052_v4, %v3965_v44  ;;  %v2060_v45 = vadd.f32 %v3084_v7, %v3963_v42 }
 0x1a4   : > { %v2111_v29 = vadd.f32 %v2110_v62, %v2096_v36  ;;  %2298 = vst [vmem:[%s3979_s26 + $0x90] sm:$0xff] %v2270_v0  ;;  %v2135_v54 = vadd.f32 %v2134_v14, %v2049_v41  ;;  %v2157_v10 = vmul.f32 %v2049_v41, %v2049_v41  ;;  %v2171_v48 = vadd.f32 %v2170_v38, %v2156_v28 }
 0x1a5   : > { %2316 = vst [vmem:[%s3971_s29 + $0x60] sm:$0xff] %v2049_v41  ;;  %v1884_v55 = vadd.f32 %v1883_v12, %v3953_v18  ;;  %v2222_v47 = vrot.slane %v1892_v6, 7  ;;  %v2255_v13 = vrot.slane %v1892_v6, 6  ;;  %2319 = vst [vmem:[%s3971_s29 + $0x78] sm:$0xff] %v2060_v45  ;;  %v2052_v4 = vadd.f32 %v3963_v42, %v2051_v60 }
 0x1a6   : > { %v2172_v56 = vadd.f32 %v2171_v48, %v2157_v10  ;;  %v2098_v61 = vmul.f32 %v1889_v9, %v1889_v9  ;;  %v2099_v31 = vmul.f32 %v1892_v6, %v1892_v6  ;;  %v2159_v42 = vmul.f32 %v2057_v19, %v2057_v19 }
 0x1a7   : > { %v2075_v21 = vadd.f32 %v2074_v8, %v1884_v55  ;;  %v2097_v50 = vmul.f32 %v1884_v55, %v1884_v55  ;;  %v2219_v44 = vrot.slane %v1884_v55, 7  ;;  %v2223_v59 = vsel %vm2121_vm2, %v2221_v26, %v2222_v47  ;;  %2317 = vst [vmem:[%s3971_s29 + $0x68] sm:$0xff] %v2052_v4 }
 0x1a8   : > { %v2279_v53 = vsel %vm2121_vm2, %v2222_v47, %v2255_v13  ;;  %v2254_v27 = vrot.slane %v1884_v55, 6  ;;  %2302 = vst [vmem:[%s3979_s26 + $0xb0] sm:$0xff] %v2223_v59  ;;  %v2136_v17 = vadd.f32 %v2135_v54, %v2052_v4  ;;  %v2158_v12 = vmul.f32 %v2052_v4, %v2052_v4 }
 0x1a9   : > { %2303 = vst [vmem:[%s3979_s26 + $0xb8] sm:$0x3] %v2279_v53  ;;  %v2076_v18 = vadd.f32 %v2075_v21, %v1889_v9  ;;  %v2112_v1 = vadd.f32 %v2111_v29, %v2097_v50  ;;  %v2220_v2 = vsel %vm2121_vm2, %v2218_v3, %v2219_v44  ;;  %v2160_v35 = vmul.f32 %v2060_v45, %v2060_v45 }
 0x1aa   : > { %v2278_v22 = vsel %vm2121_vm2, %v2219_v44, %v2254_v27  ;;  %2299 = vst [vmem:[%s3979_s26 + $0x98] sm:$0xff] %v2220_v2  ;;  %v2137_v5 = vadd.f32 %v2136_v17, %v2057_v19  ;;  %v2173_v7 = vadd.f32 %v2172_v56, %v2158_v12 }
 0x1ab   : > { %v2077_v46 = vadd.f32 %v2076_v18, %v1892_v6  ;;  %v2113_v58 = vadd.f32 %v2112_v1, %v2098_v61  ;;  %2300 = vst [vmem:[%s3979_s26 + $0xa0] sm:$0x3] %v2278_v22 }
 0x1ac   : > { %v2138_v43 = vadd.f32 %v2137_v5, %v2060_v45  ;;  %v2174_v60 = vadd.f32 %v2173_v7, %v2159_v42 }
 0x1ad   : > { %v2078_v24 = vrot.slane %v2077_v46, 4  ;;  %v2114_v33 = vadd.f32 %v2113_v58, %v2099_v31 }
 0x1ae   : > { %v2139_v63 = vrot.slane %v2138_v43, 4  ;;  %v2175_v34 = vadd.f32 %v2174_v60, %v2160_v35 }
 0x1af   : > { %v2079_v49 = vadd.f32 %v2078_v24, %v2077_v46  ;;  %v2115_v25 = vrot.slane %v2114_v33, 4 }
 0x1b0   : > { %v2140_v57 = vadd.f32 %v2139_v63, %v2138_v43  ;;  %v2176_v9 = vrot.slane %v2175_v34, 4 }
 0x1b1   : > { %v2080_v37 = vrot.slane %v2079_v49, 2  ;;  %v2116_v51 = vadd.f32 %v2115_v25, %v2114_v33 }
 0x1b2   : > { %v2141_v15 = vrot.slane %v2140_v57, 2  ;;  %v2177_v19 = vadd.f32 %v2176_v9, %v2175_v34 }
 0x1b3   : > { %v2081_v11 = vadd.f32 %v2080_v37, %v2079_v49  ;;  %v2117_v40 = vrot.slane %v2116_v51, 2 }
 0x1b4   : > { %v2142_v26 = vadd.f32 %v2141_v15, %v2140_v57  ;;  %v2178_v16 = vrot.slane %v2177_v19, 2 }
 0x1b5   : > { %v2082_v20 = vrot.slane %v2081_v11, 1  ;;  %v2118_v23 = vadd.f32 %v2117_v40, %v2116_v51 }
 0x1b6   : > { %v2143_v30 = vrot.slane %v2142_v26, 1  ;;  %v2179_v32 = vadd.f32 %v2178_v16, %v2177_v19 }
 0x1b7   : > { %v2119_v28 = vrot.slane %v2118_v23, 1  ;;  %v2083_v39 = vadd.f32 %v2082_v20, %v2081_v11 }
 0x1b8   : > { %v2180_v36 = vrot.slane %v2179_v32, 1  ;;  %v2144_v3 = vadd.f32 %v2143_v30, %v2142_v26 }
 0x1b9   : > { %v2120_v52 = vadd.f32 %v2119_v28, %v2118_v23 }
 0x1ba   : > { %v2181_v38 = vadd.f32 %v2180_v36, %v2179_v32 }
 0x1bb   : > { %v2122_v62 = vsel %vm2121_vm2, %v2083_v39, %v2120_v52 }
 0x1bc   : > { %2123 = vst [vmem:[%s585_s27] sm:$0x3] %v2122_v62  ;;  %v2182_v8 = vsel %vm2121_vm2, %v2144_v3, %v2181_v38 }
 0x1bd   : > { %2183 = vst [vmem:[%s593_s15] sm:$0x3] %v2182_v8 }
 0x1be PF: > { %s21_s17 = sadd.s32 1, %s3247_s17   ;;  %s4138_s13 = sld [smem:[#allocation2_spill]] }
 0x1bf   : > { %p18_p11 = scmp.ge.s32.totalorder %s21_s17, 6   ;;  %s4139_s14 = sld [smem:[#allocation3_spill]] }
 0x1c0   : > { %s4140_s15 = sld [smem:[#allocation4_spill]]  ;;  %s4141_s16 = sld [smem:[#allocation5_spill]] }
 0x1c1   :  { %20 = sbr.rel (!%p18_p11) target bundleno = 3 (0x3), region = 120 }

</bundles_post_ra>
